<compile_context>
chip_gen: v7x
topology: tpu7x:2x2x1
jax: 0.10.0
libtpu: 0.0.40
codegen_flags: <defaults>
</compile_context>

<pallas_src>
import math

import jax
import jax.numpy as jnp
from jax import lax
from jax.experimental import pallas as pl
from jax.experimental.pallas import tpu as pltpu

# ----------------------------- configuration --------------------------------
LSTM_SIZE = 32            # H (true hidden size of the controller LSTM)
HP = 128                  # lane-padded hidden width (one full vreg of lanes)
TANH_CONSTANT = 2.5
TEMPERATURE = 5.0
MAX_NODES = 4
OP_NAMES = ("none", "skip_connect", "nor_conv_1x1", "nor_conv_3x3", "avg_pool_3x3")
NUM_OPS = len(OP_NAMES)
NP = 128                  # lane-padded number of ops / logit width
NEG_INF = -1e30           # finite: 0 * NEG_INF == 0 (never use -inf here)

assert 4 * LSTM_SIZE == HP, "gate packing assumes the 4 gates exactly tile one vreg"

# edge2index exactly as the search space builds it
EDGE2INDEX = {}
for _i in range(1, MAX_NODES):
    for _j in range(_i):
        EDGE2INDEX["{:}<-{:}".format(_i, _j)] = len(EDGE2INDEX)
NUM_EDGE = len(EDGE2INDEX)   # 6 for max_nodes=4


# ------------------------------- the kernel ---------------------------------
def controller_kernel(x0_ref,                       # (1, HP)          input_vars (padded)
                      w0_ref, b0_ref,               # (HP, HP) bf16, (1, HP) f32   layer 0 (gate-packed)
                      w1_ref, b1_ref,               # (HP, HP) bf16, (1, HP) f32   layer 1 (gate-packed)
                      wpred_ref, bpred_ref,         # (HP, NP) bf16, (1, NP) f32   (1/T folded)
                      wembd_ref,                    # (NUM_OPS, 1, HP) f32
                      gumbel_ref,                   # (NUM_EDGE, NP)   f32 precomputed noise
                      lp_ref, ent_ref, arch_ref):   # SMEM outputs
    H = LSTM_SIZE
    lane = lax.broadcasted_iota(jnp.int32, (1, NP), 1)
    pad_mask = jnp.where(lane < NUM_OPS, 0.0, NEG_INF).astype(jnp.float32)
    hmask = (lane < H).astype(jnp.float32)          # keeps pad lanes of c exactly 0

    def lstm_cell(x, h, c, w_ref, b_ref):
        # ONE (1,128)x(128,128) MXU tile:
        #   LHS: x in lanes 0:H, h rolled to lanes H:2H (both have zero pad lanes).
        #   RHS columns: gate g in lanes g*H:(g+1)*H  (gate order i, f, g, o).
        xh = (x + pltpu.roll(h, shift=H, axis=1)).astype(jnp.bfloat16)
        gates = jnp.dot(xh, w_ref[...], preferred_element_type=jnp.float32) + b_ref[...]
        sig = jax.nn.sigmoid(gates)                 # one EUP pass: i | f | . | o
        th = jnp.tanh(gates)                        # one EUP pass: . | . | g | .
        i = sig                                     # lanes 0:H already aligned
        f = pltpu.roll(sig, shift=HP - H, axis=1)       # lanes H:2H   -> 0:H
        g = pltpu.roll(th, shift=HP - 2 * H, axis=1)    # lanes 2H:3H  -> 0:H
        o = pltpu.roll(sig, shift=HP - 3 * H, axis=1)   # lanes 3H:4H  -> 0:H
        c_new = hmask * (f * c + i * g)             # pad lanes forced back to exactly 0
        h_new = o * jnp.tanh(c_new)                 # pad lanes: finite * tanh(0) == 0
        return h_new, c_new

    x = x0_ref[...]
    zeros = jnp.zeros((1, HP), jnp.float32)
    h0 = c0 = h1 = c1 = zeros
    acc_lp = jnp.zeros((1, NP), jnp.float32)        # deferred lane reductions
    acc_plogp = jnp.zeros((1, NP), jnp.float32)

    for step in range(NUM_EDGE):                    # fully unrolled (6 steps)
        # 2-layer LSTM, seq_len = 1 (weights read at the use site, not hoisted)
        h0, c0 = lstm_cell(x, h0, c0, w0_ref, b0_ref)
        h1, c1 = lstm_cell(h0, h1, c1, w1_ref, b1_ref)

        # logits = tanh_constant * tanh((W_pred h + b) / T); 1/T folded into W,b
        raw = jnp.dot(h1.astype(jnp.bfloat16), wpred_ref[...],
                      preferred_element_type=jnp.float32) + bpred_ref[...]
        logits = TANH_CONSTANT * jnp.tanh(raw) + pad_mask     # pad lanes -> -1e30

        # softmax WITHOUT max-shift: real lanes bounded by +/-2.5, pad lanes
        # underflow exp to exactly 0.
        e = jnp.exp(logits)
        s = jnp.sum(e, axis=-1, keepdims=True)
        lse = jnp.log(s)
        logp = logits - lse
        p = e / s

        # Gumbel-max sampling with precomputed (off-critical-path) noise
        z = logits + gumbel_ref[step:step + 1, :]
        zmax = jnp.max(z)
        op_index = jnp.min(jnp.where(z == zmax, lane, NP)).astype(jnp.int32)

        onehot = (lane == op_index).astype(jnp.float32)
        acc_lp = acc_lp + onehot * logp             # log_prob(sample), lane-wise
        acc_plogp = acc_plogp + p * logp            # -entropy contribution, lane-wise

        arch_ref[step] = op_index                   # static SMEM store (unrolled step)

        # next input = embedding row of sampled op:
        # static row loads + scalar selects (no dynamic VMEM index on the critical path)
        x = wembd_ref[0] * (op_index == 0).astype(jnp.float32)
        for k in range(1, NUM_OPS):
            x = x + wembd_ref[k] * (op_index == k).astype(jnp.float32)

    lp_ref[0] = jnp.sum(acc_lp)                     # two XLU reductions total
    ent_ref[0] = -jnp.sum(acc_plogp)


# ------------------------------ the wrapper ----------------------------------
def _controller_forward(params, gumbel_noise):
    (x0, w0, b0, w1, b1, wpred, bpred, wembd) = params
    in_arrays = (x0, w0, b0, w1, b1, wpred, bpred, wembd, gumbel_noise)

    in_specs = [pl.BlockSpec(memory_space=pltpu.MemorySpace.VMEM)
                for _ in in_arrays]
    out_specs = (
        pl.BlockSpec(memory_space=pltpu.MemorySpace.SMEM),
        pl.BlockSpec(memory_space=pltpu.MemorySpace.SMEM),
        pl.BlockSpec(memory_space=pltpu.MemorySpace.SMEM),
    )
    out_shape = (
        jax.ShapeDtypeStruct((1,), jnp.float32),          # sum log_probs
        jax.ShapeDtypeStruct((1,), jnp.float32),          # sum entropys
        jax.ShapeDtypeStruct((NUM_EDGE,), jnp.int32),     # sampled_arch
    )

    # No grid / no scalar prefetch: everything fits VMEM (<150 KiB); avoid
    # grid-of-1 pipeline scaffolding entirely.
    return pl.pallas_call(
        controller_kernel,
        out_shape=out_shape,
        in_specs=in_specs,
        out_specs=out_specs,
    )(*in_arrays)


controller_forward = jax.jit(_controller_forward)


# ------------------ parameter init (deterministic, synthetic) ----------------
def init_params(key):
    H = LSTM_SIZE
    ks = jax.random.split(key, 12)

    def u(k, shape, a):
        return jax.random.uniform(k, shape, jnp.float32, -a, a)

    std = 1.0 / math.sqrt(H)   # PyTorch default LSTM / Linear init range

    input_vars = u(ks[0], (1, H), 0.1)                  # nn.init.uniform_(-0.1, 0.1)
    w_ih_l0 = u(ks[1], (4 * H, H), 0.1)
    w_hh_l0 = u(ks[2], (4 * H, H), 0.1)
    b_ih_l0 = u(ks[3], (4 * H,), std)
    b_hh_l0 = u(ks[4], (4 * H,), std)
    w_ih_l1 = u(ks[5], (4 * H, H), std)
    w_hh_l1 = u(ks[6], (4 * H, H), std)
    b_ih_l1 = u(ks[7], (4 * H,), std)
    b_hh_l1 = u(ks[8], (4 * H,), std)
    w_embd = u(ks[9], (NUM_OPS, H), 0.1)
    w_pred = u(ks[10], (NUM_OPS, H), 0.1)
    b_pred = u(ks[11], (NUM_OPS,), std)

    def fuse_lstm(w_ih, w_hh, b_ih, b_hh):
        # Gate-packed fused weight: a single (128, 128) MXU tile.
        #   rows 0:H       <- W_ih^T  (x occupies lanes 0:H of the packed LHS)
        #   rows H:2H      <- W_hh^T  (h is rolled to lanes H:2H of the packed LHS)
        #   cols g*H:(g+1)*H <- gate g (gate order i, f, g, o), so the four H-wide
        #   gate outputs exactly tile one 128-lane result vreg.
        W = jnp.zeros((HP, HP), jnp.float32)
        b = jnp.zeros((1, HP), jnp.float32)
        wih_t = w_ih.T                       # (H, 4H)
        whh_t = w_hh.T
        bias = b_ih + b_hh                   # fold the two PyTorch biases
        for g in range(4):
            W = W.at[0:H, g * H:(g + 1) * H].set(wih_t[:, g * H:(g + 1) * H])
            W = W.at[H:2 * H, g * H:(g + 1) * H].set(whh_t[:, g * H:(g + 1) * H])
            b = b.at[0, g * H:(g + 1) * H].set(bias[g * H:(g + 1) * H])
        return W.astype(jnp.bfloat16), b     # bf16 MXU operand, f32 bias

    w0, b0 = fuse_lstm(w_ih_l0, w_hh_l0, b_ih_l0, b_hh_l0)
    w1, b1 = fuse_lstm(w_ih_l1, w_hh_l1, b_ih_l1, b_hh_l1)

    # prediction head: fold 1/temperature, pad to (HP, NP) / (1, NP)
    wpred = (jnp.zeros((HP, NP), jnp.float32)
             .at[0:H, 0:NUM_OPS].set((w_pred / TEMPERATURE).T)
             .astype(jnp.bfloat16))
    bpred = jnp.zeros((1, NP), jnp.float32).at[0, 0:NUM_OPS].set(b_pred / TEMPERATURE)

    # embedding rows, lane-padded, statically indexable leading axis
    wembd = jnp.zeros((NUM_OPS, 1, HP), jnp.float32).at[:, 0, 0:H].set(w_embd)

    # initial input, lane-padded
    x0 = jnp.zeros((1, HP), jnp.float32).at[:, 0:H].set(input_vars)

    return (x0, w0, b0, w1, b1, wpred, bpred, wembd)


def convert_structure(arch):
    """Python-side equivalent of Controller.convert_structure (genotype build)."""
    # TODO(synk): returns a plain tuple-of-tuples instead of the repo's Structure container.
    genotypes = []
    for i in range(1, MAX_NODES):
        xlist = []
        for j in range(i):
            node_str = "{:}<-{:}".format(i, j)
            op_index = int(arch[EDGE2INDEX[node_str]])
            xlist.append((OP_NAMES[op_index], j))
        genotypes.append(tuple(xlist))
    return tuple(genotypes)


# ---------------------------------- main -------------------------------------
if __name__ == "__main__":
    key = jax.random.PRNGKey(0)
    pkey, skey = jax.random.split(key)

    params = init_params(pkey)
    # Gumbel noise for all edges, precomputed off the in-kernel critical path.
    # (Distributionally equivalent to torch.distributions.Categorical.sample.)
    gumbel_noise = jax.random.gumbel(skey, (NUM_EDGE, NP), jnp.float32)

    log_prob_sum, entropy_sum, sampled_arch = controller_forward(params, gumbel_noise)
    jax.block_until_ready((log_prob_sum, entropy_sum, sampled_arch))

    arch = jax.device_get(sampled_arch)
    genotype = convert_structure(arch)

    # sanity: per-edge entropy of a NUM_OPS categorical is in [0, log(NUM_OPS)]
    ent = float(entropy_sum[0])
    lp = float(log_prob_sum[0])
    assert 0.0 <= ent <= NUM_EDGE * math.log(NUM_OPS) + 1e-3, ent
    assert lp <= 1e-5, lp
    assert all(0 <= int(v) < NUM_OPS for v in arch), arch
    assert len(genotype) == MAX_NODES - 1

    print("KERNEL_OK")
</pallas_src>

<mosaic_0001>
module attributes {stable_mosaic.version = 11 : i64} {
  func.func @controller_kernel(%arg0: memref<1x128xf32, #tpu.memory_space<vmem>>, %arg1: memref<128x128xbf16, #tpu.memory_space<vmem>>, %arg2: memref<1x128xf32, #tpu.memory_space<vmem>>, %arg3: memref<128x128xbf16, #tpu.memory_space<vmem>>, %arg4: memref<1x128xf32, #tpu.memory_space<vmem>>, %arg5: memref<128x128xbf16, #tpu.memory_space<vmem>>, %arg6: memref<1x128xf32, #tpu.memory_space<vmem>>, %arg7: memref<5x1x128xf32, #tpu.memory_space<vmem>>, %arg8: memref<6x128xf32, #tpu.memory_space<vmem>>, %arg9: memref<1xf32, #tpu.memory_space<smem>>, %arg10: memref<1xf32, #tpu.memory_space<smem>>, %arg11: memref<6xi32, #tpu.memory_space<smem>>) attributes {dimension_semantics = [], scalar_prefetch = 0 : i64, scratch_operands = 0 : i64, tpu.core_type = #tpu.core_type<tc>} {
    %0 = tpu.iota {dimensions = array<i32: 1>} : vector<1x128xi32>
    %c5_i32 = arith.constant 5 : i32
    %1 = vector.broadcast %c5_i32 : i32 to vector<1x128xi32>
    %2 = arith.cmpi slt, %0, %1 : vector<1x128xi32>
    %cst = arith.constant 0.000000e+00 : f32
    %cst_0 = arith.constant -1.000000e+30 : f32
    %3 = vector.broadcast %cst : f32 to vector<1x128xf32>
    %4 = vector.broadcast %cst_0 : f32 to vector<1x128xf32>
    %5 = arith.select %2, %3, %4 : vector<1x128xi1>, vector<1x128xf32>
    %c32_i32 = arith.constant 32 : i32
    %6 = vector.broadcast %c32_i32 : i32 to vector<1x128xi32>
    %7 = arith.cmpi slt, %0, %6 : vector<1x128xi32>
    %8 = arith.extui %7 : vector<1x128xi1> to vector<1x128xi32>
    %9 = arith.sitofp %8 : vector<1x128xi32> to vector<1x128xf32>
    %c0 = arith.constant 0 : index
    %c0_1 = arith.constant 0 : index
    %10 = vector.load %arg0[%c0, %c0_1] : memref<1x128xf32, #tpu.memory_space<vmem>>, vector<1x128xf32>
    %cst_2 = arith.constant 0.000000e+00 : f32
    %11 = vector.broadcast %cst_2 : f32 to vector<1x128xf32>
    %cst_3 = arith.constant 0.000000e+00 : f32
    %12 = vector.broadcast %cst_3 : f32 to vector<1x128xf32>
    %cst_4 = arith.constant 0.000000e+00 : f32
    %13 = vector.broadcast %cst_4 : f32 to vector<1x128xf32>
    %c32_i32_5 = arith.constant 32 : i32
    %14 = tpu.dynamic_rotate %11 by %c32_i32_5 dim 1 : vector<1x128xf32>, i32 -> vector<1x128xf32>
    %15 = arith.addf %10, %14 : vector<1x128xf32>
    %16 = arith.truncf %15 : vector<1x128xf32> to vector<1x128xbf16>
    %c0_6 = arith.constant 0 : index
    %c0_7 = arith.constant 0 : index
    %17 = vector.load %arg1[%c0_6, %c0_7] : memref<128x128xbf16, #tpu.memory_space<vmem>>, vector<128x128xbf16>
    %cst_8 = arith.constant dense<0.000000e+00> : vector<1x128xf32>
    %18 = tpu.matmul %16, %17, %cst_8 {dimension_numbers = #tpu.dot_dimension_numbers<[1], [0], [0], [1], [0, 0, 1, 1], [], []>} : vector<1x128xbf16>, vector<128x128xbf16>, vector<1x128xf32> -> vector<1x128xf32>
    %c0_9 = arith.constant 0 : index
    %c0_10 = arith.constant 0 : index
    %19 = vector.load %arg2[%c0_9, %c0_10] : memref<1x128xf32, #tpu.memory_space<vmem>>, vector<1x128xf32>
    %20 = arith.addf %18, %19 : vector<1x128xf32>
    %21 = arith.negf %20 : vector<1x128xf32>
    %22 = math.exp %21 : vector<1x128xf32>
    %cst_11 = arith.constant 1.000000e+00 : f32
    %23 = vector.broadcast %cst_11 : f32 to vector<1x128xf32>
    %24 = arith.addf %23, %22 : vector<1x128xf32>
    %25 = arith.divf %23, %24 : vector<1x128xf32>
    %26 = math.tanh %20 : vector<1x128xf32>
    %c96_i32 = arith.constant 96 : i32
    %27 = tpu.dynamic_rotate %25 by %c96_i32 dim 1 : vector<1x128xf32>, i32 -> vector<1x128xf32>
    %c64_i32 = arith.constant 64 : i32
    %28 = tpu.dynamic_rotate %26 by %c64_i32 dim 1 : vector<1x128xf32>, i32 -> vector<1x128xf32>
    %c32_i32_12 = arith.constant 32 : i32
    %29 = tpu.dynamic_rotate %25 by %c32_i32_12 dim 1 : vector<1x128xf32>, i32 -> vector<1x128xf32>
    %30 = arith.mulf %27, %11 : vector<1x128xf32>
    %31 = arith.mulf %25, %28 : vector<1x128xf32>
    %32 = arith.addf %30, %31 : vector<1x128xf32>
    %33 = arith.mulf %9, %32 : vector<1x128xf32>
    %34 = math.tanh %33 : vector<1x128xf32>
    %35 = arith.mulf %29, %34 : vector<1x128xf32>
    %c32_i32_13 = arith.constant 32 : i32
    %36 = tpu.dynamic_rotate %11 by %c32_i32_13 dim 1 : vector<1x128xf32>, i32 -> vector<1x128xf32>
    %37 = arith.addf %35, %36 : vector<1x128xf32>
    %38 = arith.truncf %37 : vector<1x128xf32> to vector<1x128xbf16>
    %c0_14 = arith.constant 0 : index
    %c0_15 = arith.constant 0 : index
    %39 = vector.load %arg3[%c0_14, %c0_15] : memref<128x128xbf16, #tpu.memory_space<vmem>>, vector<128x128xbf16>
    %cst_16 = arith.constant dense<0.000000e+00> : vector<1x128xf32>
    %40 = tpu.matmul %38, %39, %cst_16 {dimension_numbers = #tpu.dot_dimension_numbers<[1], [0], [0], [1], [0, 0, 1, 1], [], []>} : vector<1x128xbf16>, vector<128x128xbf16>, vector<1x128xf32> -> vector<1x128xf32>
    %c0_17 = arith.constant 0 : index
    %c0_18 = arith.constant 0 : index
    %41 = vector.load %arg4[%c0_17, %c0_18] : memref<1x128xf32, #tpu.memory_space<vmem>>, vector<1x128xf32>
    %42 = arith.addf %40, %41 : vector<1x128xf32>
    %43 = arith.negf %42 : vector<1x128xf32>
    %44 = math.exp %43 : vector<1x128xf32>
    %cst_19 = arith.constant 1.000000e+00 : f32
    %45 = vector.broadcast %cst_19 : f32 to vector<1x128xf32>
    %46 = arith.addf %45, %44 : vector<1x128xf32>
    %47 = arith.divf %45, %46 : vector<1x128xf32>
    %48 = math.tanh %42 : vector<1x128xf32>
    %c96_i32_20 = arith.constant 96 : i32
    %49 = tpu.dynamic_rotate %47 by %c96_i32_20 dim 1 : vector<1x128xf32>, i32 -> vector<1x128xf32>
    %c64_i32_21 = arith.constant 64 : i32
    %50 = tpu.dynamic_rotate %48 by %c64_i32_21 dim 1 : vector<1x128xf32>, i32 -> vector<1x128xf32>
    %c32_i32_22 = arith.constant 32 : i32
    %51 = tpu.dynamic_rotate %47 by %c32_i32_22 dim 1 : vector<1x128xf32>, i32 -> vector<1x128xf32>
    %52 = arith.mulf %49, %11 : vector<1x128xf32>
    %53 = arith.mulf %47, %50 : vector<1x128xf32>
    %54 = arith.addf %52, %53 : vector<1x128xf32>
    %55 = arith.mulf %9, %54 : vector<1x128xf32>
    %56 = math.tanh %55 : vector<1x128xf32>
    %57 = arith.mulf %51, %56 : vector<1x128xf32>
    %58 = arith.truncf %57 : vector<1x128xf32> to vector<1x128xbf16>
    %c0_23 = arith.constant 0 : index
    %c0_24 = arith.constant 0 : index
    %59 = vector.load %arg5[%c0_23, %c0_24] : memref<128x128xbf16, #tpu.memory_space<vmem>>, vector<128x128xbf16>
    %cst_25 = arith.constant dense<0.000000e+00> : vector<1x128xf32>
    %60 = tpu.matmul %58, %59, %cst_25 {dimension_numbers = #tpu.dot_dimension_numbers<[1], [0], [0], [1], [0, 0, 1, 1], [], []>} : vector<1x128xbf16>, vector<128x128xbf16>, vector<1x128xf32> -> vector<1x128xf32>
    %c0_26 = arith.constant 0 : index
    %c0_27 = arith.constant 0 : index
    %61 = vector.load %arg6[%c0_26, %c0_27] : memref<1x128xf32, #tpu.memory_space<vmem>>, vector<1x128xf32>
    %62 = arith.addf %60, %61 : vector<1x128xf32>
    %63 = math.tanh %62 : vector<1x128xf32>
    %cst_28 = arith.constant 2.500000e+00 : f32
    %64 = vector.broadcast %cst_28 : f32 to vector<1x128xf32>
    %65 = arith.mulf %64, %63 : vector<1x128xf32>
    %66 = arith.addf %65, %5 : vector<1x128xf32>
    %67 = math.exp %66 : vector<1x128xf32>
    %cst_29 = arith.constant dense<0.000000e+00> : vector<1xf32>
    %68 = vector.multi_reduction <add>, %67, %cst_29 [1] : vector<1x128xf32> to vector<1xf32>
    %69 = vector.shape_cast %68 : vector<1xf32> to vector<1x1xf32>
    %70 = math.log %69 : vector<1x1xf32>
    %71 = vector.broadcast %70 : vector<1x1xf32> to vector<1x128xf32>
    %72 = arith.subf %66, %71 : vector<1x128xf32>
    %73 = vector.broadcast %69 : vector<1x1xf32> to vector<1x128xf32>
    %74 = arith.divf %67, %73 : vector<1x128xf32>
    %c0_30 = arith.constant 0 : index
    %c0_31 = arith.constant 0 : index
    %75 = vector.load %arg8[%c0_30, %c0_31] : memref<6x128xf32, #tpu.memory_space<vmem>>, vector<1x128xf32>
    %76 = arith.addf %66, %75 : vector<1x128xf32>
    %77 = vector.shape_cast %76 : vector<1x128xf32> to vector<1x1x128xf32>
    %cst_32 = arith.constant dense<0xFF800000> : vector<1xf32>
    %78 = vector.multi_reduction <maximumf>, %77, %cst_32 [1, 2] : vector<1x1x128xf32> to vector<1xf32>
    %79 = vector.shape_cast %78 : vector<1xf32> to vector<1x1x1xf32>
    %80 = vector.extract %79[0, 0, 0] : f32 from vector<1x1x1xf32>
    %81 = vector.broadcast %80 : f32 to vector<1x128xf32>
    %82 = arith.cmpf oeq, %76, %81 : vector<1x128xf32>
    %c128_i32 = arith.constant 128 : i32
    %83 = vector.broadcast %c128_i32 : i32 to vector<1x128xi32>
    %84 = arith.select %82, %0, %83 : vector<1x128xi1>, vector<1x128xi32>
    %85 = vector.shape_cast %84 : vector<1x128xi32> to vector<1x1x128xi32>
    %cst_33 = arith.constant dense<2147483647> : vector<1xi32>
    %86 = vector.multi_reduction <minsi>, %85, %cst_33 [1, 2] : vector<1x1x128xi32> to vector<1xi32>
    %87 = vector.shape_cast %86 : vector<1xi32> to vector<1x1x1xi32>
    %88 = vector.extract %87[0, 0, 0] : i32 from vector<1x1x1xi32>
    %89 = vector.broadcast %88 : i32 to vector<1x128xi32>
    %90 = arith.cmpi eq, %0, %89 : vector<1x128xi32>
    %91 = arith.extui %90 : vector<1x128xi1> to vector<1x128xi32>
    %92 = arith.sitofp %91 : vector<1x128xi32> to vector<1x128xf32>
    %93 = arith.mulf %92, %72 : vector<1x128xf32>
    %94 = arith.addf %12, %93 : vector<1x128xf32>
    %95 = arith.mulf %74, %72 : vector<1x128xf32>
    %96 = arith.addf %13, %95 : vector<1x128xf32>
    %c0_34 = arith.constant 0 : index
    %97 = memref.load %arg11[%c0_34] : memref<6xi32, #tpu.memory_space<smem>>
    memref.store %88, %arg11[%c0_34] : memref<6xi32, #tpu.memory_space<smem>>
    %c0_35 = arith.constant 0 : index
    %c0_36 = arith.constant 0 : index
    %c0_37 = arith.constant 0 : index
    %98 = vector.load %arg7[%c0_35, %c0_36, %c0_37] : memref<5x1x128xf32, #tpu.memory_space<vmem>>, vector<1x1x128xf32>
    %99 = vector.shape_cast %98 : vector<1x1x128xf32> to vector<1x128xf32>
    %c0_i32 = arith.constant 0 : i32
    %100 = arith.cmpi eq, %88, %c0_i32 : i32
    %101 = arith.extui %100 : i1 to i32
    %102 = arith.sitofp %101 : i32 to f32
    %103 = vector.broadcast %102 : f32 to vector<1x128xf32>
    %104 = arith.mulf %99, %103 : vector<1x128xf32>
    %c1 = arith.constant 1 : index
    %c0_38 = arith.constant 0 : index
    %c0_39 = arith.constant 0 : index
    %105 = vector.load %arg7[%c1, %c0_38, %c0_39] : memref<5x1x128xf32, #tpu.memory_space<vmem>>, vector<1x1x128xf32>
    %106 = vector.shape_cast %105 : vector<1x1x128xf32> to vector<1x128xf32>
    %c1_i32 = arith.constant 1 : i32
    %107 = arith.cmpi eq, %88, %c1_i32 : i32
    %108 = arith.extui %107 : i1 to i32
    %109 = arith.sitofp %108 : i32 to f32
    %110 = vector.broadcast %109 : f32 to vector<1x128xf32>
    %111 = arith.mulf %106, %110 : vector<1x128xf32>
    %112 = arith.addf %104, %111 : vector<1x128xf32>
    %c2 = arith.constant 2 : index
    %c0_40 = arith.constant 0 : index
    %c0_41 = arith.constant 0 : index
    %113 = vector.load %arg7[%c2, %c0_40, %c0_41] : memref<5x1x128xf32, #tpu.memory_space<vmem>>, vector<1x1x128xf32>
    %114 = vector.shape_cast %113 : vector<1x1x128xf32> to vector<1x128xf32>
    %c2_i32 = arith.constant 2 : i32
    %115 = arith.cmpi eq, %88, %c2_i32 : i32
    %116 = arith.extui %115 : i1 to i32
    %117 = arith.sitofp %116 : i32 to f32
    %118 = vector.broadcast %117 : f32 to vector<1x128xf32>
    %119 = arith.mulf %114, %118 : vector<1x128xf32>
    %120 = arith.addf %112, %119 : vector<1x128xf32>
    %c3 = arith.constant 3 : index
    %c0_42 = arith.constant 0 : index
    %c0_43 = arith.constant 0 : index
    %121 = vector.load %arg7[%c3, %c0_42, %c0_43] : memref<5x1x128xf32, #tpu.memory_space<vmem>>, vector<1x1x128xf32>
    %122 = vector.shape_cast %121 : vector<1x1x128xf32> to vector<1x128xf32>
    %c3_i32 = arith.constant 3 : i32
    %123 = arith.cmpi eq, %88, %c3_i32 : i32
    %124 = arith.extui %123 : i1 to i32
    %125 = arith.sitofp %124 : i32 to f32
    %126 = vector.broadcast %125 : f32 to vector<1x128xf32>
    %127 = arith.mulf %122, %126 : vector<1x128xf32>
    %128 = arith.addf %120, %127 : vector<1x128xf32>
    %c4 = arith.constant 4 : index
    %c0_44 = arith.constant 0 : index
    %c0_45 = arith.constant 0 : index
    %129 = vector.load %arg7[%c4, %c0_44, %c0_45] : memref<5x1x128xf32, #tpu.memory_space<vmem>>, vector<1x1x128xf32>
    %130 = vector.shape_cast %129 : vector<1x1x128xf32> to vector<1x128xf32>
    %c4_i32 = arith.constant 4 : i32
    %131 = arith.cmpi eq, %88, %c4_i32 : i32
    %132 = arith.extui %131 : i1 to i32
    %133 = arith.sitofp %132 : i32 to f32
    %134 = vector.broadcast %133 : f32 to vector<1x128xf32>
    %135 = arith.mulf %130, %134 : vector<1x128xf32>
    %136 = arith.addf %128, %135 : vector<1x128xf32>
    %c32_i32_46 = arith.constant 32 : i32
    %137 = tpu.dynamic_rotate %35 by %c32_i32_46 dim 1 : vector<1x128xf32>, i32 -> vector<1x128xf32>
    %138 = arith.addf %136, %137 : vector<1x128xf32>
    %139 = arith.truncf %138 : vector<1x128xf32> to vector<1x128xbf16>
    %c0_47 = arith.constant 0 : index
    %c0_48 = arith.constant 0 : index
    %140 = vector.load %arg1[%c0_47, %c0_48] : memref<128x128xbf16, #tpu.memory_space<vmem>>, vector<128x128xbf16>
    %cst_49 = arith.constant dense<0.000000e+00> : vector<1x128xf32>
    %141 = tpu.matmul %139, %140, %cst_49 {dimension_numbers = #tpu.dot_dimension_numbers<[1], [0], [0], [1], [0, 0, 1, 1], [], []>} : vector<1x128xbf16>, vector<128x128xbf16>, vector<1x128xf32> -> vector<1x128xf32>
    %c0_50 = arith.constant 0 : index
    %c0_51 = arith.constant 0 : index
    %142 = vector.load %arg2[%c0_50, %c0_51] : memref<1x128xf32, #tpu.memory_space<vmem>>, vector<1x128xf32>
    %143 = arith.addf %141, %142 : vector<1x128xf32>
    %144 = arith.negf %143 : vector<1x128xf32>
    %145 = math.exp %144 : vector<1x128xf32>
    %cst_52 = arith.constant 1.000000e+00 : f32
    %146 = vector.broadcast %cst_52 : f32 to vector<1x128xf32>
    %147 = arith.addf %146, %145 : vector<1x128xf32>
    %148 = arith.divf %146, %147 : vector<1x128xf32>
    %149 = math.tanh %143 : vector<1x128xf32>
    %c96_i32_53 = arith.constant 96 : i32
    %150 = tpu.dynamic_rotate %148 by %c96_i32_53 dim 1 : vector<1x128xf32>, i32 -> vector<1x128xf32>
    %c64_i32_54 = arith.constant 64 : i32
    %151 = tpu.dynamic_rotate %149 by %c64_i32_54 dim 1 : vector<1x128xf32>, i32 -> vector<1x128xf32>
    %c32_i32_55 = arith.constant 32 : i32
    %152 = tpu.dynamic_rotate %148 by %c32_i32_55 dim 1 : vector<1x128xf32>, i32 -> vector<1x128xf32>
    %153 = arith.mulf %150, %33 : vector<1x128xf32>
    %154 = arith.mulf %148, %151 : vector<1x128xf32>
    %155 = arith.addf %153, %154 : vector<1x128xf32>
    %156 = arith.mulf %9, %155 : vector<1x128xf32>
    %157 = math.tanh %156 : vector<1x128xf32>
    %158 = arith.mulf %152, %157 : vector<1x128xf32>
    %c32_i32_56 = arith.constant 32 : i32
    %159 = tpu.dynamic_rotate %57 by %c32_i32_56 dim 1 : vector<1x128xf32>, i32 -> vector<1x128xf32>
    %160 = arith.addf %158, %159 : vector<1x128xf32>
    %161 = arith.truncf %160 : vector<1x128xf32> to vector<1x128xbf16>
    %c0_57 = arith.constant 0 : index
    %c0_58 = arith.constant 0 : index
    %162 = vector.load %arg3[%c0_57, %c0_58] : memref<128x128xbf16, #tpu.memory_space<vmem>>, vector<128x128xbf16>
    %cst_59 = arith.constant dense<0.000000e+00> : vector<1x128xf32>
    %163 = tpu.matmul %161, %162, %cst_59 {dimension_numbers = #tpu.dot_dimension_numbers<[1], [0], [0], [1], [0, 0, 1, 1], [], []>} : vector<1x128xbf16>, vector<128x128xbf16>, vector<1x128xf32> -> vector<1x128xf32>
    %c0_60 = arith.constant 0 : index
    %c0_61 = arith.constant 0 : index
    %164 = vector.load %arg4[%c0_60, %c0_61] : memref<1x128xf32, #tpu.memory_space<vmem>>, vector<1x128xf32>
    %165 = arith.addf %163, %164 : vector<1x128xf32>
    %166 = arith.negf %165 : vector<1x128xf32>
    %167 = math.exp %166 : vector<1x128xf32>
    %cst_62 = arith.constant 1.000000e+00 : f32
    %168 = vector.broadcast %cst_62 : f32 to vector<1x128xf32>
    %169 = arith.addf %168, %167 : vector<1x128xf32>
    %170 = arith.divf %168, %169 : vector<1x128xf32>
    %171 = math.tanh %165 : vector<1x128xf32>
    %c96_i32_63 = arith.constant 96 : i32
    %172 = tpu.dynamic_rotate %170 by %c96_i32_63 dim 1 : vector<1x128xf32>, i32 -> vector<1x128xf32>
    %c64_i32_64 = arith.constant 64 : i32
    %173 = tpu.dynamic_rotate %171 by %c64_i32_64 dim 1 : vector<1x128xf32>, i32 -> vector<1x128xf32>
    %c32_i32_65 = arith.constant 32 : i32
    %174 = tpu.dynamic_rotate %170 by %c32_i32_65 dim 1 : vector<1x128xf32>, i32 -> vector<1x128xf32>
    %175 = arith.mulf %172, %55 : vector<1x128xf32>
    %176 = arith.mulf %170, %173 : vector<1x128xf32>
    %177 = arith.addf %175, %176 : vector<1x128xf32>
    %178 = arith.mulf %9, %177 : vector<1x128xf32>
    %179 = math.tanh %178 : vector<1x128xf32>
    %180 = arith.mulf %174, %179 : vector<1x128xf32>
    %181 = arith.truncf %180 : vector<1x128xf32> to vector<1x128xbf16>
    %c0_66 = arith.constant 0 : index
    %c0_67 = arith.constant 0 : index
    %182 = vector.load %arg5[%c0_66, %c0_67] : memref<128x128xbf16, #tpu.memory_space<vmem>>, vector<128x128xbf16>
    %cst_68 = arith.constant dense<0.000000e+00> : vector<1x128xf32>
    %183 = tpu.matmul %181, %182, %cst_68 {dimension_numbers = #tpu.dot_dimension_numbers<[1], [0], [0], [1], [0, 0, 1, 1], [], []>} : vector<1x128xbf16>, vector<128x128xbf16>, vector<1x128xf32> -> vector<1x128xf32>
    %c0_69 = arith.constant 0 : index
    %c0_70 = arith.constant 0 : index
    %184 = vector.load %arg6[%c0_69, %c0_70] : memref<1x128xf32, #tpu.memory_space<vmem>>, vector<1x128xf32>
    %185 = arith.addf %183, %184 : vector<1x128xf32>
    %186 = math.tanh %185 : vector<1x128xf32>
    %cst_71 = arith.constant 2.500000e+00 : f32
    %187 = vector.broadcast %cst_71 : f32 to vector<1x128xf32>
    %188 = arith.mulf %187, %186 : vector<1x128xf32>
    %189 = arith.addf %188, %5 : vector<1x128xf32>
    %190 = math.exp %189 : vector<1x128xf32>
    %cst_72 = arith.constant dense<0.000000e+00> : vector<1xf32>
    %191 = vector.multi_reduction <add>, %190, %cst_72 [1] : vector<1x128xf32> to vector<1xf32>
    %192 = vector.shape_cast %191 : vector<1xf32> to vector<1x1xf32>
    %193 = math.log %192 : vector<1x1xf32>
    %194 = vector.broadcast %193 : vector<1x1xf32> to vector<1x128xf32>
    %195 = arith.subf %189, %194 : vector<1x128xf32>
    %196 = vector.broadcast %192 : vector<1x1xf32> to vector<1x128xf32>
    %197 = arith.divf %190, %196 : vector<1x128xf32>
    %c1_73 = arith.constant 1 : index
    %c0_74 = arith.constant 0 : index
    %198 = vector.load %arg8[%c1_73, %c0_74] : memref<6x128xf32, #tpu.memory_space<vmem>>, vector<1x128xf32>
    %199 = arith.addf %189, %198 : vector<1x128xf32>
    %200 = vector.shape_cast %199 : vector<1x128xf32> to vector<1x1x128xf32>
    %cst_75 = arith.constant dense<0xFF800000> : vector<1xf32>
    %201 = vector.multi_reduction <maximumf>, %200, %cst_75 [1, 2] : vector<1x1x128xf32> to vector<1xf32>
    %202 = vector.shape_cast %201 : vector<1xf32> to vector<1x1x1xf32>
    %203 = vector.extract %202[0, 0, 0] : f32 from vector<1x1x1xf32>
    %204 = vector.broadcast %203 : f32 to vector<1x128xf32>
    %205 = arith.cmpf oeq, %199, %204 : vector<1x128xf32>
    %c128_i32_76 = arith.constant 128 : i32
    %206 = vector.broadcast %c128_i32_76 : i32 to vector<1x128xi32>
    %207 = arith.select %205, %0, %206 : vector<1x128xi1>, vector<1x128xi32>
    %208 = vector.shape_cast %207 : vector<1x128xi32> to vector<1x1x128xi32>
    %cst_77 = arith.constant dense<2147483647> : vector<1xi32>
    %209 = vector.multi_reduction <minsi>, %208, %cst_77 [1, 2] : vector<1x1x128xi32> to vector<1xi32>
    %210 = vector.shape_cast %209 : vector<1xi32> to vector<1x1x1xi32>
    %211 = vector.extract %210[0, 0, 0] : i32 from vector<1x1x1xi32>
    %212 = vector.broadcast %211 : i32 to vector<1x128xi32>
    %213 = arith.cmpi eq, %0, %212 : vector<1x128xi32>
    %214 = arith.extui %213 : vector<1x128xi1> to vector<1x128xi32>
    %215 = arith.sitofp %214 : vector<1x128xi32> to vector<1x128xf32>
    %216 = arith.mulf %215, %195 : vector<1x128xf32>
    %217 = arith.addf %94, %216 : vector<1x128xf32>
    %218 = arith.mulf %197, %195 : vector<1x128xf32>
    %219 = arith.addf %96, %218 : vector<1x128xf32>
    %c1_78 = arith.constant 1 : index
    %220 = memref.load %arg11[%c1_78] : memref<6xi32, #tpu.memory_space<smem>>
    memref.store %211, %arg11[%c1_78] : memref<6xi32, #tpu.memory_space<smem>>
    %c0_79 = arith.constant 0 : index
    %c0_80 = arith.constant 0 : index
    %c0_81 = arith.constant 0 : index
    %221 = vector.load %arg7[%c0_79, %c0_80, %c0_81] : memref<5x1x128xf32, #tpu.memory_space<vmem>>, vector<1x1x128xf32>
    %222 = vector.shape_cast %221 : vector<1x1x128xf32> to vector<1x128xf32>
    %c0_i32_82 = arith.constant 0 : i32
    %223 = arith.cmpi eq, %211, %c0_i32_82 : i32
    %224 = arith.extui %223 : i1 to i32
    %225 = arith.sitofp %224 : i32 to f32
    %226 = vector.broadcast %225 : f32 to vector<1x128xf32>
    %227 = arith.mulf %222, %226 : vector<1x128xf32>
    %c1_83 = arith.constant 1 : index
    %c0_84 = arith.constant 0 : index
    %c0_85 = arith.constant 0 : index
    %228 = vector.load %arg7[%c1_83, %c0_84, %c0_85] : memref<5x1x128xf32, #tpu.memory_space<vmem>>, vector<1x1x128xf32>
    %229 = vector.shape_cast %228 : vector<1x1x128xf32> to vector<1x128xf32>
    %c1_i32_86 = arith.constant 1 : i32
    %230 = arith.cmpi eq, %211, %c1_i32_86 : i32
    %231 = arith.extui %230 : i1 to i32
    %232 = arith.sitofp %231 : i32 to f32
    %233 = vector.broadcast %232 : f32 to vector<1x128xf32>
    %234 = arith.mulf %229, %233 : vector<1x128xf32>
    %235 = arith.addf %227, %234 : vector<1x128xf32>
    %c2_87 = arith.constant 2 : index
    %c0_88 = arith.constant 0 : index
    %c0_89 = arith.constant 0 : index
    %236 = vector.load %arg7[%c2_87, %c0_88, %c0_89] : memref<5x1x128xf32, #tpu.memory_space<vmem>>, vector<1x1x128xf32>
    %237 = vector.shape_cast %236 : vector<1x1x128xf32> to vector<1x128xf32>
    %c2_i32_90 = arith.constant 2 : i32
    %238 = arith.cmpi eq, %211, %c2_i32_90 : i32
    %239 = arith.extui %238 : i1 to i32
    %240 = arith.sitofp %239 : i32 to f32
    %241 = vector.broadcast %240 : f32 to vector<1x128xf32>
    %242 = arith.mulf %237, %241 : vector<1x128xf32>
    %243 = arith.addf %235, %242 : vector<1x128xf32>
    %c3_91 = arith.constant 3 : index
    %c0_92 = arith.constant 0 : index
    %c0_93 = arith.constant 0 : index
    %244 = vector.load %arg7[%c3_91, %c0_92, %c0_93] : memref<5x1x128xf32, #tpu.memory_space<vmem>>, vector<1x1x128xf32>
    %245 = vector.shape_cast %244 : vector<1x1x128xf32> to vector<1x128xf32>
    %c3_i32_94 = arith.constant 3 : i32
    %246 = arith.cmpi eq, %211, %c3_i32_94 : i32
    %247 = arith.extui %246 : i1 to i32
    %248 = arith.sitofp %247 : i32 to f32
    %249 = vector.broadcast %248 : f32 to vector<1x128xf32>
    %250 = arith.mulf %245, %249 : vector<1x128xf32>
    %251 = arith.addf %243, %250 : vector<1x128xf32>
    %c4_95 = arith.constant 4 : index
    %c0_96 = arith.constant 0 : index
    %c0_97 = arith.constant 0 : index
    %252 = vector.load %arg7[%c4_95, %c0_96, %c0_97] : memref<5x1x128xf32, #tpu.memory_space<vmem>>, vector<1x1x128xf32>
    %253 = vector.shape_cast %252 : vector<1x1x128xf32> to vector<1x128xf32>
    %c4_i32_98 = arith.constant 4 : i32
    %254 = arith.cmpi eq, %211, %c4_i32_98 : i32
    %255 = arith.extui %254 : i1 to i32
    %256 = arith.sitofp %255 : i32 to f32
    %257 = vector.broadcast %256 : f32 to vector<1x128xf32>
    %258 = arith.mulf %253, %257 : vector<1x128xf32>
    %259 = arith.addf %251, %258 : vector<1x128xf32>
    %c32_i32_99 = arith.constant 32 : i32
    %260 = tpu.dynamic_rotate %158 by %c32_i32_99 dim 1 : vector<1x128xf32>, i32 -> vector<1x128xf32>
    %261 = arith.addf %259, %260 : vector<1x128xf32>
    %262 = arith.truncf %261 : vector<1x128xf32> to vector<1x128xbf16>
    %c0_100 = arith.constant 0 : index
    %c0_101 = arith.constant 0 : index
    %263 = vector.load %arg1[%c0_100, %c0_101] : memref<128x128xbf16, #tpu.memory_space<vmem>>, vector<128x128xbf16>
    %cst_102 = arith.constant dense<0.000000e+00> : vector<1x128xf32>
    %264 = tpu.matmul %262, %263, %cst_102 {dimension_numbers = #tpu.dot_dimension_numbers<[1], [0], [0], [1], [0, 0, 1, 1], [], []>} : vector<1x128xbf16>, vector<128x128xbf16>, vector<1x128xf32> -> vector<1x128xf32>
    %c0_103 = arith.constant 0 : index
    %c0_104 = arith.constant 0 : index
    %265 = vector.load %arg2[%c0_103, %c0_104] : memref<1x128xf32, #tpu.memory_space<vmem>>, vector<1x128xf32>
    %266 = arith.addf %264, %265 : vector<1x128xf32>
    %267 = arith.negf %266 : vector<1x128xf32>
    %268 = math.exp %267 : vector<1x128xf32>
    %cst_105 = arith.constant 1.000000e+00 : f32
    %269 = vector.broadcast %cst_105 : f32 to vector<1x128xf32>
    %270 = arith.addf %269, %268 : vector<1x128xf32>
    %271 = arith.divf %269, %270 : vector<1x128xf32>
    %272 = math.tanh %266 : vector<1x128xf32>
    %c96_i32_106 = arith.constant 96 : i32
    %273 = tpu.dynamic_rotate %271 by %c96_i32_106 dim 1 : vector<1x128xf32>, i32 -> vector<1x128xf32>
    %c64_i32_107 = arith.constant 64 : i32
    %274 = tpu.dynamic_rotate %272 by %c64_i32_107 dim 1 : vector<1x128xf32>, i32 -> vector<1x128xf32>
    %c32_i32_108 = arith.constant 32 : i32
    %275 = tpu.dynamic_rotate %271 by %c32_i32_108 dim 1 : vector<1x128xf32>, i32 -> vector<1x128xf32>
    %276 = arith.mulf %273, %156 : vector<1x128xf32>
    %277 = arith.mulf %271, %274 : vector<1x128xf32>
    %278 = arith.addf %276, %277 : vector<1x128xf32>
    %279 = arith.mulf %9, %278 : vector<1x128xf32>
    %280 = math.tanh %279 : vector<1x128xf32>
    %281 = arith.mulf %275, %280 : vector<1x128xf32>
    %c32_i32_109 = arith.constant 32 : i32
    %282 = tpu.dynamic_rotate %180 by %c32_i32_109 dim 1 : vector<1x128xf32>, i32 -> vector<1x128xf32>
    %283 = arith.addf %281, %282 : vector<1x128xf32>
    %284 = arith.truncf %283 : vector<1x128xf32> to vector<1x128xbf16>
    %c0_110 = arith.constant 0 : index
    %c0_111 = arith.constant 0 : index
    %285 = vector.load %arg3[%c0_110, %c0_111] : memref<128x128xbf16, #tpu.memory_space<vmem>>, vector<128x128xbf16>
    %cst_112 = arith.constant dense<0.000000e+00> : vector<1x128xf32>
    %286 = tpu.matmul %284, %285, %cst_112 {dimension_numbers = #tpu.dot_dimension_numbers<[1], [0], [0], [1], [0, 0, 1, 1], [], []>} : vector<1x128xbf16>, vector<128x128xbf16>, vector<1x128xf32> -> vector<1x128xf32>
    %c0_113 = arith.constant 0 : index
    %c0_114 = arith.constant 0 : index
    %287 = vector.load %arg4[%c0_113, %c0_114] : memref<1x128xf32, #tpu.memory_space<vmem>>, vector<1x128xf32>
    %288 = arith.addf %286, %287 : vector<1x128xf32>
    %289 = arith.negf %288 : vector<1x128xf32>
    %290 = math.exp %289 : vector<1x128xf32>
    %cst_115 = arith.constant 1.000000e+00 : f32
    %291 = vector.broadcast %cst_115 : f32 to vector<1x128xf32>
    %292 = arith.addf %291, %290 : vector<1x128xf32>
    %293 = arith.divf %291, %292 : vector<1x128xf32>
    %294 = math.tanh %288 : vector<1x128xf32>
    %c96_i32_116 = arith.constant 96 : i32
    %295 = tpu.dynamic_rotate %293 by %c96_i32_116 dim 1 : vector<1x128xf32>, i32 -> vector<1x128xf32>
    %c64_i32_117 = arith.constant 64 : i32
    %296 = tpu.dynamic_rotate %294 by %c64_i32_117 dim 1 : vector<1x128xf32>, i32 -> vector<1x128xf32>
    %c32_i32_118 = arith.constant 32 : i32
    %297 = tpu.dynamic_rotate %293 by %c32_i32_118 dim 1 : vector<1x128xf32>, i32 -> vector<1x128xf32>
    %298 = arith.mulf %295, %178 : vector<1x128xf32>
    %299 = arith.mulf %293, %296 : vector<1x128xf32>
    %300 = arith.addf %298, %299 : vector<1x128xf32>
    %301 = arith.mulf %9, %300 : vector<1x128xf32>
    %302 = math.tanh %301 : vector<1x128xf32>
    %303 = arith.mulf %297, %302 : vector<1x128xf32>
    %304 = arith.truncf %303 : vector<1x128xf32> to vector<1x128xbf16>
    %c0_119 = arith.constant 0 : index
    %c0_120 = arith.constant 0 : index
    %305 = vector.load %arg5[%c0_119, %c0_120] : memref<128x128xbf16, #tpu.memory_space<vmem>>, vector<128x128xbf16>
    %cst_121 = arith.constant dense<0.000000e+00> : vector<1x128xf32>
    %306 = tpu.matmul %304, %305, %cst_121 {dimension_numbers = #tpu.dot_dimension_numbers<[1], [0], [0], [1], [0, 0, 1, 1], [], []>} : vector<1x128xbf16>, vector<128x128xbf16>, vector<1x128xf32> -> vector<1x128xf32>
    %c0_122 = arith.constant 0 : index
    %c0_123 = arith.constant 0 : index
    %307 = vector.load %arg6[%c0_122, %c0_123] : memref<1x128xf32, #tpu.memory_space<vmem>>, vector<1x128xf32>
    %308 = arith.addf %306, %307 : vector<1x128xf32>
    %309 = math.tanh %308 : vector<1x128xf32>
    %cst_124 = arith.constant 2.500000e+00 : f32
    %310 = vector.broadcast %cst_124 : f32 to vector<1x128xf32>
    %311 = arith.mulf %310, %309 : vector<1x128xf32>
    %312 = arith.addf %311, %5 : vector<1x128xf32>
    %313 = math.exp %312 : vector<1x128xf32>
    %cst_125 = arith.constant dense<0.000000e+00> : vector<1xf32>
    %314 = vector.multi_reduction <add>, %313, %cst_125 [1] : vector<1x128xf32> to vector<1xf32>
    %315 = vector.shape_cast %314 : vector<1xf32> to vector<1x1xf32>
    %316 = math.log %315 : vector<1x1xf32>
    %317 = vector.broadcast %316 : vector<1x1xf32> to vector<1x128xf32>
    %318 = arith.subf %312, %317 : vector<1x128xf32>
    %319 = vector.broadcast %315 : vector<1x1xf32> to vector<1x128xf32>
    %320 = arith.divf %313, %319 : vector<1x128xf32>
    %c2_126 = arith.constant 2 : index
    %c0_127 = arith.constant 0 : index
    %321 = vector.load %arg8[%c2_126, %c0_127] : memref<6x128xf32, #tpu.memory_space<vmem>>, vector<1x128xf32>
    %322 = arith.addf %312, %321 : vector<1x128xf32>
    %323 = vector.shape_cast %322 : vector<1x128xf32> to vector<1x1x128xf32>
    %cst_128 = arith.constant dense<0xFF800000> : vector<1xf32>
    %324 = vector.multi_reduction <maximumf>, %323, %cst_128 [1, 2] : vector<1x1x128xf32> to vector<1xf32>
    %325 = vector.shape_cast %324 : vector<1xf32> to vector<1x1x1xf32>
    %326 = vector.extract %325[0, 0, 0] : f32 from vector<1x1x1xf32>
    %327 = vector.broadcast %326 : f32 to vector<1x128xf32>
    %328 = arith.cmpf oeq, %322, %327 : vector<1x128xf32>
    %c128_i32_129 = arith.constant 128 : i32
    %329 = vector.broadcast %c128_i32_129 : i32 to vector<1x128xi32>
    %330 = arith.select %328, %0, %329 : vector<1x128xi1>, vector<1x128xi32>
    %331 = vector.shape_cast %330 : vector<1x128xi32> to vector<1x1x128xi32>
    %cst_130 = arith.constant dense<2147483647> : vector<1xi32>
    %332 = vector.multi_reduction <minsi>, %331, %cst_130 [1, 2] : vector<1x1x128xi32> to vector<1xi32>
    %333 = vector.shape_cast %332 : vector<1xi32> to vector<1x1x1xi32>
    %334 = vector.extract %333[0, 0, 0] : i32 from vector<1x1x1xi32>
    %335 = vector.broadcast %334 : i32 to vector<1x128xi32>
    %336 = arith.cmpi eq, %0, %335 : vector<1x128xi32>
    %337 = arith.extui %336 : vector<1x128xi1> to vector<1x128xi32>
    %338 = arith.sitofp %337 : vector<1x128xi32> to vector<1x128xf32>
    %339 = arith.mulf %338, %318 : vector<1x128xf32>
    %340 = arith.addf %217, %339 : vector<1x128xf32>
    %341 = arith.mulf %320, %318 : vector<1x128xf32>
    %342 = arith.addf %219, %341 : vector<1x128xf32>
    %c2_131 = arith.constant 2 : index
    %343 = memref.load %arg11[%c2_131] : memref<6xi32, #tpu.memory_space<smem>>
    memref.store %334, %arg11[%c2_131] : memref<6xi32, #tpu.memory_space<smem>>
    %c0_132 = arith.constant 0 : index
    %c0_133 = arith.constant 0 : index
    %c0_134 = arith.constant 0 : index
    %344 = vector.load %arg7[%c0_132, %c0_133, %c0_134] : memref<5x1x128xf32, #tpu.memory_space<vmem>>, vector<1x1x128xf32>
    %345 = vector.shape_cast %344 : vector<1x1x128xf32> to vector<1x128xf32>
    %c0_i32_135 = arith.constant 0 : i32
    %346 = arith.cmpi eq, %334, %c0_i32_135 : i32
    %347 = arith.extui %346 : i1 to i32
    %348 = arith.sitofp %347 : i32 to f32
    %349 = vector.broadcast %348 : f32 to vector<1x128xf32>
    %350 = arith.mulf %345, %349 : vector<1x128xf32>
    %c1_136 = arith.constant 1 : index
    %c0_137 = arith.constant 0 : index
    %c0_138 = arith.constant 0 : index
    %351 = vector.load %arg7[%c1_136, %c0_137, %c0_138] : memref<5x1x128xf32, #tpu.memory_space<vmem>>, vector<1x1x128xf32>
    %352 = vector.shape_cast %351 : vector<1x1x128xf32> to vector<1x128xf32>
    %c1_i32_139 = arith.constant 1 : i32
    %353 = arith.cmpi eq, %334, %c1_i32_139 : i32
    %354 = arith.extui %353 : i1 to i32
    %355 = arith.sitofp %354 : i32 to f32
    %356 = vector.broadcast %355 : f32 to vector<1x128xf32>
    %357 = arith.mulf %352, %356 : vector<1x128xf32>
    %358 = arith.addf %350, %357 : vector<1x128xf32>
    %c2_140 = arith.constant 2 : index
    %c0_141 = arith.constant 0 : index
    %c0_142 = arith.constant 0 : index
    %359 = vector.load %arg7[%c2_140, %c0_141, %c0_142] : memref<5x1x128xf32, #tpu.memory_space<vmem>>, vector<1x1x128xf32>
    %360 = vector.shape_cast %359 : vector<1x1x128xf32> to vector<1x128xf32>
    %c2_i32_143 = arith.constant 2 : i32
    %361 = arith.cmpi eq, %334, %c2_i32_143 : i32
    %362 = arith.extui %361 : i1 to i32
    %363 = arith.sitofp %362 : i32 to f32
    %364 = vector.broadcast %363 : f32 to vector<1x128xf32>
    %365 = arith.mulf %360, %364 : vector<1x128xf32>
    %366 = arith.addf %358, %365 : vector<1x128xf32>
    %c3_144 = arith.constant 3 : index
    %c0_145 = arith.constant 0 : index
    %c0_146 = arith.constant 0 : index
    %367 = vector.load %arg7[%c3_144, %c0_145, %c0_146] : memref<5x1x128xf32, #tpu.memory_space<vmem>>, vector<1x1x128xf32>
    %368 = vector.shape_cast %367 : vector<1x1x128xf32> to vector<1x128xf32>
    %c3_i32_147 = arith.constant 3 : i32
    %369 = arith.cmpi eq, %334, %c3_i32_147 : i32
    %370 = arith.extui %369 : i1 to i32
    %371 = arith.sitofp %370 : i32 to f32
    %372 = vector.broadcast %371 : f32 to vector<1x128xf32>
    %373 = arith.mulf %368, %372 : vector<1x128xf32>
    %374 = arith.addf %366, %373 : vector<1x128xf32>
    %c4_148 = arith.constant 4 : index
    %c0_149 = arith.constant 0 : index
    %c0_150 = arith.constant 0 : index
    %375 = vector.load %arg7[%c4_148, %c0_149, %c0_150] : memref<5x1x128xf32, #tpu.memory_space<vmem>>, vector<1x1x128xf32>
    %376 = vector.shape_cast %375 : vector<1x1x128xf32> to vector<1x128xf32>
    %c4_i32_151 = arith.constant 4 : i32
    %377 = arith.cmpi eq, %334, %c4_i32_151 : i32
    %378 = arith.extui %377 : i1 to i32
    %379 = arith.sitofp %378 : i32 to f32
    %380 = vector.broadcast %379 : f32 to vector<1x128xf32>
    %381 = arith.mulf %376, %380 : vector<1x128xf32>
    %382 = arith.addf %374, %381 : vector<1x128xf32>
    %c32_i32_152 = arith.constant 32 : i32
    %383 = tpu.dynamic_rotate %281 by %c32_i32_152 dim 1 : vector<1x128xf32>, i32 -> vector<1x128xf32>
    %384 = arith.addf %382, %383 : vector<1x128xf32>
    %385 = arith.truncf %384 : vector<1x128xf32> to vector<1x128xbf16>
    %c0_153 = arith.constant 0 : index
    %c0_154 = arith.constant 0 : index
    %386 = vector.load %arg1[%c0_153, %c0_154] : memref<128x128xbf16, #tpu.memory_space<vmem>>, vector<128x128xbf16>
    %cst_155 = arith.constant dense<0.000000e+00> : vector<1x128xf32>
    %387 = tpu.matmul %385, %386, %cst_155 {dimension_numbers = #tpu.dot_dimension_numbers<[1], [0], [0], [1], [0, 0, 1, 1], [], []>} : vector<1x128xbf16>, vector<128x128xbf16>, vector<1x128xf32> -> vector<1x128xf32>
    %c0_156 = arith.constant 0 : index
    %c0_157 = arith.constant 0 : index
    %388 = vector.load %arg2[%c0_156, %c0_157] : memref<1x128xf32, #tpu.memory_space<vmem>>, vector<1x128xf32>
    %389 = arith.addf %387, %388 : vector<1x128xf32>
    %390 = arith.negf %389 : vector<1x128xf32>
    %391 = math.exp %390 : vector<1x128xf32>
    %cst_158 = arith.constant 1.000000e+00 : f32
    %392 = vector.broadcast %cst_158 : f32 to vector<1x128xf32>
    %393 = arith.addf %392, %391 : vector<1x128xf32>
    %394 = arith.divf %392, %393 : vector<1x128xf32>
    %395 = math.tanh %389 : vector<1x128xf32>
    %c96_i32_159 = arith.constant 96 : i32
    %396 = tpu.dynamic_rotate %394 by %c96_i32_159 dim 1 : vector<1x128xf32>, i32 -> vector<1x128xf32>
    %c64_i32_160 = arith.constant 64 : i32
    %397 = tpu.dynamic_rotate %395 by %c64_i32_160 dim 1 : vector<1x128xf32>, i32 -> vector<1x128xf32>
    %c32_i32_161 = arith.constant 32 : i32
    %398 = tpu.dynamic_rotate %394 by %c32_i32_161 dim 1 : vector<1x128xf32>, i32 -> vector<1x128xf32>
    %399 = arith.mulf %396, %279 : vector<1x128xf32>
    %400 = arith.mulf %394, %397 : vector<1x128xf32>
    %401 = arith.addf %399, %400 : vector<1x128xf32>
    %402 = arith.mulf %9, %401 : vector<1x128xf32>
    %403 = math.tanh %402 : vector<1x128xf32>
    %404 = arith.mulf %398, %403 : vector<1x128xf32>
    %c32_i32_162 = arith.constant 32 : i32
    %405 = tpu.dynamic_rotate %303 by %c32_i32_162 dim 1 : vector<1x128xf32>, i32 -> vector<1x128xf32>
    %406 = arith.addf %404, %405 : vector<1x128xf32>
    %407 = arith.truncf %406 : vector<1x128xf32> to vector<1x128xbf16>
    %c0_163 = arith.constant 0 : index
    %c0_164 = arith.constant 0 : index
    %408 = vector.load %arg3[%c0_163, %c0_164] : memref<128x128xbf16, #tpu.memory_space<vmem>>, vector<128x128xbf16>
    %cst_165 = arith.constant dense<0.000000e+00> : vector<1x128xf32>
    %409 = tpu.matmul %407, %408, %cst_165 {dimension_numbers = #tpu.dot_dimension_numbers<[1], [0], [0], [1], [0, 0, 1, 1], [], []>} : vector<1x128xbf16>, vector<128x128xbf16>, vector<1x128xf32> -> vector<1x128xf32>
    %c0_166 = arith.constant 0 : index
    %c0_167 = arith.constant 0 : index
    %410 = vector.load %arg4[%c0_166, %c0_167] : memref<1x128xf32, #tpu.memory_space<vmem>>, vector<1x128xf32>
    %411 = arith.addf %409, %410 : vector<1x128xf32>
    %412 = arith.negf %411 : vector<1x128xf32>
    %413 = math.exp %412 : vector<1x128xf32>
    %cst_168 = arith.constant 1.000000e+00 : f32
    %414 = vector.broadcast %cst_168 : f32 to vector<1x128xf32>
    %415 = arith.addf %414, %413 : vector<1x128xf32>
    %416 = arith.divf %414, %415 : vector<1x128xf32>
    %417 = math.tanh %411 : vector<1x128xf32>
    %c96_i32_169 = arith.constant 96 : i32
    %418 = tpu.dynamic_rotate %416 by %c96_i32_169 dim 1 : vector<1x128xf32>, i32 -> vector<1x128xf32>
    %c64_i32_170 = arith.constant 64 : i32
    %419 = tpu.dynamic_rotate %417 by %c64_i32_170 dim 1 : vector<1x128xf32>, i32 -> vector<1x128xf32>
    %c32_i32_171 = arith.constant 32 : i32
    %420 = tpu.dynamic_rotate %416 by %c32_i32_171 dim 1 : vector<1x128xf32>, i32 -> vector<1x128xf32>
    %421 = arith.mulf %418, %301 : vector<1x128xf32>
    %422 = arith.mulf %416, %419 : vector<1x128xf32>
    %423 = arith.addf %421, %422 : vector<1x128xf32>
    %424 = arith.mulf %9, %423 : vector<1x128xf32>
    %425 = math.tanh %424 : vector<1x128xf32>
    %426 = arith.mulf %420, %425 : vector<1x128xf32>
    %427 = arith.truncf %426 : vector<1x128xf32> to vector<1x128xbf16>
    %c0_172 = arith.constant 0 : index
    %c0_173 = arith.constant 0 : index
    %428 = vector.load %arg5[%c0_172, %c0_173] : memref<128x128xbf16, #tpu.memory_space<vmem>>, vector<128x128xbf16>
    %cst_174 = arith.constant dense<0.000000e+00> : vector<1x128xf32>
    %429 = tpu.matmul %427, %428, %cst_174 {dimension_numbers = #tpu.dot_dimension_numbers<[1], [0], [0], [1], [0, 0, 1, 1], [], []>} : vector<1x128xbf16>, vector<128x128xbf16>, vector<1x128xf32> -> vector<1x128xf32>
    %c0_175 = arith.constant 0 : index
    %c0_176 = arith.constant 0 : index
    %430 = vector.load %arg6[%c0_175, %c0_176] : memref<1x128xf32, #tpu.memory_space<vmem>>, vector<1x128xf32>
    %431 = arith.addf %429, %430 : vector<1x128xf32>
    %432 = math.tanh %431 : vector<1x128xf32>
    %cst_177 = arith.constant 2.500000e+00 : f32
    %433 = vector.broadcast %cst_177 : f32 to vector<1x128xf32>
    %434 = arith.mulf %433, %432 : vector<1x128xf32>
    %435 = arith.addf %434, %5 : vector<1x128xf32>
    %436 = math.exp %435 : vector<1x128xf32>
    %cst_178 = arith.constant dense<0.000000e+00> : vector<1xf32>
    %437 = vector.multi_reduction <add>, %436, %cst_178 [1] : vector<1x128xf32> to vector<1xf32>
    %438 = vector.shape_cast %437 : vector<1xf32> to vector<1x1xf32>
    %439 = math.log %438 : vector<1x1xf32>
    %440 = vector.broadcast %439 : vector<1x1xf32> to vector<1x128xf32>
    %441 = arith.subf %435, %440 : vector<1x128xf32>
    %442 = vector.broadcast %438 : vector<1x1xf32> to vector<1x128xf32>
    %443 = arith.divf %436, %442 : vector<1x128xf32>
    %c3_179 = arith.constant 3 : index
    %c0_180 = arith.constant 0 : index
    %444 = vector.load %arg8[%c3_179, %c0_180] : memref<6x128xf32, #tpu.memory_space<vmem>>, vector<1x128xf32>
    %445 = arith.addf %435, %444 : vector<1x128xf32>
    %446 = vector.shape_cast %445 : vector<1x128xf32> to vector<1x1x128xf32>
    %cst_181 = arith.constant dense<0xFF800000> : vector<1xf32>
    %447 = vector.multi_reduction <maximumf>, %446, %cst_181 [1, 2] : vector<1x1x128xf32> to vector<1xf32>
    %448 = vector.shape_cast %447 : vector<1xf32> to vector<1x1x1xf32>
    %449 = vector.extract %448[0, 0, 0] : f32 from vector<1x1x1xf32>
    %450 = vector.broadcast %449 : f32 to vector<1x128xf32>
    %451 = arith.cmpf oeq, %445, %450 : vector<1x128xf32>
    %c128_i32_182 = arith.constant 128 : i32
    %452 = vector.broadcast %c128_i32_182 : i32 to vector<1x128xi32>
    %453 = arith.select %451, %0, %452 : vector<1x128xi1>, vector<1x128xi32>
    %454 = vector.shape_cast %453 : vector<1x128xi32> to vector<1x1x128xi32>
    %cst_183 = arith.constant dense<2147483647> : vector<1xi32>
    %455 = vector.multi_reduction <minsi>, %454, %cst_183 [1, 2] : vector<1x1x128xi32> to vector<1xi32>
    %456 = vector.shape_cast %455 : vector<1xi32> to vector<1x1x1xi32>
    %457 = vector.extract %456[0, 0, 0] : i32 from vector<1x1x1xi32>
    %458 = vector.broadcast %457 : i32 to vector<1x128xi32>
    %459 = arith.cmpi eq, %0, %458 : vector<1x128xi32>
    %460 = arith.extui %459 : vector<1x128xi1> to vector<1x128xi32>
    %461 = arith.sitofp %460 : vector<1x128xi32> to vector<1x128xf32>
    %462 = arith.mulf %461, %441 : vector<1x128xf32>
    %463 = arith.addf %340, %462 : vector<1x128xf32>
    %464 = arith.mulf %443, %441 : vector<1x128xf32>
    %465 = arith.addf %342, %464 : vector<1x128xf32>
    %c3_184 = arith.constant 3 : index
    %466 = memref.load %arg11[%c3_184] : memref<6xi32, #tpu.memory_space<smem>>
    memref.store %457, %arg11[%c3_184] : memref<6xi32, #tpu.memory_space<smem>>
    %c0_185 = arith.constant 0 : index
    %c0_186 = arith.constant 0 : index
    %c0_187 = arith.constant 0 : index
    %467 = vector.load %arg7[%c0_185, %c0_186, %c0_187] : memref<5x1x128xf32, #tpu.memory_space<vmem>>, vector<1x1x128xf32>
    %468 = vector.shape_cast %467 : vector<1x1x128xf32> to vector<1x128xf32>
    %c0_i32_188 = arith.constant 0 : i32
    %469 = arith.cmpi eq, %457, %c0_i32_188 : i32
    %470 = arith.extui %469 : i1 to i32
    %471 = arith.sitofp %470 : i32 to f32
    %472 = vector.broadcast %471 : f32 to vector<1x128xf32>
    %473 = arith.mulf %468, %472 : vector<1x128xf32>
    %c1_189 = arith.constant 1 : index
    %c0_190 = arith.constant 0 : index
    %c0_191 = arith.constant 0 : index
    %474 = vector.load %arg7[%c1_189, %c0_190, %c0_191] : memref<5x1x128xf32, #tpu.memory_space<vmem>>, vector<1x1x128xf32>
    %475 = vector.shape_cast %474 : vector<1x1x128xf32> to vector<1x128xf32>
    %c1_i32_192 = arith.constant 1 : i32
    %476 = arith.cmpi eq, %457, %c1_i32_192 : i32
    %477 = arith.extui %476 : i1 to i32
    %478 = arith.sitofp %477 : i32 to f32
    %479 = vector.broadcast %478 : f32 to vector<1x128xf32>
    %480 = arith.mulf %475, %479 : vector<1x128xf32>
    %481 = arith.addf %473, %480 : vector<1x128xf32>
    %c2_193 = arith.constant 2 : index
    %c0_194 = arith.constant 0 : index
    %c0_195 = arith.constant 0 : index
    %482 = vector.load %arg7[%c2_193, %c0_194, %c0_195] : memref<5x1x128xf32, #tpu.memory_space<vmem>>, vector<1x1x128xf32>
    %483 = vector.shape_cast %482 : vector<1x1x128xf32> to vector<1x128xf32>
    %c2_i32_196 = arith.constant 2 : i32
    %484 = arith.cmpi eq, %457, %c2_i32_196 : i32
    %485 = arith.extui %484 : i1 to i32
    %486 = arith.sitofp %485 : i32 to f32
    %487 = vector.broadcast %486 : f32 to vector<1x128xf32>
    %488 = arith.mulf %483, %487 : vector<1x128xf32>
    %489 = arith.addf %481, %488 : vector<1x128xf32>
    %c3_197 = arith.constant 3 : index
    %c0_198 = arith.constant 0 : index
    %c0_199 = arith.constant 0 : index
    %490 = vector.load %arg7[%c3_197, %c0_198, %c0_199] : memref<5x1x128xf32, #tpu.memory_space<vmem>>, vector<1x1x128xf32>
    %491 = vector.shape_cast %490 : vector<1x1x128xf32> to vector<1x128xf32>
    %c3_i32_200 = arith.constant 3 : i32
    %492 = arith.cmpi eq, %457, %c3_i32_200 : i32
    %493 = arith.extui %492 : i1 to i32
    %494 = arith.sitofp %493 : i32 to f32
    %495 = vector.broadcast %494 : f32 to vector<1x128xf32>
    %496 = arith.mulf %491, %495 : vector<1x128xf32>
    %497 = arith.addf %489, %496 : vector<1x128xf32>
    %c4_201 = arith.constant 4 : index
    %c0_202 = arith.constant 0 : index
    %c0_203 = arith.constant 0 : index
    %498 = vector.load %arg7[%c4_201, %c0_202, %c0_203] : memref<5x1x128xf32, #tpu.memory_space<vmem>>, vector<1x1x128xf32>
    %499 = vector.shape_cast %498 : vector<1x1x128xf32> to vector<1x128xf32>
    %c4_i32_204 = arith.constant 4 : i32
    %500 = arith.cmpi eq, %457, %c4_i32_204 : i32
    %501 = arith.extui %500 : i1 to i32
    %502 = arith.sitofp %501 : i32 to f32
    %503 = vector.broadcast %502 : f32 to vector<1x128xf32>
    %504 = arith.mulf %499, %503 : vector<1x128xf32>
    %505 = arith.addf %497, %504 : vector<1x128xf32>
    %c32_i32_205 = arith.constant 32 : i32
    %506 = tpu.dynamic_rotate %404 by %c32_i32_205 dim 1 : vector<1x128xf32>, i32 -> vector<1x128xf32>
    %507 = arith.addf %505, %506 : vector<1x128xf32>
    %508 = arith.truncf %507 : vector<1x128xf32> to vector<1x128xbf16>
    %c0_206 = arith.constant 0 : index
    %c0_207 = arith.constant 0 : index
    %509 = vector.load %arg1[%c0_206, %c0_207] : memref<128x128xbf16, #tpu.memory_space<vmem>>, vector<128x128xbf16>
    %cst_208 = arith.constant dense<0.000000e+00> : vector<1x128xf32>
    %510 = tpu.matmul %508, %509, %cst_208 {dimension_numbers = #tpu.dot_dimension_numbers<[1], [0], [0], [1], [0, 0, 1, 1], [], []>} : vector<1x128xbf16>, vector<128x128xbf16>, vector<1x128xf32> -> vector<1x128xf32>
    %c0_209 = arith.constant 0 : index
    %c0_210 = arith.constant 0 : index
    %511 = vector.load %arg2[%c0_209, %c0_210] : memref<1x128xf32, #tpu.memory_space<vmem>>, vector<1x128xf32>
    %512 = arith.addf %510, %511 : vector<1x128xf32>
    %513 = arith.negf %512 : vector<1x128xf32>
    %514 = math.exp %513 : vector<1x128xf32>
    %cst_211 = arith.constant 1.000000e+00 : f32
    %515 = vector.broadcast %cst_211 : f32 to vector<1x128xf32>
    %516 = arith.addf %515, %514 : vector<1x128xf32>
    %517 = arith.divf %515, %516 : vector<1x128xf32>
    %518 = math.tanh %512 : vector<1x128xf32>
    %c96_i32_212 = arith.constant 96 : i32
    %519 = tpu.dynamic_rotate %517 by %c96_i32_212 dim 1 : vector<1x128xf32>, i32 -> vector<1x128xf32>
    %c64_i32_213 = arith.constant 64 : i32
    %520 = tpu.dynamic_rotate %518 by %c64_i32_213 dim 1 : vector<1x128xf32>, i32 -> vector<1x128xf32>
    %c32_i32_214 = arith.constant 32 : i32
    %521 = tpu.dynamic_rotate %517 by %c32_i32_214 dim 1 : vector<1x128xf32>, i32 -> vector<1x128xf32>
    %522 = arith.mulf %519, %402 : vector<1x128xf32>
    %523 = arith.mulf %517, %520 : vector<1x128xf32>
    %524 = arith.addf %522, %523 : vector<1x128xf32>
    %525 = arith.mulf %9, %524 : vector<1x128xf32>
    %526 = math.tanh %525 : vector<1x128xf32>
    %527 = arith.mulf %521, %526 : vector<1x128xf32>
    %c32_i32_215 = arith.constant 32 : i32
    %528 = tpu.dynamic_rotate %426 by %c32_i32_215 dim 1 : vector<1x128xf32>, i32 -> vector<1x128xf32>
    %529 = arith.addf %527, %528 : vector<1x128xf32>
    %530 = arith.truncf %529 : vector<1x128xf32> to vector<1x128xbf16>
    %c0_216 = arith.constant 0 : index
    %c0_217 = arith.constant 0 : index
    %531 = vector.load %arg3[%c0_216, %c0_217] : memref<128x128xbf16, #tpu.memory_space<vmem>>, vector<128x128xbf16>
    %cst_218 = arith.constant dense<0.000000e+00> : vector<1x128xf32>
    %532 = tpu.matmul %530, %531, %cst_218 {dimension_numbers = #tpu.dot_dimension_numbers<[1], [0], [0], [1], [0, 0, 1, 1], [], []>} : vector<1x128xbf16>, vector<128x128xbf16>, vector<1x128xf32> -> vector<1x128xf32>
    %c0_219 = arith.constant 0 : index
    %c0_220 = arith.constant 0 : index
    %533 = vector.load %arg4[%c0_219, %c0_220] : memref<1x128xf32, #tpu.memory_space<vmem>>, vector<1x128xf32>
    %534 = arith.addf %532, %533 : vector<1x128xf32>
    %535 = arith.negf %534 : vector<1x128xf32>
    %536 = math.exp %535 : vector<1x128xf32>
    %cst_221 = arith.constant 1.000000e+00 : f32
    %537 = vector.broadcast %cst_221 : f32 to vector<1x128xf32>
    %538 = arith.addf %537, %536 : vector<1x128xf32>
    %539 = arith.divf %537, %538 : vector<1x128xf32>
    %540 = math.tanh %534 : vector<1x128xf32>
    %c96_i32_222 = arith.constant 96 : i32
    %541 = tpu.dynamic_rotate %539 by %c96_i32_222 dim 1 : vector<1x128xf32>, i32 -> vector<1x128xf32>
    %c64_i32_223 = arith.constant 64 : i32
    %542 = tpu.dynamic_rotate %540 by %c64_i32_223 dim 1 : vector<1x128xf32>, i32 -> vector<1x128xf32>
    %c32_i32_224 = arith.constant 32 : i32
    %543 = tpu.dynamic_rotate %539 by %c32_i32_224 dim 1 : vector<1x128xf32>, i32 -> vector<1x128xf32>
    %544 = arith.mulf %541, %424 : vector<1x128xf32>
    %545 = arith.mulf %539, %542 : vector<1x128xf32>
    %546 = arith.addf %544, %545 : vector<1x128xf32>
    %547 = arith.mulf %9, %546 : vector<1x128xf32>
    %548 = math.tanh %547 : vector<1x128xf32>
    %549 = arith.mulf %543, %548 : vector<1x128xf32>
    %550 = arith.truncf %549 : vector<1x128xf32> to vector<1x128xbf16>
    %c0_225 = arith.constant 0 : index
    %c0_226 = arith.constant 0 : index
    %551 = vector.load %arg5[%c0_225, %c0_226] : memref<128x128xbf16, #tpu.memory_space<vmem>>, vector<128x128xbf16>
    %cst_227 = arith.constant dense<0.000000e+00> : vector<1x128xf32>
    %552 = tpu.matmul %550, %551, %cst_227 {dimension_numbers = #tpu.dot_dimension_numbers<[1], [0], [0], [1], [0, 0, 1, 1], [], []>} : vector<1x128xbf16>, vector<128x128xbf16>, vector<1x128xf32> -> vector<1x128xf32>
    %c0_228 = arith.constant 0 : index
    %c0_229 = arith.constant 0 : index
    %553 = vector.load %arg6[%c0_228, %c0_229] : memref<1x128xf32, #tpu.memory_space<vmem>>, vector<1x128xf32>
    %554 = arith.addf %552, %553 : vector<1x128xf32>
    %555 = math.tanh %554 : vector<1x128xf32>
    %cst_230 = arith.constant 2.500000e+00 : f32
    %556 = vector.broadcast %cst_230 : f32 to vector<1x128xf32>
    %557 = arith.mulf %556, %555 : vector<1x128xf32>
    %558 = arith.addf %557, %5 : vector<1x128xf32>
    %559 = math.exp %558 : vector<1x128xf32>
    %cst_231 = arith.constant dense<0.000000e+00> : vector<1xf32>
    %560 = vector.multi_reduction <add>, %559, %cst_231 [1] : vector<1x128xf32> to vector<1xf32>
    %561 = vector.shape_cast %560 : vector<1xf32> to vector<1x1xf32>
    %562 = math.log %561 : vector<1x1xf32>
    %563 = vector.broadcast %562 : vector<1x1xf32> to vector<1x128xf32>
    %564 = arith.subf %558, %563 : vector<1x128xf32>
    %565 = vector.broadcast %561 : vector<1x1xf32> to vector<1x128xf32>
    %566 = arith.divf %559, %565 : vector<1x128xf32>
    %c4_232 = arith.constant 4 : index
    %c0_233 = arith.constant 0 : index
    %567 = vector.load %arg8[%c4_232, %c0_233] : memref<6x128xf32, #tpu.memory_space<vmem>>, vector<1x128xf32>
    %568 = arith.addf %558, %567 : vector<1x128xf32>
    %569 = vector.shape_cast %568 : vector<1x128xf32> to vector<1x1x128xf32>
    %cst_234 = arith.constant dense<0xFF800000> : vector<1xf32>
    %570 = vector.multi_reduction <maximumf>, %569, %cst_234 [1, 2] : vector<1x1x128xf32> to vector<1xf32>
    %571 = vector.shape_cast %570 : vector<1xf32> to vector<1x1x1xf32>
    %572 = vector.extract %571[0, 0, 0] : f32 from vector<1x1x1xf32>
    %573 = vector.broadcast %572 : f32 to vector<1x128xf32>
    %574 = arith.cmpf oeq, %568, %573 : vector<1x128xf32>
    %c128_i32_235 = arith.constant 128 : i32
    %575 = vector.broadcast %c128_i32_235 : i32 to vector<1x128xi32>
    %576 = arith.select %574, %0, %575 : vector<1x128xi1>, vector<1x128xi32>
    %577 = vector.shape_cast %576 : vector<1x128xi32> to vector<1x1x128xi32>
    %cst_236 = arith.constant dense<2147483647> : vector<1xi32>
    %578 = vector.multi_reduction <minsi>, %577, %cst_236 [1, 2] : vector<1x1x128xi32> to vector<1xi32>
    %579 = vector.shape_cast %578 : vector<1xi32> to vector<1x1x1xi32>
    %580 = vector.extract %579[0, 0, 0] : i32 from vector<1x1x1xi32>
    %581 = vector.broadcast %580 : i32 to vector<1x128xi32>
    %582 = arith.cmpi eq, %0, %581 : vector<1x128xi32>
    %583 = arith.extui %582 : vector<1x128xi1> to vector<1x128xi32>
    %584 = arith.sitofp %583 : vector<1x128xi32> to vector<1x128xf32>
    %585 = arith.mulf %584, %564 : vector<1x128xf32>
    %586 = arith.addf %463, %585 : vector<1x128xf32>
    %587 = arith.mulf %566, %564 : vector<1x128xf32>
    %588 = arith.addf %465, %587 : vector<1x128xf32>
    %c4_237 = arith.constant 4 : index
    %589 = memref.load %arg11[%c4_237] : memref<6xi32, #tpu.memory_space<smem>>
    memref.store %580, %arg11[%c4_237] : memref<6xi32, #tpu.memory_space<smem>>
    %c0_238 = arith.constant 0 : index
    %c0_239 = arith.constant 0 : index
    %c0_240 = arith.constant 0 : index
    %590 = vector.load %arg7[%c0_238, %c0_239, %c0_240] : memref<5x1x128xf32, #tpu.memory_space<vmem>>, vector<1x1x128xf32>
    %591 = vector.shape_cast %590 : vector<1x1x128xf32> to vector<1x128xf32>
    %c0_i32_241 = arith.constant 0 : i32
    %592 = arith.cmpi eq, %580, %c0_i32_241 : i32
    %593 = arith.extui %592 : i1 to i32
    %594 = arith.sitofp %593 : i32 to f32
    %595 = vector.broadcast %594 : f32 to vector<1x128xf32>
    %596 = arith.mulf %591, %595 : vector<1x128xf32>
    %c1_242 = arith.constant 1 : index
    %c0_243 = arith.constant 0 : index
    %c0_244 = arith.constant 0 : index
    %597 = vector.load %arg7[%c1_242, %c0_243, %c0_244] : memref<5x1x128xf32, #tpu.memory_space<vmem>>, vector<1x1x128xf32>
    %598 = vector.shape_cast %597 : vector<1x1x128xf32> to vector<1x128xf32>
    %c1_i32_245 = arith.constant 1 : i32
    %599 = arith.cmpi eq, %580, %c1_i32_245 : i32
    %600 = arith.extui %599 : i1 to i32
    %601 = arith.sitofp %600 : i32 to f32
    %602 = vector.broadcast %601 : f32 to vector<1x128xf32>
    %603 = arith.mulf %598, %602 : vector<1x128xf32>
    %604 = arith.addf %596, %603 : vector<1x128xf32>
    %c2_246 = arith.constant 2 : index
    %c0_247 = arith.constant 0 : index
    %c0_248 = arith.constant 0 : index
    %605 = vector.load %arg7[%c2_246, %c0_247, %c0_248] : memref<5x1x128xf32, #tpu.memory_space<vmem>>, vector<1x1x128xf32>
    %606 = vector.shape_cast %605 : vector<1x1x128xf32> to vector<1x128xf32>
    %c2_i32_249 = arith.constant 2 : i32
    %607 = arith.cmpi eq, %580, %c2_i32_249 : i32
    %608 = arith.extui %607 : i1 to i32
    %609 = arith.sitofp %608 : i32 to f32
    %610 = vector.broadcast %609 : f32 to vector<1x128xf32>
    %611 = arith.mulf %606, %610 : vector<1x128xf32>
    %612 = arith.addf %604, %611 : vector<1x128xf32>
    %c3_250 = arith.constant 3 : index
    %c0_251 = arith.constant 0 : index
    %c0_252 = arith.constant 0 : index
    %613 = vector.load %arg7[%c3_250, %c0_251, %c0_252] : memref<5x1x128xf32, #tpu.memory_space<vmem>>, vector<1x1x128xf32>
    %614 = vector.shape_cast %613 : vector<1x1x128xf32> to vector<1x128xf32>
    %c3_i32_253 = arith.constant 3 : i32
    %615 = arith.cmpi eq, %580, %c3_i32_253 : i32
    %616 = arith.extui %615 : i1 to i32
    %617 = arith.sitofp %616 : i32 to f32
    %618 = vector.broadcast %617 : f32 to vector<1x128xf32>
    %619 = arith.mulf %614, %618 : vector<1x128xf32>
    %620 = arith.addf %612, %619 : vector<1x128xf32>
    %c4_254 = arith.constant 4 : index
    %c0_255 = arith.constant 0 : index
    %c0_256 = arith.constant 0 : index
    %621 = vector.load %arg7[%c4_254, %c0_255, %c0_256] : memref<5x1x128xf32, #tpu.memory_space<vmem>>, vector<1x1x128xf32>
    %622 = vector.shape_cast %621 : vector<1x1x128xf32> to vector<1x128xf32>
    %c4_i32_257 = arith.constant 4 : i32
    %623 = arith.cmpi eq, %580, %c4_i32_257 : i32
    %624 = arith.extui %623 : i1 to i32
    %625 = arith.sitofp %624 : i32 to f32
    %626 = vector.broadcast %625 : f32 to vector<1x128xf32>
    %627 = arith.mulf %622, %626 : vector<1x128xf32>
    %628 = arith.addf %620, %627 : vector<1x128xf32>
    %c32_i32_258 = arith.constant 32 : i32
    %629 = tpu.dynamic_rotate %527 by %c32_i32_258 dim 1 : vector<1x128xf32>, i32 -> vector<1x128xf32>
    %630 = arith.addf %628, %629 : vector<1x128xf32>
    %631 = arith.truncf %630 : vector<1x128xf32> to vector<1x128xbf16>
    %c0_259 = arith.constant 0 : index
    %c0_260 = arith.constant 0 : index
    %632 = vector.load %arg1[%c0_259, %c0_260] : memref<128x128xbf16, #tpu.memory_space<vmem>>, vector<128x128xbf16>
    %cst_261 = arith.constant dense<0.000000e+00> : vector<1x128xf32>
    %633 = tpu.matmul %631, %632, %cst_261 {dimension_numbers = #tpu.dot_dimension_numbers<[1], [0], [0], [1], [0, 0, 1, 1], [], []>} : vector<1x128xbf16>, vector<128x128xbf16>, vector<1x128xf32> -> vector<1x128xf32>
    %c0_262 = arith.constant 0 : index
    %c0_263 = arith.constant 0 : index
    %634 = vector.load %arg2[%c0_262, %c0_263] : memref<1x128xf32, #tpu.memory_space<vmem>>, vector<1x128xf32>
    %635 = arith.addf %633, %634 : vector<1x128xf32>
    %636 = arith.negf %635 : vector<1x128xf32>
    %637 = math.exp %636 : vector<1x128xf32>
    %cst_264 = arith.constant 1.000000e+00 : f32
    %638 = vector.broadcast %cst_264 : f32 to vector<1x128xf32>
    %639 = arith.addf %638, %637 : vector<1x128xf32>
    %640 = arith.divf %638, %639 : vector<1x128xf32>
    %641 = math.tanh %635 : vector<1x128xf32>
    %c96_i32_265 = arith.constant 96 : i32
    %642 = tpu.dynamic_rotate %640 by %c96_i32_265 dim 1 : vector<1x128xf32>, i32 -> vector<1x128xf32>
    %c64_i32_266 = arith.constant 64 : i32
    %643 = tpu.dynamic_rotate %641 by %c64_i32_266 dim 1 : vector<1x128xf32>, i32 -> vector<1x128xf32>
    %c32_i32_267 = arith.constant 32 : i32
    %644 = tpu.dynamic_rotate %640 by %c32_i32_267 dim 1 : vector<1x128xf32>, i32 -> vector<1x128xf32>
    %645 = arith.mulf %642, %525 : vector<1x128xf32>
    %646 = arith.mulf %640, %643 : vector<1x128xf32>
    %647 = arith.addf %645, %646 : vector<1x128xf32>
    %648 = arith.mulf %9, %647 : vector<1x128xf32>
    %649 = math.tanh %648 : vector<1x128xf32>
    %650 = arith.mulf %644, %649 : vector<1x128xf32>
    %c32_i32_268 = arith.constant 32 : i32
    %651 = tpu.dynamic_rotate %549 by %c32_i32_268 dim 1 : vector<1x128xf32>, i32 -> vector<1x128xf32>
    %652 = arith.addf %650, %651 : vector<1x128xf32>
    %653 = arith.truncf %652 : vector<1x128xf32> to vector<1x128xbf16>
    %c0_269 = arith.constant 0 : index
    %c0_270 = arith.constant 0 : index
    %654 = vector.load %arg3[%c0_269, %c0_270] : memref<128x128xbf16, #tpu.memory_space<vmem>>, vector<128x128xbf16>
    %cst_271 = arith.constant dense<0.000000e+00> : vector<1x128xf32>
    %655 = tpu.matmul %653, %654, %cst_271 {dimension_numbers = #tpu.dot_dimension_numbers<[1], [0], [0], [1], [0, 0, 1, 1], [], []>} : vector<1x128xbf16>, vector<128x128xbf16>, vector<1x128xf32> -> vector<1x128xf32>
    %c0_272 = arith.constant 0 : index
    %c0_273 = arith.constant 0 : index
    %656 = vector.load %arg4[%c0_272, %c0_273] : memref<1x128xf32, #tpu.memory_space<vmem>>, vector<1x128xf32>
    %657 = arith.addf %655, %656 : vector<1x128xf32>
    %658 = arith.negf %657 : vector<1x128xf32>
    %659 = math.exp %658 : vector<1x128xf32>
    %cst_274 = arith.constant 1.000000e+00 : f32
    %660 = vector.broadcast %cst_274 : f32 to vector<1x128xf32>
    %661 = arith.addf %660, %659 : vector<1x128xf32>
    %662 = arith.divf %660, %661 : vector<1x128xf32>
    %663 = math.tanh %657 : vector<1x128xf32>
    %c96_i32_275 = arith.constant 96 : i32
    %664 = tpu.dynamic_rotate %662 by %c96_i32_275 dim 1 : vector<1x128xf32>, i32 -> vector<1x128xf32>
    %c64_i32_276 = arith.constant 64 : i32
    %665 = tpu.dynamic_rotate %663 by %c64_i32_276 dim 1 : vector<1x128xf32>, i32 -> vector<1x128xf32>
    %c32_i32_277 = arith.constant 32 : i32
    %666 = tpu.dynamic_rotate %662 by %c32_i32_277 dim 1 : vector<1x128xf32>, i32 -> vector<1x128xf32>
    %667 = arith.mulf %664, %547 : vector<1x128xf32>
    %668 = arith.mulf %662, %665 : vector<1x128xf32>
    %669 = arith.addf %667, %668 : vector<1x128xf32>
    %670 = arith.mulf %9, %669 : vector<1x128xf32>
    %671 = math.tanh %670 : vector<1x128xf32>
    %672 = arith.mulf %666, %671 : vector<1x128xf32>
    %673 = arith.truncf %672 : vector<1x128xf32> to vector<1x128xbf16>
    %c0_278 = arith.constant 0 : index
    %c0_279 = arith.constant 0 : index
    %674 = vector.load %arg5[%c0_278, %c0_279] : memref<128x128xbf16, #tpu.memory_space<vmem>>, vector<128x128xbf16>
    %cst_280 = arith.constant dense<0.000000e+00> : vector<1x128xf32>
    %675 = tpu.matmul %673, %674, %cst_280 {dimension_numbers = #tpu.dot_dimension_numbers<[1], [0], [0], [1], [0, 0, 1, 1], [], []>} : vector<1x128xbf16>, vector<128x128xbf16>, vector<1x128xf32> -> vector<1x128xf32>
    %c0_281 = arith.constant 0 : index
    %c0_282 = arith.constant 0 : index
    %676 = vector.load %arg6[%c0_281, %c0_282] : memref<1x128xf32, #tpu.memory_space<vmem>>, vector<1x128xf32>
    %677 = arith.addf %675, %676 : vector<1x128xf32>
    %678 = math.tanh %677 : vector<1x128xf32>
    %cst_283 = arith.constant 2.500000e+00 : f32
    %679 = vector.broadcast %cst_283 : f32 to vector<1x128xf32>
    %680 = arith.mulf %679, %678 : vector<1x128xf32>
    %681 = arith.addf %680, %5 : vector<1x128xf32>
    %682 = math.exp %681 : vector<1x128xf32>
    %cst_284 = arith.constant dense<0.000000e+00> : vector<1xf32>
    %683 = vector.multi_reduction <add>, %682, %cst_284 [1] : vector<1x128xf32> to vector<1xf32>
    %684 = vector.shape_cast %683 : vector<1xf32> to vector<1x1xf32>
    %685 = math.log %684 : vector<1x1xf32>
    %686 = vector.broadcast %685 : vector<1x1xf32> to vector<1x128xf32>
    %687 = arith.subf %681, %686 : vector<1x128xf32>
    %688 = vector.broadcast %684 : vector<1x1xf32> to vector<1x128xf32>
    %689 = arith.divf %682, %688 : vector<1x128xf32>
    %c5 = arith.constant 5 : index
    %c0_285 = arith.constant 0 : index
    %690 = vector.load %arg8[%c5, %c0_285] : memref<6x128xf32, #tpu.memory_space<vmem>>, vector<1x128xf32>
    %691 = arith.addf %681, %690 : vector<1x128xf32>
    %692 = vector.shape_cast %691 : vector<1x128xf32> to vector<1x1x128xf32>
    %cst_286 = arith.constant dense<0xFF800000> : vector<1xf32>
    %693 = vector.multi_reduction <maximumf>, %692, %cst_286 [1, 2] : vector<1x1x128xf32> to vector<1xf32>
    %694 = vector.shape_cast %693 : vector<1xf32> to vector<1x1x1xf32>
    %695 = vector.extract %694[0, 0, 0] : f32 from vector<1x1x1xf32>
    %696 = vector.broadcast %695 : f32 to vector<1x128xf32>
    %697 = arith.cmpf oeq, %691, %696 : vector<1x128xf32>
    %c128_i32_287 = arith.constant 128 : i32
    %698 = vector.broadcast %c128_i32_287 : i32 to vector<1x128xi32>
    %699 = arith.select %697, %0, %698 : vector<1x128xi1>, vector<1x128xi32>
    %700 = vector.shape_cast %699 : vector<1x128xi32> to vector<1x1x128xi32>
    %cst_288 = arith.constant dense<2147483647> : vector<1xi32>
    %701 = vector.multi_reduction <minsi>, %700, %cst_288 [1, 2] : vector<1x1x128xi32> to vector<1xi32>
    %702 = vector.shape_cast %701 : vector<1xi32> to vector<1x1x1xi32>
    %703 = vector.extract %702[0, 0, 0] : i32 from vector<1x1x1xi32>
    %704 = vector.broadcast %703 : i32 to vector<1x128xi32>
    %705 = arith.cmpi eq, %0, %704 : vector<1x128xi32>
    %706 = arith.extui %705 : vector<1x128xi1> to vector<1x128xi32>
    %707 = arith.sitofp %706 : vector<1x128xi32> to vector<1x128xf32>
    %708 = arith.mulf %707, %687 : vector<1x128xf32>
    %709 = arith.addf %586, %708 : vector<1x128xf32>
    %710 = arith.mulf %689, %687 : vector<1x128xf32>
    %711 = arith.addf %588, %710 : vector<1x128xf32>
    %c5_289 = arith.constant 5 : index
    %712 = memref.load %arg11[%c5_289] : memref<6xi32, #tpu.memory_space<smem>>
    memref.store %703, %arg11[%c5_289] : memref<6xi32, #tpu.memory_space<smem>>
    %713 = vector.shape_cast %709 : vector<1x128xf32> to vector<1x1x128xf32>
    %cst_290 = arith.constant dense<0.000000e+00> : vector<1xf32>
    %714 = vector.multi_reduction <add>, %713, %cst_290 [1, 2] : vector<1x1x128xf32> to vector<1xf32>
    %715 = vector.shape_cast %714 : vector<1xf32> to vector<1x1x1xf32>
    %716 = vector.extract %715[0, 0, 0] : f32 from vector<1x1x1xf32>
    %c0_291 = arith.constant 0 : index
    %717 = memref.load %arg9[%c0_291] : memref<1xf32, #tpu.memory_space<smem>>
    memref.store %716, %arg9[%c0_291] : memref<1xf32, #tpu.memory_space<smem>>
    %718 = vector.shape_cast %711 : vector<1x128xf32> to vector<1x1x128xf32>
    %cst_292 = arith.constant dense<0.000000e+00> : vector<1xf32>
    %719 = vector.multi_reduction <add>, %718, %cst_292 [1, 2] : vector<1x1x128xf32> to vector<1xf32>
    %720 = vector.shape_cast %719 : vector<1xf32> to vector<1x1x1xf32>
    %721 = vector.extract %720[0, 0, 0] : f32 from vector<1x1x1xf32>
    %cst_293 = arith.constant 0.000000e+00 : f32
    %722 = arith.subf %cst_293, %721 : f32
    %c0_294 = arith.constant 0 : index
    %723 = memref.load %arg10[%c0_294] : memref<1xf32, #tpu.memory_space<smem>>
    memref.store %722, %arg10[%c0_294] : memref<1xf32, #tpu.memory_space<smem>>
    return
  }
}

</mosaic_0001>

<bundles_post_ra>
// kernel: _controller_forward.1
= control target key start
LH: loop header
LB: loop body
LE: loop exit
PB: predicated region body
PF: predicated region fallthrough
CT: control target
= control target key end

     0   :  { %17 = vsyncpa [#allocation3], 0  ;;  %s4832_s0 = inlined_call_operand.hbm [shape: f32[1,128], index: 0, kind: input, shape index: {}]   ;;  %s4833_s1 = inlined_call_operand.hbm [shape: bf16[128,128], index: 1, kind: input, shape index: {}]   ;;  %s4834_s2 = inlined_call_operand.vmem [shape: f32[1,128], index: 2, kind: input, shape index: {}]   ;;  %s4835_s3 = inlined_call_operand.hbm [shape: bf16[128,128], index: 3, kind: input, shape index: {}]   ;;  %s4836_s4 = inlined_call_operand.vmem [shape: f32[1,128], index: 4, kind: input, shape index: {}]   ;;  %s4837_s5 = inlined_call_operand.hbm [shape: bf16[128,128], index: 5, kind: input, shape index: {}]   ;;  %s4838_s6 = inlined_call_operand.vmem [shape: f32[1,128], index: 6, kind: input, shape index: {}]   ;;  %s4839_s7 = inlined_call_operand.vmem [shape: f32[5,1,128], index: 7, kind: input, shape index: {}]   ;;  %s4840_s8 = inlined_call_operand.vmem [shape: f32[6,128], index: 8, kind: input, shape index: {}]   ;;  %s4841_s9 = inlined_call_operand.hbm [shape: f32[1], index: 9, kind: output, shape index: {0}]   ;;  %s4842_s10 = inlined_call_operand.hbm [shape: f32[1], index: 10, kind: output, shape index: {1}]   ;;  %s4843_s11 = inlined_call_operand.hbm [shape: s32[6], index: 11, kind: output, shape index: {2}]  }
   0x1   :  { %18 = vsyncpa [#allocation6], 0 }
   0x2   :  { %19 = vsyncpa [#allocation9], 0 }
   0x3   :  { %20 = vsyncpa [#allocation4], 0 }
   0x4   :  { %21 = vsyncpa [#allocation12], 0  ;;  %s4049_s17 = smov [#allocation5]   ;;  %s3921_s21 = scalar_lea.hbm %s4833_s1, 1024 }
   0x5   :  { %s37_s18 = sshll.u32 %s4049_s17, 4  ;;  %p3922_p0 = scmp.ne.s32.totalorder %s4833_s1, %s3921_s21  ;;  %s38_s18 = int_to_ptr.vmem [resolvable:$true] %s37_s18 }
   0x6   :  { %p3925_p1 = scmp.lt.u32.totalorder %s3921_s21, %s4833_s1 }
   0x8   :  { %p3927_p2 = pnand %p3925_p1, %p3922_p0 }
   0xa   :  { %3930 = shalt.err (!%p3927_p2)
}
   0xb   :  { %s3931_s26 = scalar_lea.vmem %s38_s18, 1024  ;;  %p3936_p4 = scmp.lt.s32.totalorder %s38_s18, %s38_s18 }
   0xc   :  { %p3932_p3 = scmp.ne.s32.totalorder %s38_s18, %s3931_s26  ;;  %p3937_p5 = scmp.lt.s32.totalorder %s3931_s26, %s3931_s26 }
   0xe   :  { %p3938_p6 = por %p3937_p5, %p3936_p4 }
  0x10   :  { %p3939_p7 = pnand %p3938_p6, %p3932_p3 }
  0x12   :  { %3942 = shalt.err (!%p3939_p7)
}
  0x13   :  { %s4050_s27 = smov 64   ;;  %s4051_s28 = smov 4  }
  0x14   :  { %43 = dma.hbm_to_vmem [thread:$0]  %s4833_s1, 1024, %s38_s18, [#allocation6], %s4050_s27, %s4050_s27, %s4051_s28  }
  0x15   :  { %s4052_s12 = smov [#allocation2]   ;;  %s4053_s14 = smov [#allocation7]  }
  0x16   :  { %s28_s13 = sshll.u32 %s4052_s12, 4  ;;  %s51_s15 = sshll.u32 %s4053_s14, 4  ;;  %s29_s13 = int_to_ptr.vmem [resolvable:$true] %s28_s13  ;;  %s52_s15 = int_to_ptr.vmem [resolvable:$true] %s51_s15 }
  0x17   :  { %s3943_s19 = scalar_lea.hbm %s4832_s0, 16 }
  0x18   :  { %p3944_p8 = scmp.ne.s32.totalorder %s4832_s0, %s3943_s19  ;;  %p3947_p9 = scmp.lt.u32.totalorder %s3943_s19, %s4832_s0 }
  0x1a   :  { %p3949_p10 = pnand %p3947_p9, %p3944_p8 }
  0x1c   :  { %3952 = shalt.err (!%p3949_p10)
}
  0x1d   :  { %s3953_s1 = scalar_lea.vmem %s29_s13, 16  ;;  %s3957_s18 = scalar_lea.vmem %s29_s13, 32 }
  0x1e   :  { %p3954_p11 = scmp.ne.s32.totalorder %s29_s13, %s3953_s1  ;;  %p3958_p12 = scmp.lt.s32.totalorder %s29_s13, %s29_s13 }
  0x1f   :  { %p3959_p13 = scmp.lt.s32.totalorder %s3957_s18, %s3953_s1 }
  0x21   :  { %p3960_p0 = por %p3959_p13, %p3958_p12 }
  0x23   :  { %p3961_p1 = pnand %p3960_p0, %p3954_p11 }
  0x25   :  { %3964 = shalt.err (!%p3961_p1)
}
  0x26   :  { %31 = dma.hbm_to_vmem [thread:$0]  %s4832_s0, 16, %s29_s13, [#allocation3]  }
  0x27   :  { %s3965_s30 = scalar_lea.hbm %s4835_s3, 1024 }
  0x28   :  { %p3966_p2 = scmp.ne.s32.totalorder %s4835_s3, %s3965_s30  ;;  %p3969_p3 = scmp.lt.u32.totalorder %s3965_s30, %s4835_s3 }
  0x2a   :  { %p3971_p4 = pnand %p3969_p3, %p3966_p2 }
  0x2c   :  { %3974 = shalt.err (!%p3971_p4)
}
  0x2d   :  { %s3975_s19 = scalar_lea.vmem %s52_s15, 1024  ;;  %p3980_p6 = scmp.lt.s32.totalorder %s52_s15, %s52_s15 }
  0x2e   :  { %p3976_p5 = scmp.ne.s32.totalorder %s52_s15, %s3975_s19  ;;  %p3981_p7 = scmp.lt.s32.totalorder %s3975_s19, %s3975_s19 }
  0x30   :  { %p3982_p8 = por %p3981_p7, %p3980_p6 }
  0x32   :  { %p3983_p9 = pnand %p3982_p8, %p3976_p5 }
  0x34   :  { %3986 = shalt.err (!%p3983_p9)
}
  0x35   :  { %57 = dma.hbm_to_vmem [thread:$0]  %s4835_s3, 1024, %s52_s15, [#allocation6], %s4050_s27, %s4050_s27, %s4051_s28  }
  0x36   :  { %s4054_s20 = smov [#allocation8]   ;;  %s3987_s1 = scalar_lea.hbm %s4837_s5, 1024 }
  0x37   :  { %s65_s21 = sshll.u32 %s4054_s20, 4  ;;  %p3988_p10 = scmp.ne.s32.totalorder %s4837_s5, %s3987_s1  ;;  %s66_s21 = int_to_ptr.vmem [resolvable:$true] %s65_s21 }
  0x38   :  { %p3991_p11 = scmp.lt.u32.totalorder %s3987_s1, %s4837_s5 }
  0x3a   :  { %p3993_p12 = pnand %p3991_p11, %p3988_p10 }
  0x3c   :  { %3996 = shalt.err (!%p3993_p12)
}
  0x3d   :  { %s3997_s29 = scalar_lea.vmem %s66_s21, 1024  ;;  %p4002_p0 = scmp.lt.s32.totalorder %s66_s21, %s66_s21 }
  0x3e   :  { %p3998_p13 = scmp.ne.s32.totalorder %s66_s21, %s3997_s29  ;;  %p4003_p1 = scmp.lt.s32.totalorder %s3997_s29, %s3997_s29 }
  0x40   :  { %p4004_p2 = por %p4003_p1, %p4002_p0 }
  0x42   :  { %p4005_p3 = pnand %p4004_p2, %p3998_p13 }
  0x44   :  { %4008 = shalt.err (!%p4005_p3)
}
  0x45   :  { %71 = dma.hbm_to_vmem [thread:$0]  %s4837_s5, 1024, %s66_s21, [#allocation9], %s4050_s27, %s4050_s27, %s4051_s28  }
  0x46   :  { %4039 = dma.done.wait [#allocation3], 16  }
  0x47   :  { %4040 = vsyncadd [#allocation3], 4294967280 }
  0x48   :  { %4041 = dma.done.wait [#allocation6], 2048  }
  0x49   :  { %4042 = vsyncadd [#allocation6], 4294965248 }
  0x4a   :  { %4043 = dma.done.wait [#allocation9], 1024  }
  0x4b   :  { %4044 = vsyncadd [#allocation9], 4294966272  ;;  %v4055_v0 = vmov 0.0   ;;  %s4056_s30 = smov 32   ;;  %vm4057_vm0 = vmmov 0   ;;  %v3633_v1 = vld [vmem:[#allocation5] sm:$0xff]   ;;  %v91_v32 = vlaneseq }
  0x4c   :  { %99 = vrot.lane.b32.xlu0 %v4055_v0, %s4056_s30  ;;  %3231 = vmatprep.subr.bf16.mxu0 %v4055_v0  ;;  %v3634_v2 = vld [vmem:[#allocation5 + $0x8] sm:$0xff]   ;;  %v3635_v3 = vld [vmem:[#allocation5 + $0x10] sm:$0xff]   ;;  %v3636_v4 = vld [vmem:[#allocation5 + $0x18] sm:$0xff]   ;;  %s4058_s12 = smov 96   ;;  %vm464_vm3 = vcmask 1040384  }
  0x4d   :  { %3247 = vmatprep.mubr.msk.bf16.mxu0 %vm4057_vm0, %v4055_v0  ;;  %3251 = vmatprep.subr.bf16.mxu1 %v4055_v0  ;;  %v3637_v5 = vld [vmem:[#allocation5 + $0x20] sm:$0xff]   ;;  %v3638_v6 = vld [vmem:[#allocation5 + $0x28] sm:$0xff]   ;;  %v3639_v7 = vld [vmem:[#allocation5 + $0x30] sm:$0xff]   ;;  %v4212_v33 = vand.u32 127, %v91_v32 }
  0x4e   :  { %3267 = vmatprep.mubr.msk.bf16.mxu1 %vm4057_vm0, %v4055_v0  ;;  %3232 = vmatpush3.bf16.msra.mxu0 %v3633_v1  ;;  %v3640_v8 = vld [vmem:[#allocation5 + $0x38] sm:$0xff]   ;;  %v119_v13 = vld [vmem:[%s4834_s2] sm:$0x1]  ;;  %v3641_v17 = vld [vmem:[#allocation7] sm:$0xff]  }
  0x4f   :  { %3233 = vmatprep.subr.bf16.mxu0 %v4055_v0  ;;  %v98_v9 = vld [vmem:[#allocation2] sm:$0x1]  ;;  %3252 = vmatpush3.bf16.msra.mxu1 %v3641_v17  ;;  %v3642_v21 = vld [vmem:[#allocation7 + $0x8] sm:$0xff]   ;;  %v3643_v23 = vld [vmem:[#allocation7 + $0x10] sm:$0xff]   ;;  %vm95_vm1 = vcmp.lt.s32.totalorder %v4212_v33, 32  ;;  %vm93_vm2 = vcmp.lt.s32.totalorder %v4212_v33, 5 }
  0x50   :  { %3253 = vmatprep.subr.bf16.mxu1 %v4055_v0  ;;  %v3644_v26 = vld [vmem:[#allocation7 + $0x18] sm:$0xff]   ;;  %v3645_v27 = vld [vmem:[#allocation7 + $0x20] sm:$0xff]   ;;  %v3646_v28 = vld [vmem:[#allocation7 + $0x28] sm:$0xff]   ;;  %v4216_v38 = vsel %vm95_vm1, 1.0, %v4055_v0 }
  0x51   :  { %v3647_v30 = vld [vmem:[#allocation7 + $0x30] sm:$0xff]   ;;  %v3648_v31 = vld [vmem:[#allocation7 + $0x38] sm:$0xff]   ;;  %v245_v46 = vld [vmem:[%s4836_s4] sm:$0x1] }
  0x52   :  { %3234 = vmatpush3.bf16.msra.mxu0 %v3634_v2  ;;  %v3649_v50 = vld [vmem:[#allocation8] sm:$0xff]   ;;  %v3650_v54 = vld [vmem:[#allocation8 + $0x8] sm:$0xff]   ;;  %v3651_v55 = vld [vmem:[#allocation8 + $0x10] sm:$0xff]  }
  0x53   :  { %3235 = vmatprep.subr.bf16.mxu0 %v4055_v0  ;;  %3254 = vmatpush3.bf16.msra.mxu1 %v3642_v21  ;;  %v3652_v59 = vld [vmem:[#allocation8 + $0x18] sm:$0xff]   ;;  %v3653_v60 = vld [vmem:[#allocation8 + $0x20] sm:$0xff]   ;;  %v3654_v61 = vld [vmem:[#allocation8 + $0x28] sm:$0xff]  }
  0x54   :  { %3255 = vmatprep.subr.bf16.mxu1 %v4055_v0  ;;  %v3655_v63 = vld [vmem:[#allocation8 + $0x30] sm:$0xff]   ;;  %v3656_v1 = vld [vmem:[#allocation8 + $0x38] sm:$0xff]  }
  0x56   :  { %3236 = vmatpush3.bf16.msra.mxu0 %v3635_v3 }
  0x57   :  { %3237 = vmatprep.subr.bf16.mxu0 %v4055_v0  ;;  %3256 = vmatpush3.bf16.msra.mxu1 %v3643_v23 }
  0x58   :  { %3257 = vmatprep.subr.bf16.mxu1 %v4055_v0 }
  0x5a   :  { %3238 = vmatpush3.bf16.msra.mxu0 %v3636_v4 }
  0x5b   :  { %3239 = vmatprep.subr.bf16.mxu0 %v4055_v0  ;;  %3258 = vmatpush3.bf16.msra.mxu1 %v3644_v26 }
  0x5c   :  { %3259 = vmatprep.subr.bf16.mxu1 %v4055_v0 }
  0x5e   :  { %3240 = vmatpush3.bf16.msra.mxu0 %v3637_v5 }
  0x5f   :  { %3241 = vmatprep.subr.bf16.mxu0 %v4055_v0  ;;  %3260 = vmatpush3.bf16.msra.mxu1 %v3645_v27 }
  0x60   :  { %3261 = vmatprep.subr.bf16.mxu1 %v4055_v0 }
  0x62   :  { %3242 = vmatpush3.bf16.msra.mxu0 %v3638_v6 }
  0x63   :  { %3243 = vmatprep.subr.bf16.mxu0 %v4055_v0  ;;  %3262 = vmatpush3.bf16.msra.mxu1 %v3646_v28 }
  0x64   :  { %3263 = vmatprep.subr.bf16.mxu1 %v4055_v0 }
  0x66   :  { %3244 = vmatpush3.bf16.msra.mxu0 %v3639_v7 }
  0x67   :  { %3245 = vmatprep.subr.bf16.mxu0 %v4055_v0  ;;  %3264 = vmatpush3.bf16.msra.mxu1 %v3647_v30 }
  0x68   :  { %3265 = vmatprep.subr.bf16.mxu1 %v4055_v0 }
  0x6a   :  { %3246 = vmatpush3.bf16.msra.mxu0 %v3640_v8 }
  0x6b   :  { %3271 = vmatprep.subr.bf16.mxu0 %v4055_v0  ;;  %3266 = vmatpush3.bf16.msra.mxu1 %v3648_v31 }
  0x6c   :  { %3291 = vmatprep.subr.bf16.mxu1 %v4055_v0 }
  0xbe   :  { %v100_v10 = vpop.permute.xlu0 %99 }
  0xbf   :  { %v101_v11 = vadd.f32 %v100_v10, %v98_v9 }
  0xc1   :  { %v102_v12 = vpack.c.bf16 %v101_v11, %v101_v11 }
  0xc3   :  { %3248 = vmatmul.mubr.bf16.vlgmr.msra.gmra.mrb[0].mxu0 %v102_v12  ;;  %v370_v12 = vld [vmem:[%s4838_s6] sm:$0x1] }
  0xc4   :  { %3287 = vmatprep.mubr.msk.bf16.mxu0 %vm4057_vm0, %v4055_v0  ;;  %3272 = vmatpush3.bf16.msra.mxu0 %v3649_v50  ;;  %v3662_v50 = vld [vmem:[#allocation5 + $0x28] sm:$0xff]  }
  0xc5   :  { %3273 = vmatprep.subr.bf16.mxu0 %v4055_v0 }
  0xc8   :  { %3274 = vmatpush3.bf16.msra.mxu0 %v3650_v54 }
  0xc9   :  { %3275 = vmatprep.subr.bf16.mxu0 %v4055_v0 }
  0xcc   :  { %3276 = vmatpush3.bf16.msra.mxu0 %v3651_v55 }
  0xcd   :  { %3277 = vmatprep.subr.bf16.mxu0 %v4055_v0 }
  0xd0   :  { %3278 = vmatpush3.bf16.msra.mxu0 %v3652_v59 }
  0xd1   :  { %3279 = vmatprep.subr.bf16.mxu0 %v4055_v0 }
  0xd4   :  { %3280 = vmatpush3.bf16.msra.mxu0 %v3653_v60 }
  0xd5   :  { %3281 = vmatprep.subr.bf16.mxu0 %v4055_v0 }
  0xd8   :  { %3282 = vmatpush3.bf16.msra.mxu0 %v3654_v61 }
  0xd9   :  { %3283 = vmatprep.subr.bf16.mxu0 %v4055_v0 }
  0xdc   :  { %3284 = vmatpush3.bf16.msra.mxu0 %v3655_v63 }
  0xdd   :  { %3285 = vmatprep.subr.bf16.mxu0 %v4055_v0 }
  0xe0   :  { %3286 = vmatpush3.bf16.msra.mxu0 %v3656_v1  ;;  %v523_v1 = vld [vmem:[%s4839_s7] sm:$0x1] }
  0xe1   :  { %3311 = vmatprep.subr.bf16.mxu0 %v4055_v0 }
 0x196   :  { %v202_v14 = vpop.f32.mrb[0].mxu0 }
 0x197   :  { %v203_v15 = vadd.f32 %v202_v14, %v119_v13  ;;  %v3249_v16 = vpop.f32.mrb[1].mxu0 }
 0x198   :  { %v205_v18 = vpop.f32.mrb[2].mxu0 }
 0x199   :  { %v2895_v19 = vmul.f32 -1.442695, %v203_v15  ;;  %v3250_v20 = vpop.f32.mrb[3].mxu0  ;;  %3777 = vtanh.f32 %v203_v15 }
 0x19b   :  { %3779 = vpow2.f32 %v2895_v19  ;;  %v4059_v19 = vmov -1e+30  }
 0x19c   :  { %v4255_v20 = vsel %vm93_vm2, 0.0, %v4059_v19 }
 0x1a3   :  { %v3778_v22 = vpop.eup %3777 }
 0x1a4   :  { %217 = vrot.lane.b32.xlu1 %v3778_v22, %s4050_s27  ;;  %v473_v22 = vld [vmem:[%s4840_s8] sm:$0x1] }
 0x1a5   :  { %v3780_v24 = vpop.eup %3779 }
 0x1a6   :  { %v211_v25 = vadd.f32 1.0, %v3780_v24 }
 0x1a8   :  { %3781 = vrcp.f32 %v211_v25 }
 0x1b2   :  { %v3782_v29 = vpop.eup %3781 }
 0x1b3   :  { %219 = vrot.lane.b32.xlu1 %v3782_v29, %s4056_s30  ;;  %215 = vrot.lane.b32.xlu0 %v3782_v29, %s4058_s12 }
 0x216   :  { %v218_v34 = vpop.permute.xlu1 %217 }
 0x217   :  { %v222_v36 = vmul.f32 %v3782_v29, %v218_v34 }
 0x225   :  { %v216_v35 = vpop.permute.xlu0 %215  ;;  %v220_v42 = vpop.permute.xlu1 %219 }
 0x226   :  { %v221_v37 = vmul.f32 0.0, %v216_v35 }
 0x228   :  { %v223_v39 = vadd.f32 %v222_v36, %v221_v37 }
 0x22a   :  { %v4219_v40 = vmul.f32 %v4216_v38, %v223_v39 }
 0x22c   :  { %3783 = vtanh.f32 %v4219_v40 }
 0x236   :  { %v3784_v41 = vpop.eup %3783 }
 0x237   :  { %v4222_v43 = vmul.f32 %v3784_v41, %v220_v42 }
 0x239   :  { %v227_v44 = vadd.f32 %v4222_v43, %v100_v10 }
 0x23b   :  { %v228_v45 = vpack.c.bf16 %v227_v44, %v227_v44 }
 0x23d   :  { %3268 = vmatmul.mubr.bf16.vlgmr.msra.gmra.mrb[0].mxu1 %v228_v45  ;;  %v3657_v45 = vld [vmem:[#allocation5] sm:$0xff]  }
 0x23e   :  { %3307 = vmatprep.mubr.msk.bf16.mxu1 %vm4057_vm0, %v4055_v0  ;;  %3292 = vmatpush3.bf16.msra.mxu1 %v3657_v45  ;;  %v3669_v45 = vld [vmem:[#allocation7 + $0x20] sm:$0xff]  }
 0x23f   :  { %3293 = vmatprep.subr.bf16.mxu1 %v4055_v0 }
 0x310   :  { %v328_v47 = vpop.f32.mrb[0].mxu1 }
 0x311   :  { %v329_v48 = vadd.f32 %v328_v47, %v245_v46  ;;  %v3269_v49 = vpop.f32.mrb[1].mxu1  ;;  %v3658_v46 = vld [vmem:[#allocation5 + $0x8] sm:$0xff]   ;;  %v3659_v47 = vld [vmem:[#allocation5 + $0x10] sm:$0xff]  }
 0x312   :  { %v331_v51 = vpop.f32.mrb[2].mxu1  ;;  %3294 = vmatpush3.bf16.msra.mxu1 %v3658_v46  ;;  %v3661_v49 = vld [vmem:[#allocation5 + $0x20] sm:$0xff]   ;;  %v3670_v46 = vld [vmem:[#allocation7 + $0x28] sm:$0xff]  }
 0x313   :  { %v2904_v52 = vmul.f32 -1.442695, %v329_v48  ;;  %3785 = vtanh.f32 %v329_v48  ;;  %v3270_v53 = vpop.f32.mrb[3].mxu1  ;;  %3295 = vmatprep.subr.bf16.mxu1 %v4055_v0  ;;  %v3660_v48 = vld [vmem:[#allocation5 + $0x18] sm:$0xff]   ;;  %v3663_v51 = vld [vmem:[#allocation5 + $0x30] sm:$0xff]  }
 0x315   :  { %3787 = vpow2.f32 %v2904_v52  ;;  %v3664_v52 = vld [vmem:[#allocation5 + $0x38] sm:$0xff]  }
 0x316   :  { %3296 = vmatpush3.bf16.msra.mxu1 %v3659_v47  ;;  %v3671_v47 = vld [vmem:[#allocation7 + $0x30] sm:$0xff]  }
 0x317   :  { %3297 = vmatprep.subr.bf16.mxu1 %v4055_v0 }
 0x31a   :  { %3298 = vmatpush3.bf16.msra.mxu1 %v3660_v48  ;;  %v3672_v48 = vld [vmem:[#allocation7 + $0x38] sm:$0xff]  }
 0x31b   :  { %3299 = vmatprep.subr.bf16.mxu1 %v4055_v0 }
 0x31d   :  { %v3786_v56 = vpop.eup %3785 }
 0x31e   :  { %343 = vrot.lane.b32.xlu1 %v3786_v56, %s4050_s27  ;;  %3300 = vmatpush3.bf16.msra.mxu1 %v3661_v49 }
 0x31f   :  { %v3788_v57 = vpop.eup %3787  ;;  %3301 = vmatprep.subr.bf16.mxu1 %v4055_v0 }
 0x320   :  { %v337_v58 = vadd.f32 1.0, %v3788_v57 }
 0x322   :  { %3789 = vrcp.f32 %v337_v58  ;;  %3302 = vmatpush3.bf16.msra.mxu1 %v3662_v50 }
 0x323   :  { %3303 = vmatprep.subr.bf16.mxu1 %v4055_v0 }
 0x326   :  { %3304 = vmatpush3.bf16.msra.mxu1 %v3663_v51 }
 0x327   :  { %3305 = vmatprep.subr.bf16.mxu1 %v4055_v0 }
 0x32a   :  { %3306 = vmatpush3.bf16.msra.mxu1 %v3664_v52 }
 0x32b   :  { %3331 = vmatprep.subr.bf16.mxu1 %v4055_v0 }
 0x32c   :  { %v3790_v62 = vpop.eup %3789 }
 0x32d   :  { %341 = vrot.lane.b32.xlu0 %v3790_v62, %s4058_s12 }
 0x331   :  { %345 = vrot.lane.b32.xlu0 %v3790_v62, %s4056_s30 }
 0x390   :  { %v344_v2 = vpop.permute.xlu1 %343 }
 0x391   :  { %v348_v4 = vmul.f32 %v3790_v62, %v344_v2  ;;  %v2914_v2 = vld [vmem:[%s4839_s7 + $0x1] sm:$0x1] }
 0x39f   :  { %v342_v3 = vpop.permute.xlu0 %341 }
 0x3a0   :  { %v347_v5 = vmul.f32 0.0, %v342_v3 }
 0x3a2   :  { %v349_v6 = vadd.f32 %v348_v4, %v347_v5 }
 0x3a3   :  { %v346_v9 = vpop.permute.xlu0 %345 }
 0x3a4   :  { %v4242_v7 = vmul.f32 %v4216_v38, %v349_v6 }
 0x3a6   :  { %3791 = vtanh.f32 %v4242_v7 }
 0x3b0   :  { %v3792_v8 = vpop.eup %3791 }
 0x3b1   :  { %v4245_v10 = vmul.f32 %v3792_v8, %v346_v9  ;;  %v2915_v8 = vld [vmem:[%s4839_s7 + $0x2] sm:$0x1] }
 0x3b3   :  { %v353_v11 = vpack.c.bf16 %v4245_v10, %v4245_v10 }
 0x3b5   :  { %3288 = vmatmul.mubr.bf16.vlgmr.msra.gmra.mrb[4].mxu0 %v353_v11 }
 0x3b6   :  { %3327 = vmatprep.mubr.msk.bf16.mxu0 %vm4057_vm0, %v4055_v0 }
 0x488   :  { %v453_v13 = vpop.f32.mrb[4].mxu0 }
 0x489   :  { %v454_v14 = vadd.f32 %v453_v13, %v370_v12  ;;  %v3289_v15 = vpop.f32.mrb[5].mxu0  ;;  %v2916_v12 = vld [vmem:[%s4839_s7 + $0x3] sm:$0x1] }
 0x48a   :  { %v456_v16 = vpop.f32.mrb[6].mxu0  ;;  %v2917_v15 = vld [vmem:[%s4839_s7 + $0x4] sm:$0x1] }
 0x48b   :  { %3793 = vtanh.f32 %v454_v14  ;;  %v3290_v17 = vpop.f32.mrb[7].mxu0 }
 0x495   :  { %v3794_v18 = vpop.eup %3793 }
 0x496   :  { %v460_v21 = vmul.f32 2.5, %v3794_v18 }
 0x498   :  { %v4261_v23 = vadd.f32 %v460_v21, %v4255_v20 }
 0x49a   :  { %v474_v24 = vadd.f32 %v473_v22, %v4261_v23 }
 0x49c   :  { %v475_v25 = vsel %vm464_vm3, %v474_v24, -inf }
 0x49d   :  { %476 = vmax.xlane.f32.xlu1 %v475_v25 }
 0x4ae   :  { %561 = vrot.lane.b32.xlu1 %v4222_v43, %s4056_s30 }
 0x52a   :  { %v477_v26 = vpop.xlane.xlu1 %476 }
 0x52b   :  { %v478_v27 = vrot.slane %v477_v26, 4 }
 0x52d   :  { %v479_v28 = vmax.f32 %v477_v26, %v478_v27  ;;  %v581_v27 = vld [vmem:[%s4834_s2] sm:$0x1] }
 0x52f   :  { %v480_v29 = vrot.slane %v479_v28, 2 }
 0x531   :  { %v481_v30 = vmax.f32 %v479_v28, %v480_v29 }
 0x533   :  { %v482_v31 = vrot.slane %v481_v30, 1 }
 0x535   :  { %v483_v32 = vmax.f32 %v481_v30, %v482_v31  ;;  %v3665_v31 = vld [vmem:[#allocation7] sm:$0xff]  }
 0x536   :  { %3312 = vmatpush3.bf16.msra.mxu0 %v3665_v31 }
 0x537   :  { %3591 = vpush %v483_v32  ;;  %3313 = vmatprep.subr.bf16.mxu0 %v4055_v0 }
 0x568   :  { %s3592_s20 = spop %3591 }
 0x569   :  { %v485_v34 = vstv %s3592_s20 }
 0x56a   :  { %vm486_vm4 = vcmp.eq.f32.partialorder %v474_v24, %v485_v34  ;;  %v562_v24 = vpop.permute.xlu1 %561 }
 0x56b   :  { %v487_v35 = vsel %vm486_vm4, %v4212_v33, 128 }
 0x56c   :  { %v488_v36 = vsel %vm464_vm3, %v487_v35, 2147483647 }
 0x56d   :  { %v490_v37 = vshra.s32 %v488_v36, 16  ;;  %v489_v41 = vand.u32 65535, %v488_v36  ;;  %v3666_v36 = vld [vmem:[#allocation7 + $0x8] sm:$0xff]  }
 0x56e   :  { %3314 = vmatpush3.bf16.msra.mxu0 %v3666_v36 }
 0x56f   :  { %v492_v39 = vcvt.s32.f32 %v490_v37  ;;  %v491_v43 = vcvt.s32.f32 %v489_v41  ;;  %3315 = vmatprep.subr.bf16.mxu0 %v4055_v0 }
 0x571   :  { %493 = vmin.xlane.f32.xlu0 %v492_v39 }
 0x5fe   :  { %v494_v42 = vpop.xlane.xlu0 %493 }
 0x5ff   :  { %vm495_vm5 = vcmp.eq.f32.partialorder %v492_v39, %v494_v42  ;;  %v500_v53 = vcvt.f32.s32 %v494_v42  ;;  %v3667_v42 = vld [vmem:[#allocation7 + $0x10] sm:$0xff]  }
 0x600   :  { %v496_v44 = vsel %vm495_vm5, %v491_v43, inf  ;;  %3316 = vmatpush3.bf16.msra.mxu0 %v3667_v42  ;;  %v3668_v43 = vld [vmem:[#allocation7 + $0x18] sm:$0xff]  }
 0x601   :  { %497 = vmin.xlane.f32.xlu0 %v496_v44  ;;  %v501_v55 = vshll.u32 %v500_v53, 16  ;;  %3317 = vmatprep.subr.bf16.mxu0 %v4055_v0 }
 0x604   :  { %3318 = vmatpush3.bf16.msra.mxu0 %v3668_v43 }
 0x605   :  { %3319 = vmatprep.subr.bf16.mxu0 %v4055_v0 }
 0x608   :  { %3320 = vmatpush3.bf16.msra.mxu0 %v3669_v45 }
 0x609   :  { %3321 = vmatprep.subr.bf16.mxu0 %v4055_v0 }
 0x60c   :  { %3322 = vmatpush3.bf16.msra.mxu0 %v3670_v46 }
 0x60d   :  { %3323 = vmatprep.subr.bf16.mxu0 %v4055_v0 }
 0x610   :  { %3324 = vmatpush3.bf16.msra.mxu0 %v3671_v47 }
 0x611   :  { %3325 = vmatprep.subr.bf16.mxu0 %v4055_v0 }
 0x614   :  { %3326 = vmatpush3.bf16.msra.mxu0 %v3672_v48 }
 0x615   :  { %3351 = vmatprep.subr.bf16.mxu0 %v4055_v0 }
 0x68e   :  { %v498_v54 = vpop.xlane.xlu0 %497 }
 0x68f   :  { %v499_v56 = vcvt.f32.s32 %v498_v54 }
 0x691   :  { %v502_v57 = vadd.s32 %v501_v55, %v499_v56 }
 0x693   :  { %v503_v58 = vrot.slane %v502_v57, 4 }
 0x695   :  { %vm504_vm6 = vcmp.lt.s32.totalorder %v502_v57, %v503_v58 }
 0x696   :  { %v505_v59 = vsel %vm504_vm6, %v502_v57, %v503_v58 }
 0x697   :  { %v506_v60 = vrot.slane %v505_v59, 2 }
 0x699   :  { %vm507_vm7 = vcmp.lt.s32.totalorder %v505_v59, %v506_v60 }
 0x69a   :  { %v508_v61 = vsel %vm507_vm7, %v505_v59, %v506_v60 }
 0x69b   :  { %v509_v62 = vrot.slane %v508_v61, 1 }
 0x69d   :  { %vm510_vm8 = vcmp.lt.s32.totalorder %v508_v61, %v509_v62 }
 0x69e   :  { %v511_v63 = vsel %vm510_vm8, %v508_v61, %v509_v62 }
 0x69f   :  { %3593 = vpush %v511_v63  ;;  %v3673_v63 = vld [vmem:[#allocation8] sm:$0xff]  }
 0x6d0   :  { %s4277_s21 = spop %3593 }
 0x6d1   :  { %522 = sst [smem:[#allocation13]] %s4277_s21  ;;  %p524_p4 = scmp.eq.s32.totalorder %s4277_s21, 0 }
 0x6d2   :  { %p531_p5 = scmp.eq.s32.totalorder %s4277_s21, 1  ;;  %p539_p6 = scmp.eq.s32.totalorder %s4277_s21, 2 }
 0x6d3   :  { %s525_s22 = scalar_select %p524_p4, 1, 0 }
 0x6d4   :  { %s532_s23 = scalar_select %p531_p5, 1, 0 }
 0x6d5   :  { %s526_s1 = scvt.s32.f32 %s525_s22  ;;  %p547_p7 = scmp.eq.s32.totalorder %s4277_s21, 3 }
 0x6d6   :  { %s533_s25 = scvt.s32.f32 %s532_s23  ;;  %p555_p8 = scmp.eq.s32.totalorder %s4277_s21, 4 }
 0x6d7   :  { %v527_v3 = vstv %s526_s1  ;;  %s540_s3 = scalar_select %p539_p6, 1, 0 }
 0x6d8   :  { %v534_v4 = vstv %s533_s25  ;;  %v528_v5 = vmul.f32 %v527_v3, %v523_v1  ;;  %s548_s15 = scalar_select %p547_p7, 1, 0 }
 0x6d9   :  { %s541_s5 = scvt.s32.f32 %s540_s3  ;;  %v535_v6 = vmul.f32 %v2914_v2, %v534_v4  ;;  %v3674_v4 = vld [vmem:[#allocation8 + $0x8] sm:$0xff]  }
 0x6da   :  { %s549_s16 = scvt.s32.f32 %s548_s15 }
 0x6db   :  { %v536_v9 = vadd.f32 %v535_v6, %v528_v5  ;;  %v542_v11 = vstv %s541_s5  ;;  %s556_s0 = scalar_select %p555_p8, 1, 0  ;;  %v3675_v5 = vld [vmem:[#allocation8 + $0x10] sm:$0xff]  }
 0x6dc   :  { %v543_v13 = vmul.f32 %v2915_v8, %v542_v11  ;;  %v550_v14 = vstv %s549_s16  ;;  %v3676_v11 = vld [vmem:[#allocation8 + $0x18] sm:$0xff]  }
 0x6dd   :  { %s557_s22 = scvt.s32.f32 %s556_s0  ;;  %v551_v17 = vmul.f32 %v2916_v12, %v550_v14  ;;  %v3677_v12 = vld [vmem:[#allocation8 + $0x20] sm:$0xff]   ;;  %v3678_v14 = vld [vmem:[#allocation8 + $0x28] sm:$0xff]  }
 0x6de   :  { %v544_v16 = vadd.f32 %v543_v13, %v536_v9 }
 0x6df   :  { %v558_v18 = vstv %s557_s22 }
 0x6e0   :  { %v552_v19 = vadd.f32 %v551_v17, %v544_v16  ;;  %v559_v21 = vmul.f32 %v2917_v15, %v558_v18  ;;  %v3679_v15 = vld [vmem:[#allocation8 + $0x30] sm:$0xff]   ;;  %v3680_v16 = vld [vmem:[#allocation8 + $0x38] sm:$0xff]  }
 0x6e2   :  { %v560_v22 = vadd.f32 %v559_v21, %v552_v19 }
 0x6e4   :  { %v563_v25 = vadd.f32 %v562_v24, %v560_v22 }
 0x6e6   :  { %v564_v26 = vpack.c.bf16 %v563_v25, %v563_v25 }
 0x6e8   :  { %3308 = vmatmul.mubr.bf16.vlgmr.msra.gmra.mrb[4].mxu1 %v564_v26 }
 0x6e9   :  { %3347 = vmatprep.mubr.msk.bf16.mxu1 %vm4057_vm0, %v4055_v0  ;;  %3332 = vmatpush3.bf16.msra.mxu1 %v3673_v63  ;;  %v3685_v63 = vld [vmem:[#allocation5 + $0x20] sm:$0xff]  }
 0x6ea   :  { %3333 = vmatprep.subr.bf16.mxu1 %v4055_v0 }
 0x6ed   :  { %3334 = vmatpush3.bf16.msra.mxu1 %v3674_v4 }
 0x6ee   :  { %3335 = vmatprep.subr.bf16.mxu1 %v4055_v0 }
 0x6f1   :  { %3336 = vmatpush3.bf16.msra.mxu1 %v3675_v5 }
 0x6f2   :  { %3337 = vmatprep.subr.bf16.mxu1 %v4055_v0 }
 0x6f5   :  { %3338 = vmatpush3.bf16.msra.mxu1 %v3676_v11 }
 0x6f6   :  { %3339 = vmatprep.subr.bf16.mxu1 %v4055_v0 }
 0x6f9   :  { %3340 = vmatpush3.bf16.msra.mxu1 %v3677_v12 }
 0x6fa   :  { %3341 = vmatprep.subr.bf16.mxu1 %v4055_v0 }
 0x6fd   :  { %3342 = vmatpush3.bf16.msra.mxu1 %v3678_v14 }
 0x6fe   :  { %3343 = vmatprep.subr.bf16.mxu1 %v4055_v0 }
 0x701   :  { %3344 = vmatpush3.bf16.msra.mxu1 %v3679_v15 }
 0x702   :  { %3345 = vmatprep.subr.bf16.mxu1 %v4055_v0 }
 0x705   :  { %3346 = vmatpush3.bf16.msra.mxu1 %v3680_v16  ;;  %v986_v16 = vld [vmem:[%s4839_s7] sm:$0x1] }
 0x706   :  { %3371 = vmatprep.subr.bf16.mxu1 %v4055_v0 }
 0x7bb   :  { %v664_v28 = vpop.f32.mrb[4].mxu1 }
 0x7bc   :  { %v665_v29 = vadd.f32 %v664_v28, %v581_v27  ;;  %v3309_v30 = vpop.f32.mrb[5].mxu1 }
 0x7bd   :  { %v667_v32 = vpop.f32.mrb[6].mxu1 }
 0x7be   :  { %v2926_v34 = vmul.f32 -1.442695, %v665_v29  ;;  %3795 = vtanh.f32 %v665_v29  ;;  %v3310_v35 = vpop.f32.mrb[7].mxu1 }
 0x7c0   :  { %3797 = vpow2.f32 %v2926_v34 }
 0x7c8   :  { %v3796_v37 = vpop.eup %3795 }
 0x7c9   :  { %679 = vrot.lane.b32.xlu1 %v3796_v37, %s4050_s27  ;;  %v936_v37 = vld [vmem:[%s4840_s8 + $0x1] sm:$0x1] }
 0x7ca   :  { %v3798_v39 = vpop.eup %3797 }
 0x7cb   :  { %v673_v41 = vadd.f32 1.0, %v3798_v39 }
 0x7cd   :  { %3799 = vrcp.f32 %v673_v41 }
 0x7d7   :  { %v3800_v44 = vpop.eup %3799 }
 0x7d8   :  { %681 = vrot.lane.b32.xlu1 %v3800_v44, %s4056_s30  ;;  %677 = vrot.lane.b32.xlu0 %v3800_v44, %s4058_s12 }
 0x7dc   :  { %689 = vrot.lane.b32.xlu0 %v4245_v10, %s4056_s30 }
 0x83b   :  { %v680_v49 = vpop.permute.xlu1 %679 }
 0x83c   :  { %v684_v51 = vmul.f32 %v3800_v44, %v680_v49 }
 0x84a   :  { %v678_v50 = vpop.permute.xlu0 %677  ;;  %v682_v55 = vpop.permute.xlu1 %681 }
 0x84b   :  { %v683_v52 = vmul.f32 %v678_v50, %v4219_v40  ;;  %v709_v40 = vld [vmem:[%s4836_s4] sm:$0x1] }
 0x84d   :  { %v685_v53 = vadd.f32 %v684_v51, %v683_v52 }
 0x84e   :  { %v690_v57 = vpop.permute.xlu0 %689 }
 0x84f   :  { %v4320_v54 = vmul.f32 %v4216_v38, %v685_v53 }
 0x851   :  { %3801 = vtanh.f32 %v4320_v54 }
 0x85b   :  { %v3802_v10 = vpop.eup %3801 }
 0x85c   :  { %v4323_v56 = vmul.f32 %v3802_v10, %v682_v55 }
 0x85e   :  { %v691_v58 = vadd.f32 %v690_v57, %v4323_v56 }
 0x860   :  { %v692_v59 = vpack.c.bf16 %v691_v58, %v691_v58 }
 0x862   :  { %3328 = vmatmul.mubr.bf16.vlgmr.msra.gmra.mrb[8].mxu0 %v692_v59 }
 0x863   :  { %3367 = vmatprep.mubr.msk.bf16.mxu0 %vm4057_vm0, %v4055_v0 }
 0x935   :  { %v792_v60 = vpop.f32.mrb[8].mxu0 }
 0x936   :  { %v793_v61 = vadd.f32 %v792_v60, %v709_v40  ;;  %v3329_v62 = vpop.f32.mrb[9].mxu0  ;;  %v3681_v40 = vld [vmem:[#allocation5] sm:$0xff]   ;;  %v3682_v60 = vld [vmem:[#allocation5 + $0x8] sm:$0xff]  }
 0x937   :  { %v795_v1 = vpop.f32.mrb[10].mxu0  ;;  %3352 = vmatpush3.bf16.msra.mxu0 %v3681_v40  ;;  %v3684_v62 = vld [vmem:[#allocation5 + $0x18] sm:$0xff]  }
 0x938   :  { %v2935_v2 = vmul.f32 -1.442695, %v793_v61  ;;  %3803 = vtanh.f32 %v793_v61  ;;  %v3330_v3 = vpop.f32.mrb[11].mxu0  ;;  %3353 = vmatprep.subr.bf16.mxu0 %v4055_v0  ;;  %v3683_v61 = vld [vmem:[#allocation5 + $0x10] sm:$0xff]   ;;  %v3686_v1 = vld [vmem:[#allocation5 + $0x28] sm:$0xff]  }
 0x93a   :  { %3805 = vpow2.f32 %v2935_v2  ;;  %v3688_v2 = vld [vmem:[#allocation5 + $0x38] sm:$0xff]  }
 0x93b   :  { %3354 = vmatpush3.bf16.msra.mxu0 %v3682_v60  ;;  %v3693_v60 = vld [vmem:[#allocation7 + $0x20] sm:$0xff]  }
 0x93c   :  { %3355 = vmatprep.subr.bf16.mxu0 %v4055_v0 }
 0x93f   :  { %3356 = vmatpush3.bf16.msra.mxu0 %v3683_v61  ;;  %v3694_v61 = vld [vmem:[#allocation7 + $0x28] sm:$0xff]  }
 0x940   :  { %3357 = vmatprep.subr.bf16.mxu0 %v4055_v0 }
 0x942   :  { %v3804_v6 = vpop.eup %3803 }
 0x943   :  { %807 = vrot.lane.b32.xlu0 %v3804_v6, %s4050_s27  ;;  %3358 = vmatpush3.bf16.msra.mxu0 %v3684_v62  ;;  %v3695_v62 = vld [vmem:[#allocation7 + $0x30] sm:$0xff]  }
 0x944   :  { %v3806_v8 = vpop.eup %3805  ;;  %3359 = vmatprep.subr.bf16.mxu0 %v4055_v0 }
 0x945   :  { %v801_v9 = vadd.f32 1.0, %v3806_v8 }
 0x947   :  { %3807 = vrcp.f32 %v801_v9  ;;  %3360 = vmatpush3.bf16.msra.mxu0 %v3685_v63  ;;  %v3696_v63 = vld [vmem:[#allocation7 + $0x38] sm:$0xff]  }
 0x948   :  { %3361 = vmatprep.subr.bf16.mxu0 %v4055_v0 }
 0x94b   :  { %3362 = vmatpush3.bf16.msra.mxu0 %v3686_v1 }
 0x94c   :  { %3363 = vmatprep.subr.bf16.mxu0 %v4055_v0 }
 0x951   :  { %v3808_v13 = vpop.eup %3807 }
 0x952   :  { %805 = vrot.lane.b32.xlu1 %v3808_v13, %s4058_s12 }
 0x956   :  { %809 = vrot.lane.b32.xlu1 %v3808_v13, %s4056_s30 }
 0x9b5   :  { %v808_v17 = vpop.permute.xlu0 %807 }
 0x9b6   :  { %v812_v19 = vmul.f32 %v3808_v13, %v808_v17  ;;  %v2945_v17 = vld [vmem:[%s4839_s7 + $0x1] sm:$0x1] }
 0x9c4   :  { %v806_v18 = vpop.permute.xlu1 %805 }
 0x9c5   :  { %v811_v21 = vmul.f32 %v806_v18, %v4242_v7  ;;  %v834_v7 = vld [vmem:[%s4838_s6] sm:$0x1] }
 0x9c7   :  { %v813_v22 = vadd.f32 %v812_v19, %v811_v21 }
 0x9c8   :  { %v810_v26 = vpop.permute.xlu1 %809 }
 0x9c9   :  { %v4344_v24 = vmul.f32 %v4216_v38, %v813_v22 }
 0x9cb   :  { %3809 = vtanh.f32 %v4344_v24 }
 0x9d5   :  { %v3810_v25 = vpop.eup %3809 }
 0x9d6   :  { %v4347_v27 = vmul.f32 %v3810_v25, %v810_v26  ;;  %v2946_v25 = vld [vmem:[%s4839_s7 + $0x2] sm:$0x1] }
 0x9d8   :  { %v817_v28 = vpack.c.bf16 %v4347_v27, %v4347_v27 }
 0x9da   :  { %3348 = vmatmul.mubr.bf16.vlgmr.msra.gmra.mrb[8].mxu1 %v817_v28 }
 0x9db   :  { %3387 = vmatprep.mubr.msk.bf16.mxu1 %vm4057_vm0, %v4055_v0 }
 0xaad   :  { %v917_v29 = vpop.f32.mrb[8].mxu1 }
 0xaae   :  { %v918_v30 = vadd.f32 %v917_v29, %v834_v7  ;;  %v3349_v31 = vpop.f32.mrb[9].mxu1  ;;  %v2947_v7 = vld [vmem:[%s4839_s7 + $0x3] sm:$0x1] }
 0xaaf   :  { %v920_v32 = vpop.f32.mrb[10].mxu1  ;;  %v2948_v31 = vld [vmem:[%s4839_s7 + $0x4] sm:$0x1] }
 0xab0   :  { %3811 = vtanh.f32 %v918_v30  ;;  %v3350_v34 = vpop.f32.mrb[11].mxu1 }
 0xaba   :  { %v3812_v35 = vpop.eup %3811 }
 0xabb   :  { %v924_v36 = vmul.f32 2.5, %v3812_v35 }
 0xabd   :  { %v4360_v39 = vadd.f32 %v924_v36, %v4255_v20 }
 0xabf   :  { %v937_v41 = vadd.f32 %v936_v37, %v4360_v39 }
 0xac1   :  { %v938_v42 = vsel %vm464_vm3, %v937_v41, -inf }
 0xac2   :  { %939 = vmax.xlane.f32.xlu0 %v938_v42 }
 0xb4f   :  { %v940_v43 = vpop.xlane.xlu0 %939 }
 0xb50   :  { %v941_v44 = vrot.slane %v940_v43, 4 }
 0xb52   :  { %v942_v45 = vmax.f32 %v940_v43, %v941_v44 }
 0xb54   :  { %v943_v46 = vrot.slane %v942_v45, 2 }
 0xb56   :  { %v944_v47 = vmax.f32 %v942_v45, %v943_v46  ;;  %v3689_v45 = vld [vmem:[#allocation7] sm:$0xff]   ;;  %v1040_v46 = vld [vmem:[%s4834_s2] sm:$0x1] }
 0xb57   :  { %3372 = vmatpush3.bf16.msra.mxu1 %v3689_v45 }
 0xb58   :  { %v945_v48 = vrot.slane %v944_v47, 1  ;;  %3373 = vmatprep.subr.bf16.mxu1 %v4055_v0 }
 0xb5a   :  { %v946_v49 = vmax.f32 %v944_v47, %v945_v48 }
 0xb5c   :  { %3595 = vpush %v946_v49 }
 0xb8d   :  { %s3596_s15 = spop %3595 }
 0xb8e   :  { %v948_v50 = vstv %s3596_s15 }
 0xb8f   :  { %vm949_vm9 = vcmp.eq.f32.partialorder %v937_v41, %v948_v50 }
 0xb90   :  { %v950_v51 = vsel %vm949_vm9, %v4212_v33, 128 }
 0xb91   :  { %v951_v52 = vsel %vm464_vm3, %v950_v51, 2147483647 }
 0xb92   :  { %v953_v53 = vshra.s32 %v951_v52, 16  ;;  %v952_v55 = vand.u32 65535, %v951_v52 }
 0xb94   :  { %v955_v10 = vcvt.s32.f32 %v953_v53  ;;  %v954_v58 = vcvt.s32.f32 %v952_v55  ;;  %v3690_v55 = vld [vmem:[#allocation7 + $0x8] sm:$0xff]  }
 0xb95   :  { %3374 = vmatpush3.bf16.msra.mxu1 %v3690_v55  ;;  %v1395_v55 = vld [vmem:[%s4840_s8 + $0x2] sm:$0x1] }
 0xb96   :  { %956 = vmin.xlane.f32.xlu1 %v955_v10  ;;  %3375 = vmatprep.subr.bf16.mxu1 %v4055_v0 }
 0xc23   :  { %v957_v57 = vpop.xlane.xlu1 %956 }
 0xc24   :  { %vm958_vm10 = vcmp.eq.f32.partialorder %v955_v10, %v957_v57  ;;  %v963_v3 = vcvt.f32.s32 %v957_v57  ;;  %v3691_v57 = vld [vmem:[#allocation7 + $0x10] sm:$0xff]  }
 0xc25   :  { %v959_v59 = vsel %vm958_vm10, %v954_v58, inf  ;;  %3376 = vmatpush3.bf16.msra.mxu1 %v3691_v57 }
 0xc26   :  { %960 = vmin.xlane.f32.xlu0 %v959_v59  ;;  %v964_v5 = vshll.u32 %v963_v3, 16  ;;  %3377 = vmatprep.subr.bf16.mxu1 %v4055_v0  ;;  %v3692_v59 = vld [vmem:[#allocation7 + $0x18] sm:$0xff]  }
 0xc29   :  { %3378 = vmatpush3.bf16.msra.mxu1 %v3692_v59 }
 0xc2a   :  { %3379 = vmatprep.subr.bf16.mxu1 %v4055_v0 }
 0xc2d   :  { %3380 = vmatpush3.bf16.msra.mxu1 %v3693_v60 }
 0xc2e   :  { %3381 = vmatprep.subr.bf16.mxu1 %v4055_v0 }
 0xc31   :  { %3382 = vmatpush3.bf16.msra.mxu1 %v3694_v61 }
 0xc32   :  { %3383 = vmatprep.subr.bf16.mxu1 %v4055_v0 }
 0xc35   :  { %3384 = vmatpush3.bf16.msra.mxu1 %v3695_v62 }
 0xc36   :  { %3385 = vmatprep.subr.bf16.mxu1 %v4055_v0 }
 0xc39   :  { %3386 = vmatpush3.bf16.msra.mxu1 %v3696_v63 }
 0xc3a   :  { %3411 = vmatprep.subr.bf16.mxu1 %v4055_v0 }
 0xc3c   :  { %1020 = vrot.lane.b32.xlu0 %v4323_v56, %s4056_s30  ;;  %v3687_v56 = vld [vmem:[#allocation5 + $0x30] sm:$0xff]  }
 0xc3d   :  { %3364 = vmatpush3.bf16.msra.mxu0 %v3687_v56 }
 0xc3e   :  { %3365 = vmatprep.subr.bf16.mxu0 %v4055_v0 }
 0xc41   :  { %3366 = vmatpush3.bf16.msra.mxu0 %v3688_v2 }
 0xc42   :  { %3391 = vmatprep.subr.bf16.mxu0 %v4055_v0 }
 0xcb3   :  { %v961_v4 = vpop.xlane.xlu0 %960 }
 0xcb4   :  { %v962_v6 = vcvt.f32.s32 %v961_v4 }
 0xcb6   :  { %v965_v8 = vadd.s32 %v964_v5, %v962_v6 }
 0xcb7   :  { %v1021_v42 = vpop.permute.xlu0 %1020 }
 0xcb8   :  { %v966_v9 = vrot.slane %v965_v8, 4 }
 0xcba   :  { %vm967_vm11 = vcmp.lt.s32.totalorder %v965_v8, %v966_v9 }
 0xcbb   :  { %v968_v11 = vsel %vm967_vm11, %v965_v8, %v966_v9 }
 0xcbc   :  { %v969_v12 = vrot.slane %v968_v11, 2 }
 0xcbe   :  { %vm970_vm12 = vcmp.lt.s32.totalorder %v968_v11, %v969_v12 }
 0xcbf   :  { %v971_v13 = vsel %vm970_vm12, %v968_v11, %v969_v12 }
 0xcc0   :  { %v972_v14 = vrot.slane %v971_v13, 1 }
 0xcc2   :  { %vm973_vm13 = vcmp.lt.s32.totalorder %v971_v13, %v972_v14 }
 0xcc3   :  { %v974_v15 = vsel %vm973_vm13, %v971_v13, %v972_v14 }
 0xcc4   :  { %3597 = vpush %v974_v15 }
 0xcf5   :  { %s4376_s5 = spop %3597 }
 0xcf6   :  { %985 = sst [smem:[#allocation13 + $0x1]] %s4376_s5  ;;  %p987_p9 = scmp.eq.s32.totalorder %s4376_s5, 0 }
 0xcf7   :  { %p993_p10 = scmp.eq.s32.totalorder %s4376_s5, 1  ;;  %p1000_p11 = scmp.eq.s32.totalorder %s4376_s5, 2 }
 0xcf8   :  { %s988_s28 = scalar_select %p987_p9, 1, 0 }
 0xcf9   :  { %s994_s14 = scalar_select %p993_p10, 1, 0 }
 0xcfa   :  { %s989_s16 = scvt.s32.f32 %s988_s28  ;;  %p1007_p12 = scmp.eq.s32.totalorder %s4376_s5, 3 }
 0xcfb   :  { %s995_s0 = scvt.s32.f32 %s994_s14  ;;  %p1014_p13 = scmp.eq.s32.totalorder %s4376_s5, 4 }
 0xcfc   :  { %v990_v18 = vstv %s989_s16  ;;  %s1001_s22 = scalar_select %p1000_p11, 1, 0 }
 0xcfd   :  { %v996_v19 = vstv %s995_s0  ;;  %v991_v21 = vmul.f32 %v990_v18, %v986_v16  ;;  %s1008_s23 = scalar_select %p1007_p12, 1, 0  ;;  %v3697_v16 = vld [vmem:[#allocation8] sm:$0xff]  }
 0xcfe   :  { %s1002_s1 = scvt.s32.f32 %s1001_s22  ;;  %v997_v22 = vmul.f32 %v2945_v17, %v996_v19 }
 0xcff   :  { %s1009_s25 = scvt.s32.f32 %s1008_s23 }
 0xd00   :  { %v998_v26 = vadd.f32 %v997_v22, %v991_v21  ;;  %v1003_v28 = vstv %s1002_s1  ;;  %s1015_s3 = scalar_select %p1014_p13, 1, 0  ;;  %v3698_v21 = vld [vmem:[#allocation8 + $0x8] sm:$0xff]   ;;  %v3699_v22 = vld [vmem:[#allocation8 + $0x10] sm:$0xff]  }
 0xd01   :  { %v1004_v29 = vmul.f32 %v2946_v25, %v1003_v28  ;;  %v1010_v30 = vstv %s1009_s25 }
 0xd02   :  { %s1016_s14 = scvt.s32.f32 %s1015_s3  ;;  %v1011_v34 = vmul.f32 %v2947_v7, %v1010_v30  ;;  %v3700_v7 = vld [vmem:[#allocation8 + $0x18] sm:$0xff]  }
 0xd03   :  { %v1005_v32 = vadd.f32 %v1004_v29, %v998_v26  ;;  %v3701_v29 = vld [vmem:[#allocation8 + $0x20] sm:$0xff]  }
 0xd04   :  { %v1017_v35 = vstv %s1016_s14 }
 0xd05   :  { %v1012_v36 = vadd.f32 %v1011_v34, %v1005_v32  ;;  %v1018_v37 = vmul.f32 %v2948_v31, %v1017_v35  ;;  %v3702_v31 = vld [vmem:[#allocation8 + $0x28] sm:$0xff]   ;;  %v3703_v32 = vld [vmem:[#allocation8 + $0x30] sm:$0xff]   ;;  %v3704_v34 = vld [vmem:[#allocation8 + $0x38] sm:$0xff]  }
 0xd07   :  { %v1019_v41 = vadd.f32 %v1018_v37, %v1012_v36 }
 0xd09   :  { %v1022_v43 = vadd.f32 %v1021_v42, %v1019_v41 }
 0xd0b   :  { %v1023_v44 = vpack.c.bf16 %v1022_v43, %v1022_v43 }
 0xd0d   :  { %3368 = vmatmul.mubr.bf16.vlgmr.msra.gmra.mrb[12].mxu0 %v1023_v44 }
 0xd0e   :  { %3407 = vmatprep.mubr.msk.bf16.mxu0 %vm4057_vm0, %v4055_v0  ;;  %3392 = vmatpush3.bf16.msra.mxu0 %v3697_v16  ;;  %v3709_v16 = vld [vmem:[#allocation5 + $0x20] sm:$0xff]  }
 0xd0f   :  { %3393 = vmatprep.subr.bf16.mxu0 %v4055_v0 }
 0xd12   :  { %3394 = vmatpush3.bf16.msra.mxu0 %v3698_v21 }
 0xd13   :  { %3395 = vmatprep.subr.bf16.mxu0 %v4055_v0 }
 0xd16   :  { %3396 = vmatpush3.bf16.msra.mxu0 %v3699_v22 }
 0xd17   :  { %3397 = vmatprep.subr.bf16.mxu0 %v4055_v0 }
 0xd1a   :  { %3398 = vmatpush3.bf16.msra.mxu0 %v3700_v7 }
 0xd1b   :  { %3399 = vmatprep.subr.bf16.mxu0 %v4055_v0 }
 0xd1e   :  { %3400 = vmatpush3.bf16.msra.mxu0 %v3701_v29 }
 0xd1f   :  { %3401 = vmatprep.subr.bf16.mxu0 %v4055_v0 }
 0xd22   :  { %3402 = vmatpush3.bf16.msra.mxu0 %v3702_v31 }
 0xd23   :  { %3403 = vmatprep.subr.bf16.mxu0 %v4055_v0 }
 0xd26   :  { %3404 = vmatpush3.bf16.msra.mxu0 %v3703_v32 }
 0xd27   :  { %3405 = vmatprep.subr.bf16.mxu0 %v4055_v0 }
 0xd2a   :  { %3406 = vmatpush3.bf16.msra.mxu0 %v3704_v34 }
 0xd2b   :  { %3431 = vmatprep.subr.bf16.mxu0 %v4055_v0 }
 0xde0   :  { %v1123_v47 = vpop.f32.mrb[12].mxu0 }
 0xde1   :  { %v1124_v48 = vadd.f32 %v1123_v47, %v1040_v46  ;;  %v3369_v49 = vpop.f32.mrb[13].mxu0 }
 0xde2   :  { %v1126_v50 = vpop.f32.mrb[14].mxu0 }
 0xde3   :  { %v2957_v51 = vmul.f32 -1.442695, %v1124_v48  ;;  %v3370_v52 = vpop.f32.mrb[15].mxu0 }
 0xde5   :  { %3813 = vpow2.f32 %v2957_v51 }
 0xdef   :  { %v3814_v53 = vpop.eup %3813 }
 0xdf0   :  { %v1132_v10 = vadd.f32 1.0, %v3814_v53 }
 0xdf2   :  { %3815 = vrcp.f32 %v1132_v10 }
 0xdf3   :  { %3817 = vtanh.f32 %v1124_v48 }
 0xdfc   :  { %v3816_v58 = vpop.eup %3815 }
 0xdfd   :  { %1140 = vrot.lane.b32.xlu0 %v3816_v58, %s4056_s30  ;;  %1136 = vrot.lane.b32.xlu1 %v3816_v58, %s4058_s12  ;;  %v3818_v40 = vpop.eup %3817 }
 0xe01   :  { %1138 = vrot.lane.b32.xlu1 %v3818_v40, %s4050_s27 }
 0xe05   :  { %1148 = vrot.lane.b32.xlu1 %v4347_v27, %s4056_s30 }
 0xe6f   :  { %v1137_v1 = vpop.permute.xlu1 %1136  ;;  %v1141_v6 = vpop.permute.xlu0 %1140 }
 0xe70   :  { %v1142_v2 = vmul.f32 %v1137_v1, %v4320_v54  ;;  %v1168_v54 = vld [vmem:[%s4836_s4] sm:$0x1] }
 0xe73   :  { %v1139_v56 = vpop.permute.xlu1 %1138 }
 0xe74   :  { %v1143_v3 = vmul.f32 %v3816_v58, %v1139_v56 }
 0xe76   :  { %v1144_v4 = vadd.f32 %v1143_v3, %v1142_v2 }
 0xe77   :  { %v1149_v9 = vpop.permute.xlu1 %1148 }
 0xe78   :  { %v4419_v5 = vmul.f32 %v4216_v38, %v1144_v4 }
 0xe7a   :  { %3819 = vtanh.f32 %v4419_v5 }
 0xe84   :  { %v3820_v27 = vpop.eup %3819 }
 0xe85   :  { %v4422_v8 = vmul.f32 %v3820_v27, %v1141_v6 }
 0xe87   :  { %v1150_v11 = vadd.f32 %v1149_v9, %v4422_v8 }
 0xe89   :  { %v1151_v12 = vpack.c.bf16 %v1150_v11, %v1150_v11 }
 0xe8b   :  { %3388 = vmatmul.mubr.bf16.vlgmr.msra.gmra.mrb[12].mxu1 %v1151_v12 }
 0xe8c   :  { %3427 = vmatprep.mubr.msk.bf16.mxu1 %vm4057_vm0, %v4055_v0 }
 0xf5e   :  { %v1251_v13 = vpop.f32.mrb[12].mxu1 }
 0xf5f   :  { %v1252_v14 = vadd.f32 %v1251_v13, %v1168_v54  ;;  %v3389_v15 = vpop.f32.mrb[13].mxu1  ;;  %v3705_v54 = vld [vmem:[#allocation5] sm:$0xff]   ;;  %v3706_v13 = vld [vmem:[#allocation5 + $0x8] sm:$0xff]  }
 0xf60   :  { %v1254_v17 = vpop.f32.mrb[14].mxu1  ;;  %3412 = vmatpush3.bf16.msra.mxu1 %v3705_v54  ;;  %v3708_v15 = vld [vmem:[#allocation5 + $0x18] sm:$0xff]  }
 0xf61   :  { %v2966_v18 = vmul.f32 -1.442695, %v1252_v14  ;;  %3821 = vtanh.f32 %v1252_v14  ;;  %v3390_v19 = vpop.f32.mrb[15].mxu1  ;;  %3413 = vmatprep.subr.bf16.mxu1 %v4055_v0  ;;  %v3707_v14 = vld [vmem:[#allocation5 + $0x10] sm:$0xff]   ;;  %v3710_v17 = vld [vmem:[#allocation5 + $0x28] sm:$0xff]   ;;  %v3716_v54 = vld [vmem:[#allocation7 + $0x18] sm:$0xff]  }
 0xf62   :  { %v3712_v19 = vld [vmem:[#allocation5 + $0x38] sm:$0xff]  }
 0xf63   :  { %3823 = vpow2.f32 %v2966_v18  ;;  %v3711_v18 = vld [vmem:[#allocation5 + $0x30] sm:$0xff]  }
 0xf64   :  { %3414 = vmatpush3.bf16.msra.mxu1 %v3706_v13 }
 0xf65   :  { %3415 = vmatprep.subr.bf16.mxu1 %v4055_v0 }
 0xf68   :  { %3416 = vmatpush3.bf16.msra.mxu1 %v3707_v14  ;;  %v3717_v14 = vld [vmem:[#allocation7 + $0x20] sm:$0xff]  }
 0xf69   :  { %3417 = vmatprep.subr.bf16.mxu1 %v4055_v0 }
 0xf6b   :  { %v3822_v25 = vpop.eup %3821 }
 0xf6c   :  { %1266 = vrot.lane.b32.xlu1 %v3822_v25, %s4050_s27  ;;  %3418 = vmatpush3.bf16.msra.mxu1 %v3708_v15  ;;  %v3718_v15 = vld [vmem:[#allocation7 + $0x28] sm:$0xff]  }
 0xf6d   :  { %v3824_v26 = vpop.eup %3823  ;;  %3419 = vmatprep.subr.bf16.mxu1 %v4055_v0 }
 0xf6e   :  { %v1260_v28 = vadd.f32 1.0, %v3824_v26 }
 0xf70   :  { %3825 = vrcp.f32 %v1260_v28  ;;  %3420 = vmatpush3.bf16.msra.mxu1 %v3709_v16  ;;  %v3719_v16 = vld [vmem:[#allocation7 + $0x30] sm:$0xff]  }
 0xf71   :  { %3421 = vmatprep.subr.bf16.mxu1 %v4055_v0 }
 0xf74   :  { %3422 = vmatpush3.bf16.msra.mxu1 %v3710_v17  ;;  %v3720_v17 = vld [vmem:[#allocation7 + $0x38] sm:$0xff]  }
 0xf75   :  { %3423 = vmatprep.subr.bf16.mxu1 %v4055_v0 }
 0xf78   :  { %3424 = vmatpush3.bf16.msra.mxu1 %v3711_v18 }
 0xf79   :  { %3425 = vmatprep.subr.bf16.mxu1 %v4055_v0 }
 0xf7a   :  { %v3826_v30 = vpop.eup %3825 }
 0xf7b   :  { %1264 = vrot.lane.b32.xlu0 %v3826_v30, %s4058_s12 }
 0xf7c   :  { %3426 = vmatpush3.bf16.msra.mxu1 %v3712_v19 }
 0xf7d   :  { %3451 = vmatprep.subr.bf16.mxu1 %v4055_v0 }
 0xf7f   :  { %1268 = vrot.lane.b32.xlu0 %v3826_v30, %s4056_s30 }
 0xfde   :  { %v1267_v35 = vpop.permute.xlu1 %1266 }
 0xfdf   :  { %v1271_v37 = vmul.f32 %v3826_v30, %v1267_v35  ;;  %v1445_v35 = vld [vmem:[%s4839_s7] sm:$0x1] }
 0xfed   :  { %v1265_v36 = vpop.permute.xlu0 %1264 }
 0xfee   :  { %v1270_v41 = vmul.f32 %v1265_v36, %v4344_v24  ;;  %v1293_v24 = vld [vmem:[%s4838_s6] sm:$0x1]  ;;  %v2976_v36 = vld [vmem:[%s4839_s7 + $0x1] sm:$0x1] }
 0xff0   :  { %v1272_v42 = vadd.f32 %v1271_v37, %v1270_v41 }
 0xff1   :  { %v1269_v45 = vpop.permute.xlu0 %1268 }
 0xff2   :  { %v4443_v43 = vmul.f32 %v4216_v38, %v1272_v42 }
 0xff4   :  { %3827 = vtanh.f32 %v4443_v43 }
 0xffe   :  { %v3828_v44 = vpop.eup %3827 }
 0xfff   :  { %v4446_v46 = vmul.f32 %v3828_v44, %v1269_v45  ;;  %v2977_v45 = vld [vmem:[%s4839_s7 + $0x2] sm:$0x1] }
0x1001   :  { %v1276_v47 = vpack.c.bf16 %v4446_v46, %v4446_v46 }
0x1003   :  { %3408 = vmatmul.mubr.bf16.vlgmr.msra.gmra.mrb[16].mxu0 %v1276_v47 }
0x1004   :  { %3447 = vmatprep.mubr.msk.bf16.mxu0 %vm4057_vm0, %v4055_v0 }
0x10d6   :  { %v1376_v48 = vpop.f32.mrb[16].mxu0 }
0x10d7   :  { %v1377_v49 = vadd.f32 %v1376_v48, %v1293_v24  ;;  %v3409_v50 = vpop.f32.mrb[17].mxu0  ;;  %v2978_v48 = vld [vmem:[%s4839_s7 + $0x3] sm:$0x1] }
0x10d8   :  { %v1379_v51 = vpop.f32.mrb[18].mxu0 }
0x10d9   :  { %3829 = vtanh.f32 %v1377_v49  ;;  %v3410_v52 = vpop.f32.mrb[19].mxu0  ;;  %v2979_v51 = vld [vmem:[%s4839_s7 + $0x4] sm:$0x1] }
0x10e3   :  { %v3830_v53 = vpop.eup %3829 }
0x10e4   :  { %v1383_v10 = vmul.f32 2.5, %v3830_v53 }
0x10e6   :  { %v4459_v57 = vadd.f32 %v1383_v10, %v4255_v20 }
0x10e8   :  { %v1396_v58 = vadd.f32 %v1395_v55, %v4459_v57 }
0x10ea   :  { %v1397_v59 = vsel %vm464_vm3, %v1396_v58, -inf }
0x10eb   :  { %1398 = vmax.xlane.f32.xlu1 %v1397_v59 }
0x10fc   :  { %1479 = vrot.lane.b32.xlu1 %v4422_v8, %s4056_s30 }
0x1178   :  { %v1399_v40 = vpop.xlane.xlu1 %1398 }
0x1179   :  { %v1400_v60 = vrot.slane %v1399_v40, 4 }
0x117b   :  { %v1401_v61 = vmax.f32 %v1399_v40, %v1400_v60 }
0x117c   :  { %v1480_v40 = vpop.permute.xlu1 %1479 }
0x117d   :  { %v1402_v62 = vrot.slane %v1401_v61, 2 }
0x117f   :  { %v1403_v63 = vmax.f32 %v1401_v61, %v1402_v62  ;;  %v1499_v62 = vld [vmem:[%s4834_s2] sm:$0x1] }
0x1181   :  { %v1404_v1 = vrot.slane %v1403_v63, 1 }
0x1183   :  { %v1405_v56 = vmax.f32 %v1403_v63, %v1404_v1 }
0x1185   :  { %3599 = vpush %v1405_v56 }
0x11b6   :  { %s3600_s1 = spop %3599 }
0x11b7   :  { %v1407_v2 = vstv %s3600_s1 }
0x11b8   :  { %vm1408_vm14 = vcmp.eq.f32.partialorder %v1396_v58, %v1407_v2  ;;  %v3713_v2 = vld [vmem:[#allocation7] sm:$0xff]  }
0x11b9   :  { %v1409_v3 = vsel %vm1408_vm14, %v4212_v33, 128  ;;  %3432 = vmatpush3.bf16.msra.mxu0 %v3713_v2 }
0x11ba   :  { %v1410_v4 = vsel %vm464_vm3, %v1409_v3, 2147483647  ;;  %3433 = vmatprep.subr.bf16.mxu0 %v4055_v0 }
0x11bb   :  { %v1412_v27 = vshra.s32 %v1410_v4, 16  ;;  %v1411_v9 = vand.u32 65535, %v1410_v4 }
0x11bd   :  { %v1414_v6 = vcvt.s32.f32 %v1412_v27  ;;  %v1413_v11 = vcvt.s32.f32 %v1411_v9 }
0x11bf   :  { %1415 = vmin.xlane.f32.xlu0 %v1414_v6 }
0x124c   :  { %v1416_v8 = vpop.xlane.xlu0 %1415 }
0x124d   :  { %vm1417_vm15 = vcmp.eq.f32.partialorder %v1414_v6, %v1416_v8  ;;  %v1422_v21 = vcvt.f32.s32 %v1416_v8  ;;  %v3714_v6 = vld [vmem:[#allocation7 + $0x8] sm:$0xff]  }
0x124e   :  { %v1418_v12 = vsel %vm1417_vm15, %v1413_v11, inf  ;;  %3434 = vmatpush3.bf16.msra.mxu0 %v3714_v6 }
0x124f   :  { %1419 = vmin.xlane.f32.xlu0 %v1418_v12  ;;  %v1423_v25 = vshll.u32 %v1422_v21, 16  ;;  %3435 = vmatprep.subr.bf16.mxu0 %v4055_v0  ;;  %v3715_v12 = vld [vmem:[#allocation7 + $0x10] sm:$0xff]  }
0x1252   :  { %3436 = vmatpush3.bf16.msra.mxu0 %v3715_v12 }
0x1253   :  { %3437 = vmatprep.subr.bf16.mxu0 %v4055_v0 }
0x1256   :  { %3438 = vmatpush3.bf16.msra.mxu0 %v3716_v54 }
0x1257   :  { %3439 = vmatprep.subr.bf16.mxu0 %v4055_v0 }
0x125a   :  { %3440 = vmatpush3.bf16.msra.mxu0 %v3717_v14 }
0x125b   :  { %3441 = vmatprep.subr.bf16.mxu0 %v4055_v0 }
0x125e   :  { %3442 = vmatpush3.bf16.msra.mxu0 %v3718_v15 }
0x125f   :  { %3443 = vmatprep.subr.bf16.mxu0 %v4055_v0 }
0x1262   :  { %3444 = vmatpush3.bf16.msra.mxu0 %v3719_v16 }
0x1263   :  { %3445 = vmatprep.subr.bf16.mxu0 %v4055_v0 }
0x1266   :  { %3446 = vmatpush3.bf16.msra.mxu0 %v3720_v17 }
0x1267   :  { %3471 = vmatprep.subr.bf16.mxu0 %v4055_v0 }
0x12dc   :  { %v1420_v22 = vpop.xlane.xlu0 %1419 }
0x12dd   :  { %v1421_v26 = vcvt.f32.s32 %v1420_v22 }
0x12df   :  { %v1424_v28 = vadd.s32 %v1423_v25, %v1421_v26 }
0x12e1   :  { %v1425_v7 = vrot.slane %v1424_v28, 4 }
0x12e3   :  { %vm1426_vm1 = vcmp.lt.s32.totalorder %v1424_v28, %v1425_v7 }
0x12e4   :  { %v1427_v29 = vsel %vm1426_vm1, %v1424_v28, %v1425_v7 }
0x12e5   :  { %v1428_v30 = vrot.slane %v1427_v29, 2 }
0x12e7   :  { %vm1429_vm2 = vcmp.lt.s32.totalorder %v1427_v29, %v1428_v30 }
0x12e8   :  { %v1430_v31 = vsel %vm1429_vm2, %v1427_v29, %v1428_v30 }
0x12e9   :  { %v1431_v32 = vrot.slane %v1430_v31, 1 }
0x12eb   :  { %vm1432_vm4 = vcmp.lt.s32.totalorder %v1430_v31, %v1431_v32 }
0x12ec   :  { %v1433_v34 = vsel %vm1432_vm4, %v1430_v31, %v1431_v32 }
0x12ed   :  { %3601 = vpush %v1433_v34 }
0x131e   :  { %s4475_s18 = spop %3601 }
0x131f   :  { %1444 = sst [smem:[#allocation13 + $0x2]] %s4475_s18  ;;  %p1446_p0 = scmp.eq.s32.totalorder %s4475_s18, 0 }
0x1320   :  { %p1452_p1 = scmp.eq.s32.totalorder %s4475_s18, 1  ;;  %p1459_p2 = scmp.eq.s32.totalorder %s4475_s18, 2 }
0x1321   :  { %s1447_s24 = scalar_select %p1446_p0, 1, 0 }
0x1322   :  { %s1453_s25 = scalar_select %p1452_p1, 1, 0 }
0x1323   :  { %s1448_s26 = scvt.s32.f32 %s1447_s24  ;;  %p1466_p3 = scmp.eq.s32.totalorder %s4475_s18, 3 }
0x1324   :  { %s1454_s15 = scvt.s32.f32 %s1453_s25  ;;  %p1473_p4 = scmp.eq.s32.totalorder %s4475_s18, 4 }
0x1325   :  { %v1449_v37 = vstv %s1448_s26  ;;  %s1460_s16 = scalar_select %p1459_p2, 1, 0 }
0x1326   :  { %v1455_v41 = vstv %s1454_s15  ;;  %v1450_v42 = vmul.f32 %v1449_v37, %v1445_v35  ;;  %s1467_s17 = scalar_select %p1466_p3, 1, 0 }
0x1327   :  { %s1461_s19 = scvt.s32.f32 %s1460_s16  ;;  %v1456_v44 = vmul.f32 %v2976_v36, %v1455_v41  ;;  %v3721_v36 = vld [vmem:[#allocation8] sm:$0xff]  }
0x1328   :  { %s1468_s20 = scvt.s32.f32 %s1467_s17 }
0x1329   :  { %v1457_v47 = vadd.f32 %v1456_v44, %v1450_v42  ;;  %v1462_v24 = vstv %s1461_s19  ;;  %s1474_s1 = scalar_select %p1473_p4, 1, 0  ;;  %v3722_v44 = vld [vmem:[#allocation8 + $0x8] sm:$0xff]  }
0x132a   :  { %v1463_v49 = vmul.f32 %v2977_v45, %v1462_v24  ;;  %v1469_v50 = vstv %s1468_s20  ;;  %v3723_v45 = vld [vmem:[#allocation8 + $0x10] sm:$0xff]  }
0x132b   :  { %s1475_s26 = scvt.s32.f32 %s1474_s1  ;;  %v1470_v53 = vmul.f32 %v2978_v48, %v1469_v50  ;;  %v3725_v50 = vld [vmem:[#allocation8 + $0x20] sm:$0xff]  }
0x132c   :  { %v1464_v52 = vadd.f32 %v1463_v49, %v1457_v47  ;;  %v3724_v49 = vld [vmem:[#allocation8 + $0x18] sm:$0xff]  }
0x132d   :  { %v1476_v10 = vstv %s1475_s26 }
0x132e   :  { %v1471_v55 = vadd.f32 %v1470_v53, %v1464_v52  ;;  %v1477_v58 = vmul.f32 %v2979_v51, %v1476_v10  ;;  %v3726_v52 = vld [vmem:[#allocation8 + $0x28] sm:$0xff]   ;;  %v3727_v53 = vld [vmem:[#allocation8 + $0x30] sm:$0xff]   ;;  %v3728_v10 = vld [vmem:[#allocation8 + $0x38] sm:$0xff]  }
0x1330   :  { %v1478_v59 = vadd.f32 %v1477_v58, %v1471_v55 }
0x1332   :  { %v1481_v60 = vadd.f32 %v1480_v40, %v1478_v59 }
0x1334   :  { %v1482_v61 = vpack.c.bf16 %v1481_v60, %v1481_v60 }
0x1336   :  { %3428 = vmatmul.mubr.bf16.vlgmr.msra.gmra.mrb[16].mxu1 %v1482_v61 }
0x1337   :  { %3467 = vmatprep.mubr.msk.bf16.mxu1 %vm4057_vm0, %v4055_v0  ;;  %3452 = vmatpush3.bf16.msra.mxu1 %v3721_v36  ;;  %v3731_v36 = vld [vmem:[#allocation5 + $0x10] sm:$0xff]  }
0x1338   :  { %3453 = vmatprep.subr.bf16.mxu1 %v4055_v0 }
0x133b   :  { %3454 = vmatpush3.bf16.msra.mxu1 %v3722_v44  ;;  %v3736_v44 = vld [vmem:[#allocation5 + $0x38] sm:$0xff]  }
0x133c   :  { %3455 = vmatprep.subr.bf16.mxu1 %v4055_v0 }
0x133f   :  { %3456 = vmatpush3.bf16.msra.mxu1 %v3723_v45 }
0x1340   :  { %3457 = vmatprep.subr.bf16.mxu1 %v4055_v0 }
0x1343   :  { %3458 = vmatpush3.bf16.msra.mxu1 %v3724_v49 }
0x1344   :  { %3459 = vmatprep.subr.bf16.mxu1 %v4055_v0 }
0x1347   :  { %3460 = vmatpush3.bf16.msra.mxu1 %v3725_v50 }
0x1348   :  { %3461 = vmatprep.subr.bf16.mxu1 %v4055_v0 }
0x134b   :  { %3462 = vmatpush3.bf16.msra.mxu1 %v3726_v52 }
0x134c   :  { %3463 = vmatprep.subr.bf16.mxu1 %v4055_v0 }
0x134f   :  { %3464 = vmatpush3.bf16.msra.mxu1 %v3727_v53 }
0x1350   :  { %3465 = vmatprep.subr.bf16.mxu1 %v4055_v0 }
0x1353   :  { %3466 = vmatpush3.bf16.msra.mxu1 %v3728_v10 }
0x1354   :  { %3491 = vmatprep.subr.bf16.mxu1 %v4055_v0 }
0x1409   :  { %v1582_v63 = vpop.f32.mrb[16].mxu1 }
0x140a   :  { %v1583_v1 = vadd.f32 %v1582_v63, %v1499_v62  ;;  %v3429_v56 = vpop.f32.mrb[17].mxu1 }
0x140b   :  { %v1585_v3 = vpop.f32.mrb[18].mxu1 }
0x140c   :  { %v2988_v4 = vmul.f32 -1.442695, %v1583_v1  ;;  %3831 = vtanh.f32 %v1583_v1  ;;  %v3430_v27 = vpop.f32.mrb[19].mxu1 }
0x140e   :  { %3833 = vpow2.f32 %v2988_v4 }
0x1416   :  { %v3832_v9 = vpop.eup %3831 }
0x1417   :  { %1597 = vrot.lane.b32.xlu1 %v3832_v9, %s4050_s27 }
0x1418   :  { %v3834_v8 = vpop.eup %3833 }
0x1419   :  { %v1591_v11 = vadd.f32 1.0, %v3834_v8 }
0x141b   :  { %3835 = vrcp.f32 %v1591_v11  ;;  %v1854_v11 = vld [vmem:[%s4840_s8 + $0x3] sm:$0x1] }
0x1425   :  { %v3836_v13 = vpop.eup %3835 }
0x1426   :  { %1599 = vrot.lane.b32.xlu1 %v3836_v13, %s4056_s30  ;;  %1595 = vrot.lane.b32.xlu0 %v3836_v13, %s4058_s12 }
0x142a   :  { %1607 = vrot.lane.b32.xlu0 %v4446_v46, %s4056_s30 }
0x1489   :  { %v1598_v18 = vpop.permute.xlu1 %1597 }
0x148a   :  { %v1602_v21 = vmul.f32 %v3836_v13, %v1598_v18 }
0x1498   :  { %v1596_v19 = vpop.permute.xlu0 %1595  ;;  %v1600_v28 = vpop.permute.xlu1 %1599 }
0x1499   :  { %v1601_v22 = vmul.f32 %v1596_v19, %v4419_v5  ;;  %v1627_v5 = vld [vmem:[%s4836_s4] sm:$0x1] }
0x149b   :  { %v1603_v25 = vadd.f32 %v1602_v21, %v1601_v22 }
0x149c   :  { %v1608_v29 = vpop.permute.xlu0 %1607 }
0x149d   :  { %v4518_v26 = vmul.f32 %v4216_v38, %v1603_v25 }
0x149f   :  { %3837 = vtanh.f32 %v4518_v26 }
0x14a9   :  { %v3838_v46 = vpop.eup %3837 }
0x14aa   :  { %v4521_v7 = vmul.f32 %v3838_v46, %v1600_v28 }
0x14ac   :  { %v1609_v30 = vadd.f32 %v1608_v29, %v4521_v7 }
0x14ae   :  { %v1610_v31 = vpack.c.bf16 %v1609_v30, %v1609_v30 }
0x14b0   :  { %3448 = vmatmul.mubr.bf16.vlgmr.msra.gmra.mrb[20].mxu0 %v1610_v31 }
0x14b1   :  { %3487 = vmatprep.mubr.msk.bf16.mxu0 %vm4057_vm0, %v4055_v0 }
0x1583   :  { %v1710_v32 = vpop.f32.mrb[20].mxu0 }
0x1584   :  { %v1711_v34 = vadd.f32 %v1710_v32, %v1627_v5  ;;  %v3449_v35 = vpop.f32.mrb[21].mxu0 }
0x1585   :  { %v1713_v37 = vpop.f32.mrb[22].mxu0  ;;  %v3730_v35 = vld [vmem:[#allocation5 + $0x8] sm:$0xff]  }
0x1586   :  { %v2997_v41 = vmul.f32 -1.442695, %v1711_v34  ;;  %3839 = vtanh.f32 %v1711_v34  ;;  %v3450_v42 = vpop.f32.mrb[23].mxu0  ;;  %v3729_v34 = vld [vmem:[#allocation5] sm:$0xff]   ;;  %v3732_v37 = vld [vmem:[#allocation5 + $0x18] sm:$0xff]  }
0x1587   :  { %3472 = vmatpush3.bf16.msra.mxu0 %v3729_v34  ;;  %v3734_v42 = vld [vmem:[#allocation5 + $0x28] sm:$0xff]  }
0x1588   :  { %3841 = vpow2.f32 %v2997_v41  ;;  %3473 = vmatprep.subr.bf16.mxu0 %v4055_v0  ;;  %v3733_v41 = vld [vmem:[#allocation5 + $0x20] sm:$0xff]  }
0x158b   :  { %3474 = vmatpush3.bf16.msra.mxu0 %v3730_v35  ;;  %v3740_v35 = vld [vmem:[#allocation7 + $0x18] sm:$0xff]  }
0x158c   :  { %3475 = vmatprep.subr.bf16.mxu0 %v4055_v0 }
0x158f   :  { %3476 = vmatpush3.bf16.msra.mxu0 %v3731_v36 }
0x1590   :  { %v3840_v47 = vpop.eup %3839  ;;  %3477 = vmatprep.subr.bf16.mxu0 %v4055_v0 }
0x1591   :  { %1725 = vrot.lane.b32.xlu0 %v3840_v47, %s4050_s27 }
0x1592   :  { %v3842_v24 = vpop.eup %3841 }
0x1593   :  { %v1719_v48 = vadd.f32 1.0, %v3842_v24  ;;  %3478 = vmatpush3.bf16.msra.mxu0 %v3732_v37  ;;  %v3741_v37 = vld [vmem:[#allocation7 + $0x20] sm:$0xff]  }
0x1594   :  { %3479 = vmatprep.subr.bf16.mxu0 %v4055_v0 }
0x1595   :  { %3843 = vrcp.f32 %v1719_v48 }
0x1597   :  { %3480 = vmatpush3.bf16.msra.mxu0 %v3733_v41  ;;  %v3742_v41 = vld [vmem:[#allocation7 + $0x28] sm:$0xff]  }
0x1598   :  { %3481 = vmatprep.subr.bf16.mxu0 %v4055_v0 }
0x159b   :  { %3482 = vmatpush3.bf16.msra.mxu0 %v3734_v42  ;;  %v3743_v42 = vld [vmem:[#allocation7 + $0x30] sm:$0xff]  }
0x159c   :  { %3483 = vmatprep.subr.bf16.mxu0 %v4055_v0 }
0x159f   :  { %v3844_v51 = vpop.eup %3843 }
0x15a0   :  { %1723 = vrot.lane.b32.xlu1 %v3844_v51, %s4058_s12 }
0x15a4   :  { %1727 = vrot.lane.b32.xlu1 %v3844_v51, %s4056_s30 }
0x1603   :  { %v1726_v55 = vpop.permute.xlu0 %1725 }
0x1604   :  { %v1730_v59 = vmul.f32 %v3844_v51, %v1726_v55 }
0x1612   :  { %v1724_v58 = vpop.permute.xlu1 %1723 }
0x1613   :  { %v1729_v40 = vmul.f32 %v1724_v58, %v4443_v43  ;;  %v1752_v43 = vld [vmem:[%s4838_s6] sm:$0x1] }
0x1614   :  { %v1904_v58 = vld [vmem:[%s4839_s7] sm:$0x1] }
0x1615   :  { %v1731_v60 = vadd.f32 %v1730_v59, %v1729_v40  ;;  %v3007_v59 = vld [vmem:[%s4839_s7 + $0x1] sm:$0x1] }
0x1616   :  { %v1728_v63 = vpop.permute.xlu1 %1727 }
0x1617   :  { %v4542_v61 = vmul.f32 %v4216_v38, %v1731_v60 }
0x1619   :  { %3845 = vtanh.f32 %v4542_v61 }
0x1623   :  { %v3846_v62 = vpop.eup %3845 }
0x1624   :  { %v4545_v1 = vmul.f32 %v3846_v62, %v1728_v63 }
0x1626   :  { %v1735_v56 = vpack.c.bf16 %v4545_v1, %v4545_v1 }
0x1628   :  { %3468 = vmatmul.mubr.bf16.vlgmr.msra.gmra.mrb[20].mxu1 %v1735_v56  ;;  %v3008_v56 = vld [vmem:[%s4839_s7 + $0x2] sm:$0x1] }
0x1629   :  { %3507 = vmatprep.mubr.msk.bf16.mxu1 %vm4057_vm0, %v4055_v0 }
0x16fb   :  { %v1835_v2 = vpop.f32.mrb[20].mxu1 }
0x16fc   :  { %v1836_v3 = vadd.f32 %v1835_v2, %v1752_v43  ;;  %v3469_v4 = vpop.f32.mrb[21].mxu1 }
0x16fd   :  { %v1838_v27 = vpop.f32.mrb[22].mxu1 }
0x16fe   :  { %3847 = vtanh.f32 %v1836_v3  ;;  %v3470_v6 = vpop.f32.mrb[23].mxu1  ;;  %v3009_v3 = vld [vmem:[%s4839_s7 + $0x3] sm:$0x1] }
0x16ff   :  { %v3010_v6 = vld [vmem:[%s4839_s7 + $0x4] sm:$0x1] }
0x1708   :  { %v3848_v9 = vpop.eup %3847 }
0x1709   :  { %v1842_v8 = vmul.f32 2.5, %v3848_v9 }
0x170b   :  { %v4558_v12 = vadd.f32 %v1842_v8, %v4255_v20 }
0x170d   :  { %v1855_v54 = vadd.f32 %v1854_v11, %v4558_v12 }
0x170f   :  { %v1856_v13 = vsel %vm464_vm3, %v1855_v54, -inf }
0x1710   :  { %1857 = vmax.xlane.f32.xlu0 %v1856_v13 }
0x179d   :  { %v1858_v14 = vpop.xlane.xlu0 %1857 }
0x179e   :  { %v1859_v15 = vrot.slane %v1858_v14, 4 }
0x17a0   :  { %v1860_v16 = vmax.f32 %v1858_v14, %v1859_v15 }
0x17a2   :  { %v1861_v17 = vrot.slane %v1860_v16, 2 }
0x17a4   :  { %v1862_v18 = vmax.f32 %v1860_v16, %v1861_v17 }
0x17a6   :  { %v1863_v19 = vrot.slane %v1862_v18, 1 }
0x17a8   :  { %v1864_v21 = vmax.f32 %v1862_v18, %v1863_v19  ;;  %v3737_v18 = vld [vmem:[#allocation7] sm:$0xff]   ;;  %v1958_v19 = vld [vmem:[%s4834_s2] sm:$0x1] }
0x17a9   :  { %3492 = vmatpush3.bf16.msra.mxu1 %v3737_v18 }
0x17aa   :  { %3603 = vpush %v1864_v21  ;;  %3493 = vmatprep.subr.bf16.mxu1 %v4055_v0 }
0x17db   :  { %s3604_s0 = spop %3603 }
0x17dc   :  { %v1866_v22 = vstv %s3604_s0 }
0x17dd   :  { %vm1867_vm5 = vcmp.eq.f32.partialorder %v1855_v54, %v1866_v22 }
0x17de   :  { %v1868_v25 = vsel %vm1867_vm5, %v4212_v33, 128 }
0x17df   :  { %v1869_v46 = vsel %vm464_vm3, %v1868_v25, 2147483647 }
0x17e0   :  { %v1871_v28 = vshra.s32 %v1869_v46, 16  ;;  %v1870_v30 = vand.u32 65535, %v1869_v46 }
0x17e2   :  { %v1873_v29 = vcvt.s32.f32 %v1871_v28  ;;  %v1872_v5 = vcvt.s32.f32 %v1870_v30 }
0x17e4   :  { %1874 = vmin.xlane.f32.xlu1 %v1873_v29 }
0x1871   :  { %v1875_v31 = vpop.xlane.xlu1 %1874 }
0x1872   :  { %vm1876_vm6 = vcmp.eq.f32.partialorder %v1873_v29, %v1875_v31  ;;  %v1881_v45 = vcvt.f32.s32 %v1875_v31 }
0x1873   :  { %v1877_v32 = vsel %vm1876_vm6, %v1872_v5, inf  ;;  %v3738_v5 = vld [vmem:[#allocation7 + $0x8] sm:$0xff]  }
0x1874   :  { %1878 = vmin.xlane.f32.xlu0 %v1877_v32  ;;  %v1882_v24 = vshll.u32 %v1881_v45, 16  ;;  %3494 = vmatpush3.bf16.msra.mxu1 %v3738_v5  ;;  %v3739_v32 = vld [vmem:[#allocation7 + $0x10] sm:$0xff]  }
0x1875   :  { %3495 = vmatprep.subr.bf16.mxu1 %v4055_v0 }
0x1878   :  { %3496 = vmatpush3.bf16.msra.mxu1 %v3739_v32 }
0x1879   :  { %3497 = vmatprep.subr.bf16.mxu1 %v4055_v0 }
0x187c   :  { %3498 = vmatpush3.bf16.msra.mxu1 %v3740_v35 }
0x187d   :  { %3499 = vmatprep.subr.bf16.mxu1 %v4055_v0 }
0x1880   :  { %3500 = vmatpush3.bf16.msra.mxu1 %v3741_v37 }
0x1881   :  { %3501 = vmatprep.subr.bf16.mxu1 %v4055_v0 }
0x1884   :  { %3502 = vmatpush3.bf16.msra.mxu1 %v3742_v41 }
0x1885   :  { %3503 = vmatprep.subr.bf16.mxu1 %v4055_v0 }
0x1888   :  { %3504 = vmatpush3.bf16.msra.mxu1 %v3743_v42 }
0x1889   :  { %3505 = vmatprep.subr.bf16.mxu1 %v4055_v0 }
0x188a   :  { %1938 = vrot.lane.b32.xlu0 %v4521_v7, %s4056_s30  ;;  %v3735_v7 = vld [vmem:[#allocation5 + $0x30] sm:$0xff]  }
0x188b   :  { %3484 = vmatpush3.bf16.msra.mxu0 %v3735_v7  ;;  %v3744_v7 = vld [vmem:[#allocation7 + $0x38] sm:$0xff]  }
0x188c   :  { %3485 = vmatprep.subr.bf16.mxu0 %v4055_v0  ;;  %3506 = vmatpush3.bf16.msra.mxu1 %v3744_v7 }
0x188d   :  { %3531 = vmatprep.subr.bf16.mxu1 %v4055_v0 }
0x188f   :  { %3486 = vmatpush3.bf16.msra.mxu0 %v3736_v44 }
0x1890   :  { %3511 = vmatprep.subr.bf16.mxu0 %v4055_v0 }
0x1901   :  { %v1879_v47 = vpop.xlane.xlu0 %1878 }
0x1902   :  { %v1880_v48 = vcvt.f32.s32 %v1879_v47 }
0x1904   :  { %v1883_v49 = vadd.s32 %v1882_v24, %v1880_v48 }
0x1905   :  { %v1939_v15 = vpop.permute.xlu0 %1938 }
0x1906   :  { %v1884_v50 = vrot.slane %v1883_v49, 4 }
0x1908   :  { %vm1885_vm7 = vcmp.lt.s32.totalorder %v1883_v49, %v1884_v50 }
0x1909   :  { %v1886_v51 = vsel %vm1885_vm7, %v1883_v49, %v1884_v50 }
0x190a   :  { %v1887_v52 = vrot.slane %v1886_v51, 2 }
0x190c   :  { %vm1888_vm8 = vcmp.lt.s32.totalorder %v1886_v51, %v1887_v52 }
0x190d   :  { %v1889_v53 = vsel %vm1888_vm8, %v1886_v51, %v1887_v52 }
0x190e   :  { %v1890_v10 = vrot.slane %v1889_v53, 1 }
0x1910   :  { %vm1891_vm9 = vcmp.lt.s32.totalorder %v1889_v53, %v1890_v10 }
0x1911   :  { %v1892_v55 = vsel %vm1891_vm9, %v1889_v53, %v1890_v10 }
0x1912   :  { %3605 = vpush %v1892_v55 }
0x1943   :  { %s4574_s13 = spop %3605 }
0x1944   :  { %1903 = sst [smem:[#allocation13 + $0x3]] %s4574_s13  ;;  %p1905_p5 = scmp.eq.s32.totalorder %s4574_s13, 0 }
0x1945   :  { %p1911_p6 = scmp.eq.s32.totalorder %s4574_s13, 1  ;;  %p1918_p7 = scmp.eq.s32.totalorder %s4574_s13, 2 }
0x1946   :  { %s1906_s20 = scalar_select %p1905_p5, 1, 0 }
0x1947   :  { %s1912_s22 = scalar_select %p1911_p6, 1, 0 }
0x1948   :  { %s1907_s23 = scvt.s32.f32 %s1906_s20  ;;  %p1925_p8 = scmp.eq.s32.totalorder %s4574_s13, 3 }
0x1949   :  { %s1913_s25 = scvt.s32.f32 %s1912_s22  ;;  %p1932_p9 = scmp.eq.s32.totalorder %s4574_s13, 4 }
0x194a   :  { %v1908_v40 = vstv %s1907_s23  ;;  %s1919_s3 = scalar_select %p1918_p7, 1, 0 }
0x194b   :  { %v1914_v60 = vstv %s1913_s25  ;;  %v1909_v62 = vmul.f32 %v1908_v40, %v1904_v58  ;;  %s1926_s15 = scalar_select %p1925_p8, 1, 0  ;;  %v3745_v40 = vld [vmem:[#allocation8] sm:$0xff]  }
0x194c   :  { %s1920_s28 = scvt.s32.f32 %s1919_s3  ;;  %v1915_v63 = vmul.f32 %v3007_v59, %v1914_v60  ;;  %s4009_s25 = scalar_lea.hbm %s4841_s9, 16 }
0x194d   :  { %s1927_s17 = scvt.s32.f32 %s1926_s15  ;;  %p4010_p1 = scmp.ne.s32.totalorder %s4841_s9, %s4009_s25 }
0x194e   :  { %v1916_v43 = vadd.f32 %v1915_v63, %v1909_v62  ;;  %v1921_v2 = vstv %s1920_s28  ;;  %s1933_s20 = scalar_select %p1932_p9, 1, 0 }
0x194f   :  { %v1922_v4 = vmul.f32 %v3008_v56, %v1921_v2  ;;  %v1928_v27 = vstv %s1927_s17  ;;  %v3746_v56 = vld [vmem:[#allocation8 + $0x8] sm:$0xff]   ;;  %p4013_p2 = scmp.lt.u32.totalorder %s4009_s25, %s4841_s9 }
0x1950   :  { %s1934_s1 = scvt.s32.f32 %s1933_s20  ;;  %v1929_v8 = vmul.f32 %v3009_v3, %v1928_v27  ;;  %v3748_v27 = vld [vmem:[#allocation8 + $0x18] sm:$0xff]  }
0x1951   :  { %v1923_v9 = vadd.f32 %v1922_v4, %v1916_v43  ;;  %v3747_v43 = vld [vmem:[#allocation8 + $0x10] sm:$0xff]   ;;  %p4015_p3 = pnand %p4013_p2, %p4010_p1 }
0x1952   :  { %v1935_v11 = vstv %s1934_s1 }
0x1953   :  { %v1930_v54 = vadd.f32 %v1929_v8, %v1923_v9  ;;  %v1936_v13 = vmul.f32 %v3010_v6, %v1935_v11  ;;  %v3749_v6 = vld [vmem:[#allocation8 + $0x20] sm:$0xff]   ;;  %v3750_v8 = vld [vmem:[#allocation8 + $0x28] sm:$0xff]   ;;  %v3751_v11 = vld [vmem:[#allocation8 + $0x30] sm:$0xff]  }
0x1955   :  { %v1937_v14 = vadd.f32 %v1936_v13, %v1930_v54  ;;  %v3752_v54 = vld [vmem:[#allocation8 + $0x38] sm:$0xff]  }
0x1957   :  { %v1940_v16 = vadd.f32 %v1939_v15, %v1937_v14 }
0x1959   :  { %v1941_v17 = vpack.c.bf16 %v1940_v16, %v1940_v16 }
0x195b   :  { %3488 = vmatmul.mubr.bf16.vlgmr.msra.gmra.mrb[24].mxu0 %v1941_v17 }
0x195c   :  { %3527 = vmatprep.mubr.msk.bf16.mxu0 %vm4057_vm0, %v4055_v0  ;;  %3512 = vmatpush3.bf16.msra.mxu0 %v3745_v40  ;;  %v3755_v40 = vld [vmem:[#allocation5 + $0x10] sm:$0xff]  }
0x195d   :  { %3513 = vmatprep.subr.bf16.mxu0 %v4055_v0 }
0x1960   :  { %3514 = vmatpush3.bf16.msra.mxu0 %v3746_v56  ;;  %v3759_v56 = vld [vmem:[#allocation5 + $0x30] sm:$0xff]  }
0x1961   :  { %3515 = vmatprep.subr.bf16.mxu0 %v4055_v0 }
0x1964   :  { %3516 = vmatpush3.bf16.msra.mxu0 %v3747_v43  ;;  %v3760_v43 = vld [vmem:[#allocation5 + $0x38] sm:$0xff]  }
0x1965   :  { %3517 = vmatprep.subr.bf16.mxu0 %v4055_v0 }
0x1968   :  { %3518 = vmatpush3.bf16.msra.mxu0 %v3748_v27 }
0x1969   :  { %3519 = vmatprep.subr.bf16.mxu0 %v4055_v0 }
0x196c   :  { %3520 = vmatpush3.bf16.msra.mxu0 %v3749_v6 }
0x196d   :  { %3521 = vmatprep.subr.bf16.mxu0 %v4055_v0 }
0x1970   :  { %3522 = vmatpush3.bf16.msra.mxu0 %v3750_v8 }
0x1971   :  { %3523 = vmatprep.subr.bf16.mxu0 %v4055_v0 }
0x1974   :  { %3524 = vmatpush3.bf16.msra.mxu0 %v3751_v11 }
0x1975   :  { %3525 = vmatprep.subr.bf16.mxu0 %v4055_v0 }
0x1978   :  { %3526 = vmatpush3.bf16.msra.mxu0 %v3752_v54 }
0x1979   :  { %3551 = vmatprep.subr.bf16.mxu0 %v4055_v0 }
0x1a2e   :  { %v2041_v21 = vpop.f32.mrb[24].mxu0 }
0x1a2f   :  { %v2042_v22 = vadd.f32 %v2041_v21, %v1958_v19  ;;  %v3489_v25 = vpop.f32.mrb[25].mxu0 }
0x1a30   :  { %v2044_v46 = vpop.f32.mrb[26].mxu0 }
0x1a31   :  { %v3019_v28 = vmul.f32 -1.442695, %v2042_v22  ;;  %v3490_v29 = vpop.f32.mrb[27].mxu0 }
0x1a33   :  { %3849 = vpow2.f32 %v3019_v28 }
0x1a3d   :  { %v3850_v30 = vpop.eup %3849 }
0x1a3e   :  { %v2050_v31 = vadd.f32 1.0, %v3850_v30 }
0x1a40   :  { %3851 = vrcp.f32 %v2050_v31 }
0x1a41   :  { %3853 = vtanh.f32 %v2042_v22 }
0x1a4a   :  { %v3852_v34 = vpop.eup %3851 }
0x1a4b   :  { %2058 = vrot.lane.b32.xlu0 %v3852_v34, %s4056_s30  ;;  %2054 = vrot.lane.b32.xlu1 %v3852_v34, %s4058_s12  ;;  %v3854_v36 = vpop.eup %3853 }
0x1a4f   :  { %2056 = vrot.lane.b32.xlu1 %v3854_v36, %s4050_s27 }
0x1a53   :  { %2066 = vrot.lane.b32.xlu1 %v4545_v1, %s4056_s30 }
0x1abd   :  { %v2055_v44 = vpop.permute.xlu1 %2054  ;;  %v2059_v50 = vpop.permute.xlu0 %2058 }
0x1abe   :  { %v2060_v47 = vmul.f32 %v2055_v44, %v4518_v26  ;;  %v2086_v26 = vld [vmem:[%s4836_s4] sm:$0x1] }
0x1ac1   :  { %v2057_v45 = vpop.permute.xlu1 %2056 }
0x1ac2   :  { %v2061_v24 = vmul.f32 %v3852_v34, %v2057_v45  ;;  %v2313_v34 = vld [vmem:[%s4840_s8 + $0x4] sm:$0x1] }
0x1ac4   :  { %v2062_v48 = vadd.f32 %v2061_v24, %v2060_v47 }
0x1ac5   :  { %v2067_v52 = vpop.permute.xlu1 %2066 }
0x1ac6   :  { %v4617_v49 = vmul.f32 %v4216_v38, %v2062_v48 }
0x1ac8   :  { %3855 = vtanh.f32 %v4617_v49 }
0x1ad2   :  { %v3856_v1 = vpop.eup %3855 }
0x1ad3   :  { %v4620_v51 = vmul.f32 %v3856_v1, %v2059_v50 }
0x1ad5   :  { %v2068_v53 = vadd.f32 %v2067_v52, %v4620_v51 }
0x1ad7   :  { %v2069_v10 = vpack.c.bf16 %v2068_v53, %v2068_v53 }
0x1ad9   :  { %3508 = vmatmul.mubr.bf16.vlgmr.msra.gmra.mrb[24].mxu1 %v2069_v10 }
0x1ada   :  { %3547 = vmatprep.mubr.msk.bf16.mxu1 %vm4057_vm0, %v4055_v0 }
0x1bac   :  { %v2169_v55 = vpop.f32.mrb[24].mxu1 }
0x1bad   :  { %v2170_v58 = vadd.f32 %v2169_v55, %v2086_v26  ;;  %v3509_v59 = vpop.f32.mrb[25].mxu1 }
0x1bae   :  { %v2172_v60 = vpop.f32.mrb[26].mxu1  ;;  %v3754_v59 = vld [vmem:[#allocation5 + $0x8] sm:$0xff]  }
0x1baf   :  { %v3028_v62 = vmul.f32 -1.442695, %v2170_v58  ;;  %3857 = vtanh.f32 %v2170_v58  ;;  %v3510_v63 = vpop.f32.mrb[27].mxu1  ;;  %v3753_v58 = vld [vmem:[#allocation5] sm:$0xff]   ;;  %v3756_v60 = vld [vmem:[#allocation5 + $0x18] sm:$0xff]  }
0x1bb0   :  { %3532 = vmatpush3.bf16.msra.mxu1 %v3753_v58  ;;  %v3758_v63 = vld [vmem:[#allocation5 + $0x28] sm:$0xff]  }
0x1bb1   :  { %3859 = vpow2.f32 %v3028_v62  ;;  %3533 = vmatprep.subr.bf16.mxu1 %v4055_v0  ;;  %v3757_v62 = vld [vmem:[#allocation5 + $0x20] sm:$0xff]  }
0x1bb4   :  { %3534 = vmatpush3.bf16.msra.mxu1 %v3754_v59  ;;  %v3763_v59 = vld [vmem:[#allocation7 + $0x10] sm:$0xff]  }
0x1bb5   :  { %3535 = vmatprep.subr.bf16.mxu1 %v4055_v0 }
0x1bb8   :  { %3536 = vmatpush3.bf16.msra.mxu1 %v3755_v40  ;;  %v3764_v40 = vld [vmem:[#allocation7 + $0x18] sm:$0xff]  }
0x1bb9   :  { %v3858_v2 = vpop.eup %3857  ;;  %3537 = vmatprep.subr.bf16.mxu1 %v4055_v0 }
0x1bba   :  { %2184 = vrot.lane.b32.xlu1 %v3858_v2, %s4050_s27 }
0x1bbb   :  { %v3860_v3 = vpop.eup %3859 }
0x1bbc   :  { %v2178_v4 = vadd.f32 1.0, %v3860_v3  ;;  %3538 = vmatpush3.bf16.msra.mxu1 %v3756_v60 }
0x1bbd   :  { %3539 = vmatprep.subr.bf16.mxu1 %v4055_v0 }
0x1bbe   :  { %3861 = vrcp.f32 %v2178_v4 }
0x1bc0   :  { %3540 = vmatpush3.bf16.msra.mxu1 %v3757_v62  ;;  %v3765_v62 = vld [vmem:[#allocation7 + $0x20] sm:$0xff]  }
0x1bc1   :  { %3541 = vmatprep.subr.bf16.mxu1 %v4055_v0 }
0x1bc4   :  { %3542 = vmatpush3.bf16.msra.mxu1 %v3758_v63  ;;  %v3766_v63 = vld [vmem:[#allocation7 + $0x28] sm:$0xff]  }
0x1bc5   :  { %3543 = vmatprep.subr.bf16.mxu1 %v4055_v0 }
0x1bc8   :  { %v3862_v9 = vpop.eup %3861  ;;  %3544 = vmatpush3.bf16.msra.mxu1 %v3759_v56  ;;  %v3767_v56 = vld [vmem:[#allocation7 + $0x30] sm:$0xff]  }
0x1bc9   :  { %2182 = vrot.lane.b32.xlu0 %v3862_v9, %s4058_s12  ;;  %3545 = vmatprep.subr.bf16.mxu1 %v4055_v0 }
0x1bcc   :  { %3546 = vmatpush3.bf16.msra.mxu1 %v3760_v43  ;;  %v3768_v43 = vld [vmem:[#allocation7 + $0x38] sm:$0xff]  }
0x1bcd   :  { %2186 = vrot.lane.b32.xlu0 %v3862_v9, %s4056_s30  ;;  %3571 = vmatprep.subr.bf16.mxu1 %v4055_v0 }
0x1c2c   :  { %v2185_v13 = vpop.permute.xlu1 %2184 }
0x1c2d   :  { %v2189_v15 = vmul.f32 %v3862_v9, %v2185_v13 }
0x1c3b   :  { %v2183_v14 = vpop.permute.xlu0 %2182 }
0x1c3c   :  { %v2188_v16 = vmul.f32 %v2183_v14, %v4542_v61  ;;  %v2211_v61 = vld [vmem:[%s4838_s6] sm:$0x1] }
0x1c3e   :  { %v2190_v17 = vadd.f32 %v2189_v15, %v2188_v16  ;;  %v2363_v15 = vld [vmem:[%s4839_s7] sm:$0x1]  ;;  %v3038_v16 = vld [vmem:[%s4839_s7 + $0x1] sm:$0x1] }
0x1c3f   :  { %v2187_v21 = vpop.permute.xlu0 %2186 }
0x1c40   :  { %v4641_v18 = vmul.f32 %v4216_v38, %v2190_v17 }
0x1c42   :  { %3863 = vtanh.f32 %v4641_v18 }
0x1c4c   :  { %v3864_v19 = vpop.eup %3863 }
0x1c4d   :  { %v4644_v22 = vmul.f32 %v3864_v19, %v2187_v21 }
0x1c4f   :  { %v2194_v25 = vpack.c.bf16 %v4644_v22, %v4644_v22 }
0x1c51   :  { %3528 = vmatmul.mubr.bf16.vlgmr.msra.gmra.mrb[28].mxu0 %v2194_v25 }
0x1c52   :  { %3567 = vmatprep.mubr.msk.bf16.mxu0 %vm4057_vm0, %v4055_v0 }
0x1d24   :  { %v2294_v46 = vpop.f32.mrb[28].mxu0 }
0x1d25   :  { %v2295_v28 = vadd.f32 %v2294_v46, %v2211_v61  ;;  %v3529_v29 = vpop.f32.mrb[29].mxu0  ;;  %v3039_v61 = vld [vmem:[%s4839_s7 + $0x2] sm:$0x1] }
0x1d26   :  { %v2297_v30 = vpop.f32.mrb[30].mxu0  ;;  %v3040_v29 = vld [vmem:[%s4839_s7 + $0x3] sm:$0x1] }
0x1d27   :  { %3865 = vtanh.f32 %v2295_v28  ;;  %v3530_v31 = vpop.f32.mrb[31].mxu0 }
0x1d31   :  { %v3866_v5 = vpop.eup %3865 }
0x1d32   :  { %v2301_v32 = vmul.f32 2.5, %v3866_v5  ;;  %v3041_v5 = vld [vmem:[%s4839_s7 + $0x4] sm:$0x1] }
0x1d34   :  { %v4657_v35 = vadd.f32 %v2301_v32, %v4255_v20 }
0x1d36   :  { %v2314_v36 = vadd.f32 %v2313_v34, %v4657_v35 }
0x1d38   :  { %v2315_v37 = vsel %vm464_vm3, %v2314_v36, -inf }
0x1d39   :  { %2316 = vmax.xlane.f32.xlu1 %v2315_v37 }
0x1d4a   :  { %2397 = vrot.lane.b32.xlu1 %v4620_v51, %s4056_s30 }
0x1dc6   :  { %v2317_v41 = vpop.xlane.xlu1 %2316 }
0x1dc7   :  { %v2318_v42 = vrot.slane %v2317_v41, 4 }
0x1dc9   :  { %v2319_v7 = vmax.f32 %v2317_v41, %v2318_v42 }
0x1dcb   :  { %v2320_v44 = vrot.slane %v2319_v7, 2 }
0x1dcd   :  { %v2321_v45 = vmax.f32 %v2319_v7, %v2320_v44  ;;  %v2398_v7 = vpop.permute.xlu1 %2397 }
0x1dcf   :  { %v2322_v47 = vrot.slane %v2321_v45, 1 }
0x1dd1   :  { %v2323_v24 = vmax.f32 %v2321_v45, %v2322_v47  ;;  %v2417_v47 = vld [vmem:[%s4834_s2] sm:$0x1] }
0x1dd3   :  { %3607 = vpush %v2323_v24 }
0x1e04   :  { %s3608_s16 = spop %3607 }
0x1e05   :  { %v2325_v48 = vstv %s3608_s16 }
0x1e06   :  { %vm2326_vm10 = vcmp.eq.f32.partialorder %v2314_v36, %v2325_v48 }
0x1e07   :  { %v2327_v1 = vsel %vm2326_vm10, %v4212_v33, 128 }
0x1e08   :  { %v2328_v50 = vsel %vm464_vm3, %v2327_v1, 2147483647 }
0x1e09   :  { %v2330_v52 = vshra.s32 %v2328_v50, 16  ;;  %v2329_v10 = vand.u32 65535, %v2328_v50  ;;  %v3761_v50 = vld [vmem:[#allocation7] sm:$0xff]  }
0x1e0a   :  { %3552 = vmatpush3.bf16.msra.mxu0 %v3761_v50 }
0x1e0b   :  { %v2332_v53 = vcvt.s32.f32 %v2330_v52  ;;  %v2331_v26 = vcvt.s32.f32 %v2329_v10  ;;  %3553 = vmatprep.subr.bf16.mxu0 %v4055_v0 }
0x1e0d   :  { %2333 = vmin.xlane.f32.xlu0 %v2332_v53 }
0x1e9a   :  { %v2334_v51 = vpop.xlane.xlu0 %2333 }
0x1e9b   :  { %vm2335_vm11 = vcmp.eq.f32.partialorder %v2332_v53, %v2334_v51  ;;  %v2340_v2 = vcvt.f32.s32 %v2334_v51  ;;  %v3762_v51 = vld [vmem:[#allocation7 + $0x8] sm:$0xff]  }
0x1e9c   :  { %v2336_v55 = vsel %vm2335_vm11, %v2331_v26, inf  ;;  %3554 = vmatpush3.bf16.msra.mxu0 %v3762_v51 }
0x1e9d   :  { %2337 = vmin.xlane.f32.xlu0 %v2336_v55  ;;  %v2341_v4 = vshll.u32 %v2340_v2, 16  ;;  %3555 = vmatprep.subr.bf16.mxu0 %v4055_v0 }
0x1ea0   :  { %3556 = vmatpush3.bf16.msra.mxu0 %v3763_v59 }
0x1ea1   :  { %3557 = vmatprep.subr.bf16.mxu0 %v4055_v0 }
0x1ea4   :  { %3558 = vmatpush3.bf16.msra.mxu0 %v3764_v40 }
0x1ea5   :  { %3559 = vmatprep.subr.bf16.mxu0 %v4055_v0 }
0x1ea8   :  { %3560 = vmatpush3.bf16.msra.mxu0 %v3765_v62 }
0x1ea9   :  { %3561 = vmatprep.subr.bf16.mxu0 %v4055_v0 }
0x1eac   :  { %3562 = vmatpush3.bf16.msra.mxu0 %v3766_v63 }
0x1ead   :  { %3563 = vmatprep.subr.bf16.mxu0 %v4055_v0 }
0x1eb0   :  { %3564 = vmatpush3.bf16.msra.mxu0 %v3767_v56 }
0x1eb1   :  { %3565 = vmatprep.subr.bf16.mxu0 %v4055_v0 }
0x1eb4   :  { %3566 = vmatpush3.bf16.msra.mxu0 %v3768_v43 }
0x1f2a   :  { %v2338_v3 = vpop.xlane.xlu0 %2337 }
0x1f2b   :  { %v2339_v27 = vcvt.f32.s32 %v2338_v3 }
0x1f2d   :  { %v2342_v6 = vadd.s32 %v2341_v4, %v2339_v27 }
0x1f2f   :  { %v2343_v9 = vrot.slane %v2342_v6, 4 }
0x1f31   :  { %vm2344_vm12 = vcmp.lt.s32.totalorder %v2342_v6, %v2343_v9 }
0x1f32   :  { %v2345_v8 = vsel %vm2344_vm12, %v2342_v6, %v2343_v9 }
0x1f33   :  { %v2346_v11 = vrot.slane %v2345_v8, 2 }
0x1f35   :  { %vm2347_vm13 = vcmp.lt.s32.totalorder %v2345_v8, %v2346_v11 }
0x1f36   :  { %v2348_v54 = vsel %vm2347_vm13, %v2345_v8, %v2346_v11 }
0x1f37   :  { %v2349_v13 = vrot.slane %v2348_v54, 1 }
0x1f39   :  { %vm2350_vm14 = vcmp.lt.s32.totalorder %v2348_v54, %v2349_v13 }
0x1f3a   :  { %v2351_v14 = vsel %vm2350_vm14, %v2348_v54, %v2349_v13 }
0x1f3b   :  { %3609 = vpush %v2351_v14 }
0x1f6c   :  { %s4673_s17 = spop %3609 }
0x1f6d   :  { %2362 = sst [smem:[#allocation13 + $0x4]] %s4673_s17  ;;  %p2364_p10 = scmp.eq.s32.totalorder %s4673_s17, 0 }
0x1f6e   :  { %p2370_p11 = scmp.eq.s32.totalorder %s4673_s17, 1  ;;  %p2377_p12 = scmp.eq.s32.totalorder %s4673_s17, 2 }
0x1f6f   :  { %s2365_s19 = scalar_select %p2364_p10, 1, 0 }
0x1f70   :  { %s2371_s0 = scalar_select %p2370_p11, 1, 0 }
0x1f71   :  { %s2366_s20 = scvt.s32.f32 %s2365_s19  ;;  %p2384_p13 = scmp.eq.s32.totalorder %s4673_s17, 3 }
0x1f72   :  { %s2372_s1 = scvt.s32.f32 %s2371_s0  ;;  %p2391_p0 = scmp.eq.s32.totalorder %s4673_s17, 4 }
0x1f73   :  { %v2367_v17 = vstv %s2366_s20  ;;  %s2378_s26 = scalar_select %p2377_p12, 1, 0 }
0x1f74   :  { %v2373_v19 = vstv %s2372_s1  ;;  %v2368_v21 = vmul.f32 %v2367_v17, %v2363_v15  ;;  %s2385_s29 = scalar_select %p2384_p13, 1, 0  ;;  %v2545_v15 = vld [vmem:[%s4836_s4] sm:$0x1] }
0x1f75   :  { %s2379_s3 = scvt.s32.f32 %s2378_s26  ;;  %v2374_v25 = vmul.f32 %v3038_v16, %v2373_v19 }
0x1f76   :  { %s2386_s14 = scvt.s32.f32 %s2385_s29 }
0x1f77   :  { %v2375_v46 = vadd.f32 %v2374_v25, %v2368_v21  ;;  %v2380_v28 = vstv %s2379_s3  ;;  %s2392_s0 = scalar_select %p2391_p0, 1, 0  ;;  %v3769_v21 = vld [vmem:[#allocation8] sm:$0xff]  }
0x1f78   :  { %v2381_v30 = vmul.f32 %v3039_v61, %v2380_v28  ;;  %v2387_v31 = vstv %s2386_s14  ;;  %v3771_v28 = vld [vmem:[#allocation8 + $0x10] sm:$0xff]  }
0x1f79   :  { %s2393_s23 = scvt.s32.f32 %s2392_s0  ;;  %v2388_v34 = vmul.f32 %v3040_v29, %v2387_v31 }
0x1f7a   :  { %v2382_v32 = vadd.f32 %v2381_v30, %v2375_v46  ;;  %v3770_v46 = vld [vmem:[#allocation8 + $0x8] sm:$0xff]  }
0x1f7b   :  { %v2394_v36 = vstv %s2393_s23 }
0x1f7c   :  { %v2389_v37 = vadd.f32 %v2388_v34, %v2382_v32  ;;  %v2395_v41 = vmul.f32 %v3041_v5, %v2394_v36  ;;  %v3772_v5 = vld [vmem:[#allocation8 + $0x18] sm:$0xff]   ;;  %v3773_v32 = vld [vmem:[#allocation8 + $0x20] sm:$0xff]   ;;  %v3774_v36 = vld [vmem:[#allocation8 + $0x28] sm:$0xff]  }
0x1f7e   :  { %v2396_v42 = vadd.f32 %v2395_v41, %v2389_v37  ;;  %v3775_v37 = vld [vmem:[#allocation8 + $0x30] sm:$0xff]   ;;  %v3776_v41 = vld [vmem:[#allocation8 + $0x38] sm:$0xff]  }
0x1f80   :  { %v2399_v44 = vadd.f32 %v2398_v7, %v2396_v42 }
0x1f82   :  { %v2400_v45 = vpack.c.bf16 %v2399_v44, %v2399_v44 }
0x1f84   :  { %3548 = vmatmul.mubr.bf16.vlgmr.msra.gmra.mrb[28].mxu1 %v2400_v45 }
0x1f85   :  { %3587 = vmatprep.mubr.msk.bf16.mxu1 %vm4057_vm0, %v4055_v0  ;;  %3572 = vmatpush3.bf16.msra.mxu1 %v3769_v21 }
0x1f86   :  { %3573 = vmatprep.subr.bf16.mxu1 %v4055_v0 }
0x1f89   :  { %3574 = vmatpush3.bf16.msra.mxu1 %v3770_v46  ;;  %v2303_v46 = vmul.f32 1.442695, %v4657_v35 }
0x1f8a   :  { %3575 = vmatprep.subr.bf16.mxu1 %v4055_v0 }
0x1f8d   :  { %3576 = vmatpush3.bf16.msra.mxu1 %v3771_v28 }
0x1f8e   :  { %3577 = vmatprep.subr.bf16.mxu1 %v4055_v0 }
0x1f91   :  { %3578 = vmatpush3.bf16.msra.mxu1 %v3772_v5 }
0x1f92   :  { %3579 = vmatprep.subr.bf16.mxu1 %v4055_v0 }
0x1f95   :  { %3580 = vmatpush3.bf16.msra.mxu1 %v3773_v32 }
0x1f96   :  { %3581 = vmatprep.subr.bf16.mxu1 %v4055_v0 }
0x1f99   :  { %3582 = vmatpush3.bf16.msra.mxu1 %v3774_v36 }
0x1f9a   :  { %3583 = vmatprep.subr.bf16.mxu1 %v4055_v0 }
0x1f9d   :  { %3584 = vmatpush3.bf16.msra.mxu1 %v3775_v37 }
0x1f9e   :  { %3585 = vmatprep.subr.bf16.mxu1 %v4055_v0 }
0x1fa1   :  { %3586 = vmatpush3.bf16.msra.mxu1 %v3776_v41 }
0x2057   :  { %v2500_v24 = vpop.f32.mrb[28].mxu1 }
0x2058   :  { %v2501_v48 = vadd.f32 %v2500_v24, %v2417_v47  ;;  %v3549_v1 = vpop.f32.mrb[29].mxu1 }
0x2059   :  { %v2503_v52 = vpop.f32.mrb[30].mxu1 }
0x205a   :  { %v3050_v53 = vmul.f32 -1.442695, %v2501_v48  ;;  %3867 = vtanh.f32 %v2501_v48  ;;  %v3550_v10 = vpop.f32.mrb[31].mxu1 }
0x205c   :  { %3869 = vpow2.f32 %v3050_v53  ;;  %v2670_v53 = vld [vmem:[%s4838_s6] sm:$0x1] }
0x2064   :  { %v3868_v26 = vpop.eup %3867 }
0x2065   :  { %2515 = vrot.lane.b32.xlu1 %v3868_v26, %s4050_s27 }
0x2066   :  { %v3870_v55 = vpop.eup %3869 }
0x2067   :  { %v2509_v58 = vadd.f32 1.0, %v3870_v55 }
0x2069   :  { %3871 = vrcp.f32 %v2509_v58 }
0x2073   :  { %v3872_v60 = vpop.eup %3871 }
0x2074   :  { %2517 = vrot.lane.b32.xlu1 %v3872_v60, %s4056_s30  ;;  %2513 = vrot.lane.b32.xlu0 %v3872_v60, %s4058_s12 }
0x2078   :  { %2525 = vrot.lane.b32.xlu0 %v4644_v22, %s4056_s30 }
0x20d7   :  { %v2516_v2 = vpop.permute.xlu1 %2515 }
0x20d8   :  { %v2520_v4 = vmul.f32 %v3872_v60, %v2516_v2 }
0x20e6   :  { %v2514_v3 = vpop.permute.xlu0 %2513  ;;  %v2518_v22 = vpop.permute.xlu1 %2517 }
0x20e7   :  { %v2519_v27 = vmul.f32 %v2514_v3, %v4617_v49 }
0x20e9   :  { %v2521_v6 = vadd.f32 %v2520_v4, %v2519_v27 }
0x20ea   :  { %v2526_v54 = vpop.permute.xlu0 %2525 }
0x20eb   :  { %v2522_v9 = vmul.f32 %v4216_v38, %v2521_v6  ;;  %v926_v6 = vmul.f32 1.442695, %v4360_v39 }
0x20ed   :  { %3873 = vtanh.f32 %v2522_v9  ;;  %v1844_v9 = vmul.f32 1.442695, %v4558_v12 }
0x20f7   :  { %v3874_v8 = vpop.eup %3873 }
0x20f8   :  { %v2524_v11 = vmul.f32 %v3874_v8, %v2518_v22 }
0x20fa   :  { %v2527_v13 = vadd.f32 %v2526_v54, %v2524_v11 }
0x20fc   :  { %v2528_v14 = vpack.c.bf16 %v2527_v13, %v2527_v13 }
0x20fe   :  { %3568 = vmatmul.mubr.bf16.vlgmr.msra.gmra.mrb[32].mxu0 %v2528_v14 }
0x21d1   :  { %v2628_v16 = vpop.f32.mrb[32].mxu0 }
0x21d2   :  { %v2629_v17 = vadd.f32 %v2628_v16, %v2545_v15  ;;  %v3569_v19 = vpop.f32.mrb[33].mxu0 }
0x21d3   :  { %v2631_v49 = vpop.f32.mrb[34].mxu0 }
0x21d4   :  { %v3059_v25 = vmul.f32 -1.442695, %v2629_v17  ;;  %3875 = vtanh.f32 %v2629_v17  ;;  %v3570_v61 = vpop.f32.mrb[35].mxu0  ;;  %v462_v49 = vmul.f32 1.442695, %v4261_v23 }
0x21d6   :  { %3877 = vpow2.f32 %v3059_v25  ;;  %v1385_v25 = vmul.f32 1.442695, %v4459_v57 }
0x21de   :  { %v3876_v29 = vpop.eup %3875 }
0x21df   :  { %2643 = vrot.lane.b32.xlu0 %v3876_v29, %s4050_s27 }
0x21e0   :  { %v3878_v30 = vpop.eup %3877 }
0x21e1   :  { %v2637_v31 = vadd.f32 1.0, %v3878_v30 }
0x21e3   :  { %3879 = vrcp.f32 %v2637_v31 }
0x21ed   :  { %v3880_v34 = vpop.eup %3879 }
0x21ee   :  { %2641 = vrot.lane.b32.xlu1 %v3880_v34, %s4058_s12 }
0x21f2   :  { %2645 = vrot.lane.b32.xlu1 %v3880_v34, %s4056_s30 }
0x2251   :  { %v2644_v42 = vpop.permute.xlu0 %2643 }
0x2252   :  { %v2648_v44 = vmul.f32 %v3880_v34, %v2644_v42 }
0x2260   :  { %v2642_v7 = vpop.permute.xlu1 %2641 }
0x2261   :  { %v2647_v45 = vmul.f32 %v2642_v7, %v4641_v18 }
0x2263   :  { %v2649_v47 = vadd.f32 %v2648_v44, %v2647_v45 }
0x2264   :  { %v2646_v1 = vpop.permute.xlu1 %2645 }
0x2265   :  { %v2650_v24 = vmul.f32 %v4216_v38, %v2649_v47  ;;  %v2772_v38 = vld [vmem:[%s4840_s8 + $0x5] sm:$0x1] }
0x2267   :  { %3881 = vtanh.f32 %v2650_v24 }
0x2271   :  { %v3882_v48 = vpop.eup %3881 }
0x2272   :  { %v2652_v50 = vmul.f32 %v3882_v48, %v2646_v1 }
0x2274   :  { %v2653_v52 = vpack.c.bf16 %v2652_v50, %v2652_v50 }
0x2276   :  { %3588 = vmatmul.mubr.bf16.vlgmr.msra.gmra.mrb[32].mxu1 %v2653_v52 }
0x2349   :  { %v2753_v10 = vpop.f32.mrb[32].mxu1 }
0x234a   :  { %v2754_v51 = vadd.f32 %v2753_v10, %v2670_v53  ;;  %v3589_v26 = vpop.f32.mrb[33].mxu1 }
0x234b   :  { %v2756_v55 = vpop.f32.mrb[34].mxu1 }
0x234c   :  { %3883 = vtanh.f32 %v2754_v51  ;;  %v3590_v58 = vpop.f32.mrb[35].mxu1 }
0x234d   :  { %3885 = vpow2.f32 %v926_v6 }
0x234e   :  { %3887 = vpow2.f32 %v1844_v9 }
0x2356   :  { %v3884_v18 = vpop.eup %3883 }
0x2357   :  { %v2760_v59 = vmul.f32 2.5, %v3884_v18  ;;  %v4746_v14 = vpop.eup %3885 }
0x2358   :  { %v928_v15 = vsel %vm464_vm3, %v4746_v14, 0.0  ;;  %v4750_v16 = vpop.eup %3887 }
0x2359   :  { %v4737_v40 = vadd.f32 %v2760_v59, %v4255_v20  ;;  %v1846_v17 = vsel %vm464_vm3, %v4750_v16, 0.0 }
0x235b   :  { %v2773_v60 = vadd.f32 %v2772_v38, %v4737_v40  ;;  %v2762_v8 = vmul.f32 1.442695, %v4737_v40 }
0x235d   :  { %v2774_v62 = vsel %vm464_vm3, %v2773_v60, -inf  ;;  %3889 = vpow2.f32 %v2762_v8 }
0x235e   :  { %2775 = vmax.xlane.f32.xlu0 %v2774_v62  ;;  %3891 = vpow2.f32 %v462_v49 }
0x235f   :  { %3893 = vpow2.f32 %v1385_v25 }
0x2360   :  { %3895 = vpow2.f32 %v2303_v46 }
0x2367   :  { %v4754_v19 = vpop.eup %3889 }
0x2368   :  { %v2764_v21 = vsel %vm464_vm3, %v4754_v19, 0.0  ;;  %v3892_v31 = vpop.eup %3891 }
0x2369   :  { %v465_v5 = vsel %vm464_vm3, %v3892_v31, 0.0  ;;  %v3894_v32 = vpop.eup %3893 }
0x236a   :  { %v1387_v34 = vsel %vm464_vm3, %v3894_v32, 0.0  ;;  %v4763_v36 = vpop.eup %3895 }
0x236b   :  { %v2305_v37 = vsel %vm464_vm3, %v4763_v36, 0.0 }
0x23eb   :  { %v2776_v63 = vpop.xlane.xlu0 %2775 }
0x23ec   :  { %v2777_v56 = vrot.slane %v2776_v63, 4 }
0x23ee   :  { %v2778_v43 = vmax.f32 %v2776_v63, %v2777_v56 }
0x23f0   :  { %v2779_v2 = vrot.slane %v2778_v43, 2 }
0x23f2   :  { %v2780_v3 = vmax.f32 %v2778_v43, %v2779_v2 }
0x23f4   :  { %v2781_v4 = vrot.slane %v2780_v3, 1 }
0x23f6   :  { %v2782_v27 = vmax.f32 %v2780_v3, %v2781_v4 }
0x23f8   :  { %3611 = vpush %v2782_v27 }
0x2429   :  { %s3612_s6 = spop %3611 }
0x242a   :  { %v2784_v20 = vstv %s3612_s6 }
0x242b   :  { %vm2785_vm0 = vcmp.eq.f32.partialorder %v2773_v60, %v2784_v20 }
0x242c   :  { %v2786_v22 = vsel %vm2785_vm0, %v4212_v33, 128 }
0x242d   :  { %v2787_v11 = vsel %vm464_vm3, %v2786_v22, 2147483647 }
0x242e   :  { %v2789_v54 = vshra.s32 %v2787_v11, 16  ;;  %v2788_v61 = vand.u32 65535, %v2787_v11 }
0x2430   :  { %v2791_v13 = vcvt.s32.f32 %v2789_v54  ;;  %v2790_v29 = vcvt.s32.f32 %v2788_v61 }
0x2432   :  { %2792 = vmin.xlane.f32.xlu1 %v2791_v13 }
0x2436   :  { %929 = vadd.xlane.f32.xlu1 %v928_v15 }
0x243a   :  { %1847 = vadd.xlane.f32.xlu1 %v1846_v17 }
0x243e   :  { %2765 = vadd.xlane.f32.xlu1 %v2764_v21 }
0x24bf   :  { %v2793_v28 = vpop.xlane.xlu1 %2792 }
0x24c0   :  { %vm2794_vm15 = vcmp.eq.f32.partialorder %v2791_v13, %v2793_v28  ;;  %v2799_v42 = vcvt.f32.s32 %v2793_v28 }
0x24c1   :  { %v2795_v30 = vsel %vm2794_vm15, %v2790_v29, inf }
0x24c2   :  { %2796 = vmin.xlane.f32.xlu0 %v2795_v30  ;;  %v2800_v45 = vshll.u32 %v2799_v42, 16  ;;  %v513_v42 = vstv %s4277_s21 }
0x24c3   :  { %v930_v41 = vpop.xlane.xlu1 %929  ;;  %vm514_vm5 = vcmp.eq.s32.totalorder %v4212_v33, %v513_v42 }
0x24c4   :  { %3897 = vlog2.f32 %v930_v41 }
0x24c5   :  { %3899 = vrcp.f32 %v930_v41 }
0x24c6   :  { %466 = vadd.xlane.f32.xlu0 %v465_v5 }
0x24c7   :  { %v1848_v7 = vpop.xlane.xlu1 %1847 }
0x24c8   :  { %3901 = vlog2.f32 %v1848_v7 }
0x24ca   :  { %1388 = vadd.xlane.f32.xlu0 %v1387_v34 }
0x24cb   :  { %v2766_v1 = vpop.xlane.xlu1 %2765 }
0x24ce   :  { %2306 = vadd.xlane.f32.xlu0 %v2305_v37  ;;  %v3898_v51 = vpop.eup %3897 }
0x24cf   :  { %v3900_v58 = vpop.eup %3899  ;;  %v932_v38 = vmul.f32 0.6931472, %v3898_v51 }
0x24d0   :  { %v935_v8 = vmul.f32 %v3900_v58, %v4746_v14 }
0x24d1   :  { %v933_v4 = vsub.f32 %v4360_v39, %v932_v38 }
0x24d2   :  { %v3902_v59 = vpop.eup %3901 }
0x24d3   :  { %v1850_v2 = vmul.f32 0.6931472, %v3902_v59  ;;  %v982_v13 = vmul.f32 %v935_v8, %v933_v4 }
0x24d5   :  { %v1851_v54 = vsub.f32 %v4558_v12, %v1850_v2 }
0x254f   :  { %v2797_v44 = vpop.xlane.xlu0 %2796 }
0x2550   :  { %v2798_v47 = vcvt.f32.s32 %v2797_v44 }
0x2552   :  { %v2801_v24 = vadd.s32 %v2800_v45, %v2798_v47  ;;  %v1894_v45 = vstv %s4574_s13 }
0x2553   :  { %v467_v48 = vpop.xlane.xlu0 %466  ;;  %vm1895_vm8 = vcmp.eq.s32.totalorder %v4212_v33, %v1894_v45 }
0x2554   :  { %v2802_v50 = vrot.slane %v2801_v24, 4  ;;  %3903 = vlog2.f32 %v467_v48 }
0x2555   :  { %3905 = vrcp.f32 %v467_v48  ;;  %v2353_v48 = vstv %s4673_s17 }
0x2556   :  { %3907 = vrcp.f32 %v1848_v7  ;;  %vm2803_vm1 = vcmp.lt.s32.totalorder %v2801_v24, %v2802_v50  ;;  %v976_v7 = vstv %s4376_s5  ;;  %vm2354_vm9 = vcmp.eq.s32.totalorder %v4212_v33, %v2353_v48 }
0x2557   :  { %3909 = vlog2.f32 %v2766_v1  ;;  %v1389_v52 = vpop.xlane.xlu0 %1388  ;;  %v2804_v53 = vsel %vm2803_vm1, %v2801_v24, %v2802_v50  ;;  %vm977_vm6 = vcmp.eq.s32.totalorder %v4212_v33, %v976_v7 }
0x2558   :  { %3911 = vlog2.f32 %v1389_v52  ;;  %v2805_v10 = vrot.slane %v2804_v53, 2 }
0x2559   :  { %3913 = vrcp.f32 %v1389_v52  ;;  %v3006_v52 = vsel %vm1895_vm8, 1.0, %v4055_v0 }
0x255a   :  { %vm2806_vm2 = vcmp.lt.s32.totalorder %v2804_v53, %v2805_v10 }
0x255b   :  { %v2307_v26 = vpop.xlane.xlu0 %2306  ;;  %v2807_v55 = vsel %vm2806_vm2, %v2804_v53, %v2805_v10  ;;  %v1898_v53 = vmul.f32 %v3006_v52, %v1851_v54  ;;  %v3037_v10 = vsel %vm2354_vm9, 1.0, %v4055_v0 }
0x255c   :  { %3915 = vlog2.f32 %v2307_v26  ;;  %v2808_v18 = vrot.slane %v2807_v55, 1 }
0x255d   :  { %3917 = vrcp.f32 %v2307_v26 }
0x255e   :  { %v3904_v60 = vpop.eup %3903  ;;  %3919 = vrcp.f32 %v2766_v1  ;;  %vm2809_vm4 = vcmp.lt.s32.totalorder %v2807_v55, %v2808_v18 }
0x255f   :  { %v3906_v62 = vpop.eup %3905  ;;  %v469_v63 = vmul.f32 0.6931472, %v3904_v60  ;;  %v2810_v56 = vsel %vm2809_vm4, %v2807_v55, %v2808_v18 }
0x2560   :  { %v3908_v43 = vpop.eup %3907  ;;  %3613 = vpush %v2810_v56  ;;  %v472_v6 = vmul.f32 %v3906_v62, %v3892_v31 }
0x2561   :  { %v3910_v3 = vpop.eup %3909  ;;  %v470_v27 = vsub.f32 %v4261_v23, %v469_v63  ;;  %v1853_v25 = vmul.f32 %v3908_v43, %v4750_v16 }
0x2562   :  { %v3912_v9 = vpop.eup %3911  ;;  %v2768_v15 = vmul.f32 0.6931472, %v3910_v3 }
0x2563   :  { %v3914_v20 = vpop.eup %3913  ;;  %v519_v22 = vmul.f32 %v472_v6, %v470_v27  ;;  %v1391_v11 = vmul.f32 0.6931472, %v3912_v9  ;;  %v1900_v14 = vmul.f32 %v1853_v25, %v1851_v54 }
0x2564   :  { %v1394_v21 = vmul.f32 %v3914_v20, %v3894_v32 }
0x2565   :  { %v1392_v17 = vsub.f32 %v4459_v57, %v1391_v11  ;;  %v983_v46 = vadd.f32 %v982_v13, %v519_v22  ;;  %v2769_v57 = vsub.f32 %v4737_v40, %v2768_v15  ;;  %v2913_v40 = vsel %vm514_vm5, 1.0, %v4055_v0 }
0x2566   :  { %v3916_v49 = vpop.eup %3915 }
0x2567   :  { %v3918_v39 = vpop.eup %3917  ;;  %v1441_v61 = vmul.f32 %v1394_v21, %v1392_v17  ;;  %v2309_v23 = vmul.f32 0.6931472, %v3916_v49 }
0x2568   :  { %v3920_v28 = vpop.eup %3919  ;;  %v2312_v30 = vmul.f32 %v3918_v39, %v4763_v36  ;;  %v2944_v36 = vsel %vm977_vm6, 1.0, %v4055_v0 }
0x2569   :  { %v2310_v29 = vsub.f32 %v4657_v35, %v2309_v23  ;;  %v1442_v12 = vadd.f32 %v1441_v61, %v983_v46  ;;  %v2771_v16 = vmul.f32 %v3920_v28, %v4754_v19  ;;  %v1435_v35 = vstv %s4475_s18 }
0x256a   :  { %vm1436_vm7 = vcmp.eq.s32.totalorder %v4212_v33, %v1435_v35  ;;  %v517_v19 = vmul.f32 %v2913_v40, %v470_v27  ;;  %v980_v47 = vmul.f32 %v2944_v36, %v933_v4 }
0x256b   :  { %v1901_v31 = vadd.f32 %v1900_v14, %v1442_v12  ;;  %v2359_v5 = vmul.f32 %v2312_v30, %v2310_v29  ;;  %v2818_v34 = vmul.f32 %v2771_v16, %v2769_v57  ;;  %v2975_v44 = vsel %vm1436_vm7, 1.0, %v4055_v0 }
0x256c   :  { %v1439_v24 = vmul.f32 %v2975_v44, %v1392_v17  ;;  %v981_v1 = vadd.f32 %v980_v47, %v517_v19  ;;  %v2357_v26 = vmul.f32 %v3037_v10, %v2310_v29 }
0x256d   :  { %v2360_v32 = vadd.f32 %v2359_v5, %v1901_v31 }
0x256e   :  { %v1440_v50 = vadd.f32 %v1439_v24, %v981_v1 }
0x256f   :  { %v2819_v37 = vadd.f32 %v2818_v34, %v2360_v32 }
0x2570   :  { %v1899_v51 = vadd.f32 %v1898_v53, %v1440_v50 }
0x2571   :  { %v2834_v41 = vsel %vm464_vm3, %v2819_v37, 0.0 }
0x2572   :  { %2835 = vadd.xlane.f32.xlu1 %v2834_v41  ;;  %v2358_v18 = vadd.f32 %v2357_v26, %v1899_v51 }
0x2591   :  { %s3614_s8 = spop %3613 }
0x2592   :  { %v2812_v55 = vstv %s3614_s8  ;;  %2821 = sst [smem:[#allocation13 + $0x5]] %s3614_s8 }
0x2593   :  { %vm2813_vm10 = vcmp.eq.s32.totalorder %v4212_v33, %v2812_v55 }
0x2594   :  { %v3068_v58 = vsel %vm2813_vm10, 1.0, %v4055_v0 }
0x2595   :  { %v2816_v59 = vmul.f32 %v3068_v58, %v2769_v57 }
0x2597   :  { %v2817_v38 = vadd.f32 %v2816_v59, %v2358_v18 }
0x2599   :  { %v2822_v60 = vsel %vm464_vm3, %v2817_v38, 0.0 }
0x259a   :  { %2823 = vadd.xlane.f32.xlu0 %v2822_v60 }
0x25ff   :  { %v2836_v62 = vpop.xlane.xlu1 %2835 }
0x2600   :  { %v2837_v63 = vrot.slane %v2836_v62, 4 }
0x2602   :  { %v2838_v56 = vadd.f32 %v2837_v63, %v2836_v62 }
0x2604   :  { %v2839_v43 = vrot.slane %v2838_v56, 2 }
0x2606   :  { %v2840_v27 = vadd.f32 %v2839_v43, %v2838_v56 }
0x2608   :  { %v2841_v20 = vrot.slane %v2840_v27, 1 }
0x260a   :  { %v2842_v0 = vadd.f32 %v2841_v20, %v2840_v27 }
0x2627   :  { %v2824_v2 = vpop.xlane.xlu0 %2823 }
0x2628   :  { %v2825_v3 = vrot.slane %v2824_v2, 4 }
0x262a   :  { %v2826_v4 = vadd.f32 %v2825_v3, %v2824_v2 }
0x262c   :  { %v2827_v6 = vrot.slane %v2826_v4, 2 }
0x262e   :  { %v2828_v9 = vadd.f32 %v2827_v6, %v2826_v4 }
0x2630   :  { %v2829_v33 = vrot.slane %v2828_v9, 1 }
0x2632   :  { %v2830_v8 = vadd.f32 %v2829_v33, %v2828_v9 }
0x2634   :  { %3615 = vpush %v2830_v8 }
0x2635   :  { %3617 = vpush %v2842_v0 }
0x2665   :  { %s3616_s21 = spop %3615 }
0x2666   :  { %2833 = sst [smem:[#allocation10]] %s3616_s21  ;;  %s3618_s5 = spop %3617 }
0x2667   :  { %s2844_s18 = ssub.f32 0.0, %s3618_s5 }
0x2668   :  { %4018 = shalt.err (!%p4015_p3)
}
0x2669   :  { %s4060_s28 = smov [#allocation10]   ;;  %2846 = sst [smem:[#allocation11]] %s2844_s18 }
0x266a   :  { %2854 = dma.smem_to_hbm %s4060_s28, 16, %s4841_s9, [#allocation4]  }
0x266b   :  { %s4019_s20 = scalar_lea.hbm %s4842_s10, 16 }
0x266c   :  { %p4020_p4 = scmp.ne.s32.totalorder %s4842_s10, %s4019_s20  ;;  %p4023_p5 = scmp.lt.u32.totalorder %s4019_s20, %s4842_s10 }
0x266e   :  { %p4025_p6 = pnand %p4023_p5, %p4020_p4 }
0x2670   :  { %4028 = shalt.err (!%p4025_p6)
}
0x2671   :  { %s4061_s2 = smov [#allocation11]   ;;  %s4029_s30 = scalar_lea.hbm %s4843_s11, 16 }
0x2672   :  { %2862 = dma.smem_to_hbm %s4061_s2, 16, %s4842_s10, [#allocation12]  }
0x2673   :  { %p4030_p7 = scmp.ne.s32.totalorder %s4843_s11, %s4029_s30  ;;  %p4033_p8 = scmp.lt.u32.totalorder %s4029_s30, %s4843_s11 }
0x2675   :  { %p4035_p9 = pnand %p4033_p8, %p4030_p7 }
0x2677   :  { %4038 = shalt.err (!%p4035_p9)
}
0x2678   :  { %s4062_s5 = smov [#allocation13]  }
0x2679   :  { %2870 = dma.smem_to_hbm %s4062_s5, 16, %s4843_s11, [#allocation12]  }
0x267a   :  { %4045 = dma.done.wait [#allocation4], 16  }
0x267b   :  { %4046 = vsyncadd [#allocation4], 4294967280 }
0x267c   :  { %4047 = dma.done.wait [#allocation12], 32  }
0x267d   :  { %4048 = vsyncadd [#allocation12], 4294967264 }
0x267e   :  { %2880 = sfence }
0x267f   :  { %2881 = vsyncpa [#allocation3], 1 }
0x2680   :  { %2882 = vsyncpa [#allocation6], 1 }
0x2681   :  { %2883 = vsyncpa [#allocation9], 1 }
0x2682   :  { %2884 = vsyncpa [#allocation4], 1 }
0x2683   :  { %2885 = vsyncpa [#allocation12], 1 }

</bundles_post_ra>
